<compile_context>
chip_gen: v5e
topology: v5e:2x2
jax: 0.10.0
libtpu: 0.0.40
codegen_flags: <defaults>
</compile_context>

<pallas_src>
import math

import jax
import jax.numpy as jnp
from jax.experimental import pallas as pl
from jax.experimental.pallas import tpu as pltpu

HIDDEN = 32          # per-modality hidden size
NMOD = 3             # language, vision, acoustic
HP = 128             # stacked hidden width  [h_l | h_v | h_a | pad]
G4 = 4 * HP          # stacked gate width    [i | f | g | o] x HP lanes
PB = 8               # batch padded to one full sublane group
LN_EPS = 1e-5
NEG_INF = -1e30

# bias-slab row indices
(_B_GAMMA, _B_BETA, _B_D, _B_BT, _B_EFF, _B_DU, _B_12, _B_HEAD, _B_RELU) = range(9)
# w128-slab block indices (each block is HP sublane rows)
(_W_AVG, _W_D, _W_BT, _W_EFF, _W_EUNI, _W_EBI, _W_SUNI, _W_SBI,
 _W_DU, _W_12, _W_HEAD) = range(11)
_N_WBLK = 11


# ----------------------------------------------------------------------------
# Single fused kernel: stacked LSTM recurrence + per-modality LayerNorm +
# Dl/Dv/Da + Dynamic Fusion Graph + multi-view gated memory + both heads.
# ----------------------------------------------------------------------------
def graph_mfn_kernel(x_ref, w512_ref, w128_ref, b_ref, out_ref):
    f32 = jnp.float32
    H = HIDDEN
    T = x_ref.shape[0] // PB

    def wblk(i):                                  # [HP,128] tile-aligned slab slice
        return w128_ref[i * HP:(i + 1) * HP, :]

    def brow(i):                                  # [1,128] bias / constant row
        return b_ref[i:i + 1, :]

    # NaN / Inf -> 0 scrubbing (same effect as the PyTorch in-place masking).
    x = x_ref[...]
    x = jnp.where(jnp.isfinite(x), x, 0.0)

    # Hoisted input projection; the combined LSTM bias is folded into wih through the
    # constant-1.0 input column, so the per-step gate math is xw[t] + h @ whh only.
    wih = w512_ref[0:HP, :]
    whh = w512_ref[HP:2 * HP, :]
    xw = jnp.dot(x, wih, preferred_element_type=f32)         # [T*PB, G4]

    h = jnp.zeros((PB, HP), f32)
    c = jnp.zeros((PB, HP), f32)
    for t in range(T):                            # fully unrolled (T static, small)
        gates = xw[t * PB:(t + 1) * PB, :] + jnp.dot(h, whh, preferred_element_type=f32)
        i_g = jax.nn.sigmoid(gates[:, 0 * HP:1 * HP])         # full 128-lane slices
        f_g = jax.nn.sigmoid(gates[:, 1 * HP:2 * HP])
        g_g = jnp.tanh(gates[:, 2 * HP:3 * HP])
        o_g = jax.nn.sigmoid(gates[:, 3 * HP:4 * HP])
        c = f_g * c + i_g * g_g
        h = o_g * jnp.tanh(c)

    # Block-wise LayerNorm (one per modality, eps=1e-5) via precomputed averaging matrix.
    avg = wblk(_W_AVG)
    mean = jnp.dot(h, avg, preferred_element_type=f32)
    diff = h - mean
    var = jnp.dot(diff * diff, avg, preferred_element_type=f32)
    h_ln = diff * jax.lax.rsqrt(var + LN_EPS) * brow(_B_GAMMA) + brow(_B_BETA)

    # Dropout = identity (inference).  Dl / Dv / Da as one block-diagonal matmul.
    lva = jnp.tanh(jnp.dot(h_ln, wblk(_W_D), preferred_element_type=f32) + brow(_B_D))

    # TODO(synk): DynamicFusionGraph's definition was not provided with the reference
    # module; implemented as the canonical DFG: bimodal + trimodal vertices
    # tanh(Linear(concat)) combined with softmax efficacies.  All concats are folded
    # into zero-padded weights at pack time; pad efficacy lanes carry a -1e30 bias so
    # the softmax ignores them exactly.
    bt = jnp.tanh(jnp.dot(lva, wblk(_W_BT), preferred_element_type=f32) + brow(_B_BT))
    eff = jax.nn.softmax(
        jnp.dot(lva, wblk(_W_EFF), preferred_element_type=f32) + brow(_B_EFF), axis=-1)

    # Weighted sum over vertices (l,v,a,lv,la,va,tri) via precomputed expand/collapse.
    wu = lva * jnp.dot(eff, wblk(_W_EUNI), preferred_element_type=f32)
    wb = bt * jnp.dot(eff, wblk(_W_EBI), preferred_element_type=f32)
    tt = (jnp.dot(wu, wblk(_W_SUNI), preferred_element_type=f32)
          + jnp.dot(wb, wblk(_W_SBI), preferred_element_type=f32))   # lanes 0:H real, rest 0

    # Multi-view gated memory; D1|D2 fused in one matmul, combined with an XLU roll.
    ut = jnp.dot(tt, wblk(_W_DU), preferred_element_type=f32) + brow(_B_DU)
    g = jax.nn.sigmoid(jnp.dot(ut, wblk(_W_12), preferred_element_type=f32) + brow(_B_12))
    tu = tt + pltpu.roll(ut, shift=HIDDEN, axis=1)       # lanes [ Tt | ut | 0 ... ]
    prod = g * tu                                        # [ retain*Tt | update*ut | 0 ]
    final = prod + pltpu.roll(prod, shift=HP - HIDDEN, axis=1)   # lanes 0:H = memory

    # Packed heads: lane 0 = sentiment (linear), lanes 1..6 = emotions (ReLU); zero
    # rows >= H of the head weights kill the junk lanes of `final`.
    raw = jnp.dot(final, wblk(_W_HEAD), preferred_element_type=f32) + brow(_B_HEAD)
    out_ref[...] = jnp.where(brow(_B_RELU) > 0.0, jnp.maximum(raw, 0.0), raw)


# ----------------------------------------------------------------------------
# Wrapper: time-major, sublane/lane-padded activations; single fused pallas_call.
# ----------------------------------------------------------------------------
def graph_mfn_forward(language, vision, acoustic, packed, dpad):
    w512, w128, b_slab = packed
    B, T = language.shape[0], language.shape[1]
    assert B <= PB, "pad-batch scheme assumes B <= 8; add a batch grid for larger B"
    Dc = NMOD * dpad

    xs = []
    for xm in (language, vision, acoustic):
        pad = dpad - xm.shape[-1]
        xp = jnp.pad(xm, ((0, 0), (0, 0), (0, pad)))
        xs.append(jnp.transpose(xp, (1, 0, 2)))                 # [T, B, dpad]
    x_cat = jnp.concatenate(xs, axis=-1).astype(jnp.float32)    # [T, B, Dc]

    # Time-major, batch padded to PB sublanes, features lane-padded to 128, with a
    # constant-1.0 column at index Dc that drives the folded LSTM bias row of wih.
    x_pad = jnp.zeros((T, PB, HP), jnp.float32)
    x_pad = x_pad.at[:, :B, :Dc].set(x_cat)
    x_pad = x_pad.at[:, :, Dc].set(1.0)
    x2d = x_pad.reshape(T * PB, HP)                             # [T*PB, 128]

    flops = 2 * (2 * T * PB * HP * G4) + 2 * 13 * PB * HP * HP
    transcendentals = (5 * T + 8) * PB * HP
    bytes_accessed = 4 * (x2d.size + w512.size + w128.size + b_slab.size + PB * HP)

    vmem = pl.BlockSpec(memory_space=pltpu.MemorySpace.VMEM)
    out = pl.pallas_call(
        graph_mfn_kernel,
        out_shape=jax.ShapeDtypeStruct((PB, HP), jnp.float32),
        in_specs=[vmem, vmem, vmem, vmem],
        out_specs=vmem,
        cost_estimate=pl.CostEstimate(flops=flops, transcendentals=transcendentals,
                                      bytes_accessed=bytes_accessed),
    )(x2d, w512, w128, b_slab)
    return out[:B, 0:1], out[:B, 1:7]


# ----------------------------------------------------------------------------
# Deterministic parameter construction (matches the module's __init__ shapes).
# ----------------------------------------------------------------------------
def linear_params(key, in_dim, out_dim):
    k1, k2 = jax.random.split(key)
    bound = 1.0 / math.sqrt(in_dim)
    w = jax.random.uniform(k1, (in_dim, out_dim), jnp.float32, -bound, bound)
    b = jax.random.uniform(k2, (1, out_dim), jnp.float32, -bound, bound)
    return w, b


def lstm_params(key, in_dim, hidden):
    k1, k2 = jax.random.split(key)
    ortho = jax.nn.initializers.orthogonal()
    wih = ortho(k1, (in_dim, 4 * hidden), jnp.float32)      # [in, 4H], gates i,f,g,o
    whh = ortho(k2, (hidden, 4 * hidden), jnp.float32)      # [H, 4H]
    # b_ih and b_hh are zero with the forget-gate slice set to 1 -> combined = 2.
    b = jnp.zeros((1, 4 * hidden), jnp.float32).at[:, hidden:2 * hidden].set(2.0)
    return wih, whh, b


# ----------------------------------------------------------------------------
# Pack-time assembly of the three slabs the fused kernel consumes.
# ----------------------------------------------------------------------------
def pack_parameters(lstms, lns, fusion, dpad):
    H = HIDDEN
    Dc = NMOD * dpad
    f32 = jnp.float32

    # --- recurrence slab [2*HP, G4]: rows 0:HP wih (bias row at Dc), HP:2*HP whh.
    wih_big = jnp.zeros((HP, G4), f32)
    whh_big = jnp.zeros((HP, G4), f32)
    b_big = jnp.zeros((G4,), f32)
    for m, (wih, whh, b) in enumerate(lstms):
        din = wih.shape[0]
        for gi in range(4):                     # gate groups i, f, g, o
            c0 = gi * HP + m * H
            wih_big = wih_big.at[m * dpad:m * dpad + din, c0:c0 + H].set(
                wih[:, gi * H:(gi + 1) * H])
            whh_big = whh_big.at[m * H:(m + 1) * H, c0:c0 + H].set(
                whh[:, gi * H:(gi + 1) * H])
            b_big = b_big.at[c0:c0 + H].set(b[0, gi * H:(gi + 1) * H])
    wih_big = wih_big.at[Dc, :].set(b_big)      # bias folded via x[:, Dc] == 1.0
    w512 = jnp.concatenate([wih_big, whh_big], axis=0)          # [256, 512]

    (dl_w, dl_b, dv_w, dv_b, da_w, da_b,
     wlv, blv, wla, bla, wva, bva, wtri, btri, weff, beff,
     du_w, du_b, d1_w, d1_b, d2_w, d2_b,
     sent_w, sent_b, emo_w, emo_b) = fusion

    lane = jnp.arange(HP)
    row = lane[:, None]
    col = lane[None, :]

    # LayerNorm block-averaging matrix (1/H inside each modality block, 0 on padding).
    avg = ((row // H == col // H) & (row < NMOD * H)).astype(f32) * (1.0 / H)

    # Block-diagonal Dl / Dv / Da.
    wd_bd = jnp.zeros((HP, HP), f32)
    bd_cat = jnp.zeros((HP,), f32)
    for m, (w, b) in enumerate(((dl_w, dl_b), (dv_w, dv_b), (da_w, da_b))):
        wd_bd = wd_bd.at[m * H:(m + 1) * H, m * H:(m + 1) * H].set(w)
        bd_cat = bd_cat.at[m * H:(m + 1) * H].set(b[0])

    # DFG bimodal + trimodal vertex weights, cols [lv | la | va | tri].
    w_bt = jnp.zeros((HP, HP), f32)
    w_bt = w_bt.at[0 * H:1 * H, 0 * H:1 * H].set(wlv[0:H])       # lv <- l
    w_bt = w_bt.at[1 * H:2 * H, 0 * H:1 * H].set(wlv[H:2 * H])   # lv <- v
    w_bt = w_bt.at[0 * H:1 * H, 1 * H:2 * H].set(wla[0:H])       # la <- l
    w_bt = w_bt.at[2 * H:3 * H, 1 * H:2 * H].set(wla[H:2 * H])   # la <- a
    w_bt = w_bt.at[1 * H:2 * H, 2 * H:3 * H].set(wva[0:H])       # va <- v
    w_bt = w_bt.at[2 * H:3 * H, 2 * H:3 * H].set(wva[H:2 * H])   # va <- a
    w_bt = w_bt.at[0:3 * H, 3 * H:4 * H].set(wtri)               # tri <- l,v,a
    b_bt = jnp.concatenate([blv[0], bla[0], bva[0], btri[0]])

    # Efficacy projection (7 logits); pad lanes get -1e30 bias so softmax ignores them.
    w_eff = jnp.zeros((HP, HP), f32).at[0:3 * H, 0:7].set(weff)
    b_eff = jnp.full((HP,), NEG_INF, f32).at[0:7].set(beff[0])

    # Expand efficacy lanes onto 32-lane vertex blocks / collapse blocks to H lanes.
    e_uni = ((row < NMOD) & (col // H == row)).astype(f32)
    e_bi = ((row >= NMOD) & (row < 7) & (col // H == row - NMOD)).astype(f32)
    s_uni = ((col == row % H) & (row < NMOD * H)).astype(f32)
    s_bi = (col == row % H).astype(f32)

    # Gated memory: Du, fused [D1 | D2], packed heads — embedded in 128x128 blocks.
    du_blk = jnp.zeros((HP, HP), f32).at[0:H, 0:H].set(du_w)
    b_du = jnp.zeros((HP,), f32).at[0:H].set(du_b[0])
    w12_blk = (jnp.zeros((HP, HP), f32)
               .at[0:H, 0:H].set(d1_w)
               .at[0:H, H:2 * H].set(d2_w))
    b_12 = jnp.zeros((HP,), f32).at[0:H].set(d1_b[0]).at[H:2 * H].set(d2_b[0])
    w_head = (jnp.zeros((HP, HP), f32)
              .at[0:H, 0:1].set(sent_w)
              .at[0:H, 1:7].set(emo_w))
    b_head = jnp.zeros((HP,), f32).at[0:1].set(sent_b[0]).at[1:7].set(emo_b[0])
    relu_mask = jnp.ones((HP,), f32).at[0].set(0.0)

    w128 = jnp.concatenate([avg, wd_bd, w_bt, w_eff, e_uni, e_bi, s_uni, s_bi,
                            du_blk, w12_blk, w_head], axis=0)    # [11*128, 128]
    assert w128.shape[0] == _N_WBLK * HP

    # LayerNorm gamma / beta (pad lanes zero -> pad lanes of h_ln stay exactly zero).
    gamma = jnp.zeros((HP,), f32)
    beta = jnp.zeros((HP,), f32)
    for m, (g, bta) in enumerate(lns):
        gamma = gamma.at[m * H:(m + 1) * H].set(g[0])
        beta = beta.at[m * H:(m + 1) * H].set(bta[0])

    b_slab = jnp.zeros((16, HP), f32)
    for idx, vec in ((_B_GAMMA, gamma), (_B_BETA, beta), (_B_D, bd_cat), (_B_BT, b_bt),
                     (_B_EFF, b_eff), (_B_DU, b_du), (_B_12, b_12), (_B_HEAD, b_head),
                     (_B_RELU, relu_mask)):
        b_slab = b_slab.at[idx].set(vec)

    return w512, w128, b_slab


if __name__ == "__main__":
    B, T = 2, 8
    input_dims = [16, 12, 8]          # [language, vision, acoustic]
    H = HIDDEN
    dpad = max(input_dims)

    root = jax.random.PRNGKey(0)
    keys = jax.random.split(root, 24)

    lstms = [lstm_params(keys[0], input_dims[0], H),
             lstm_params(keys[1], input_dims[1], H),
             lstm_params(keys[2], input_dims[2], H)]
    lns = [(jnp.ones((1, H), jnp.float32), jnp.zeros((1, H), jnp.float32))
           for _ in range(NMOD)]

    dl = linear_params(keys[3], H, H)
    dv = linear_params(keys[4], H, H)
    da = linear_params(keys[5], H, H)
    wlv, blv = linear_params(keys[6], 2 * H, H)
    wla, bla = linear_params(keys[7], 2 * H, H)
    wva, bva = linear_params(keys[8], 2 * H, H)
    wtri, btri = linear_params(keys[9], 3 * H, H)
    weff, beff = linear_params(keys[10], 3 * H, 7)
    du = linear_params(keys[11], H, H)
    d1 = linear_params(keys[12], H, H)
    d2 = linear_params(keys[13], H, H)
    sent = linear_params(keys[14], H, 1)
    emo = linear_params(keys[15], H, 6)

    fusion = (dl[0], dl[1], dv[0], dv[1], da[0], da[1],
              wlv, blv, wla, bla, wva, bva, wtri, btri, weff, beff,
              du[0], du[1], d1[0], d1[1], d2[0], d2[1],
              sent[0], sent[1], emo[0], emo[1])

    packed = pack_parameters(lstms, lns, fusion, dpad)

    language = jax.random.normal(keys[16], (B, T, input_dims[0]), jnp.float32)
    vision = jax.random.normal(keys[17], (B, T, input_dims[1]), jnp.float32)
    acoustic = jax.random.normal(keys[18], (B, T, input_dims[2]), jnp.float32)
    # poke a NaN / Inf to exercise the in-kernel sanitization path
    language = language.at[0, 0, 0].set(jnp.nan)
    vision = vision.at[1, 2, 3].set(jnp.inf)

    fwd = jax.jit(lambda l, v, a, p: graph_mfn_forward(l, v, a, p, dpad))
    sentiment, emotion = fwd(language, vision, acoustic, packed)
    jax.block_until_ready((sentiment, emotion))

    assert sentiment.shape == (B, 1) and emotion.shape == (B, 6)
    assert bool(jnp.all(jnp.isfinite(sentiment))) and bool(jnp.all(jnp.isfinite(emotion)))
    print("KERNEL_OK")
</pallas_src>

<mosaic_0001>
module attributes {stable_mosaic.version = 11 : i64} {
  func.func @graph_mfn_kernel(%arg0: memref<64x128xf32, #tpu.memory_space<vmem>>, %arg1: memref<256x512xf32, #tpu.memory_space<vmem>>, %arg2: memref<1408x128xf32, #tpu.memory_space<vmem>>, %arg3: memref<16x128xf32, #tpu.memory_space<vmem>>, %arg4: memref<8x128xf32, #tpu.memory_space<vmem>>) attributes {dimension_semantics = [], scalar_prefetch = 0 : i64, scratch_operands = 0 : i64, tpu.core_type = #tpu.core_type<tc>} {
    %c0 = arith.constant 0 : index
    %c0_0 = arith.constant 0 : index
    %0 = vector.load %arg0[%c0, %c0_0] : memref<64x128xf32, #tpu.memory_space<vmem>>, vector<64x128xf32>
    %1 = tpu.weird %0 : vector<64x128xf32> -> vector<64x128xi1>
    %cst = arith.constant dense<true> : vector<64x128xi1>
    %2 = arith.xori %1, %cst : vector<64x128xi1>
    %cst_1 = arith.constant 0.000000e+00 : f32
    %3 = vector.broadcast %cst_1 : f32 to vector<64x128xf32>
    %4 = arith.select %2, %0, %3 : vector<64x128xi1>, vector<64x128xf32>
    %c0_2 = arith.constant 0 : index
    %c0_3 = arith.constant 0 : index
    %5 = vector.load %arg1[%c0_2, %c0_3] : memref<256x512xf32, #tpu.memory_space<vmem>>, vector<128x512xf32>
    %c128 = arith.constant 128 : index
    %c0_4 = arith.constant 0 : index
    %6 = vector.load %arg1[%c128, %c0_4] : memref<256x512xf32, #tpu.memory_space<vmem>>, vector<128x512xf32>
    %cst_5 = arith.constant dense<0.000000e+00> : vector<64x512xf32>
    %7 = tpu.matmul %4, %5, %cst_5 {dimension_numbers = #tpu.dot_dimension_numbers<[1], [0], [0], [1], [0, 0, 1, 1], [], []>} : vector<64x128xf32>, vector<128x512xf32>, vector<64x512xf32> -> vector<64x512xf32>
    %cst_6 = arith.constant 0.000000e+00 : f32
    %8 = vector.broadcast %cst_6 : f32 to vector<8x128xf32>
    %cst_7 = arith.constant 0.000000e+00 : f32
    %9 = vector.broadcast %cst_7 : f32 to vector<8x128xf32>
    %10 = vector.extract_strided_slice %7 {offsets = [0, 0], sizes = [8, 512], strides = [1, 1]} : vector<64x512xf32> to vector<8x512xf32>
    %cst_8 = arith.constant dense<0.000000e+00> : vector<8x512xf32>
    %11 = tpu.matmul %8, %6, %cst_8 {dimension_numbers = #tpu.dot_dimension_numbers<[1], [0], [0], [1], [0, 0, 1, 1], [], []>} : vector<8x128xf32>, vector<128x512xf32>, vector<8x512xf32> -> vector<8x512xf32>
    %12 = arith.addf %10, %11 : vector<8x512xf32>
    %13 = vector.extract_strided_slice %12 {offsets = [0, 0], sizes = [8, 128], strides = [1, 1]} : vector<8x512xf32> to vector<8x128xf32>
    %14 = arith.negf %13 : vector<8x128xf32>
    %15 = math.exp %14 : vector<8x128xf32>
    %cst_9 = arith.constant 1.000000e+00 : f32
    %16 = vector.broadcast %cst_9 : f32 to vector<8x128xf32>
    %17 = arith.addf %16, %15 : vector<8x128xf32>
    %18 = arith.divf %16, %17 : vector<8x128xf32>
    %19 = vector.extract_strided_slice %12 {offsets = [0, 128], sizes = [8, 128], strides = [1, 1]} : vector<8x512xf32> to vector<8x128xf32>
    %20 = arith.negf %19 : vector<8x128xf32>
    %21 = math.exp %20 : vector<8x128xf32>
    %cst_10 = arith.constant 1.000000e+00 : f32
    %22 = vector.broadcast %cst_10 : f32 to vector<8x128xf32>
    %23 = arith.addf %22, %21 : vector<8x128xf32>
    %24 = arith.divf %22, %23 : vector<8x128xf32>
    %25 = vector.extract_strided_slice %12 {offsets = [0, 256], sizes = [8, 128], strides = [1, 1]} : vector<8x512xf32> to vector<8x128xf32>
    %26 = math.tanh %25 : vector<8x128xf32>
    %27 = vector.extract_strided_slice %12 {offsets = [0, 384], sizes = [8, 128], strides = [1, 1]} : vector<8x512xf32> to vector<8x128xf32>
    %28 = arith.negf %27 : vector<8x128xf32>
    %29 = math.exp %28 : vector<8x128xf32>
    %cst_11 = arith.constant 1.000000e+00 : f32
    %30 = vector.broadcast %cst_11 : f32 to vector<8x128xf32>
    %31 = arith.addf %30, %29 : vector<8x128xf32>
    %32 = arith.divf %30, %31 : vector<8x128xf32>
    %33 = arith.mulf %24, %9 : vector<8x128xf32>
    %34 = arith.mulf %18, %26 : vector<8x128xf32>
    %35 = arith.addf %33, %34 : vector<8x128xf32>
    %36 = math.tanh %35 : vector<8x128xf32>
    %37 = arith.mulf %32, %36 : vector<8x128xf32>
    %38 = vector.extract_strided_slice %7 {offsets = [8, 0], sizes = [8, 512], strides = [1, 1]} : vector<64x512xf32> to vector<8x512xf32>
    %cst_12 = arith.constant dense<0.000000e+00> : vector<8x512xf32>
    %39 = tpu.matmul %37, %6, %cst_12 {dimension_numbers = #tpu.dot_dimension_numbers<[1], [0], [0], [1], [0, 0, 1, 1], [], []>} : vector<8x128xf32>, vector<128x512xf32>, vector<8x512xf32> -> vector<8x512xf32>
    %40 = arith.addf %38, %39 : vector<8x512xf32>
    %41 = vector.extract_strided_slice %40 {offsets = [0, 0], sizes = [8, 128], strides = [1, 1]} : vector<8x512xf32> to vector<8x128xf32>
    %42 = arith.negf %41 : vector<8x128xf32>
    %43 = math.exp %42 : vector<8x128xf32>
    %cst_13 = arith.constant 1.000000e+00 : f32
    %44 = vector.broadcast %cst_13 : f32 to vector<8x128xf32>
    %45 = arith.addf %44, %43 : vector<8x128xf32>
    %46 = arith.divf %44, %45 : vector<8x128xf32>
    %47 = vector.extract_strided_slice %40 {offsets = [0, 128], sizes = [8, 128], strides = [1, 1]} : vector<8x512xf32> to vector<8x128xf32>
    %48 = arith.negf %47 : vector<8x128xf32>
    %49 = math.exp %48 : vector<8x128xf32>
    %cst_14 = arith.constant 1.000000e+00 : f32
    %50 = vector.broadcast %cst_14 : f32 to vector<8x128xf32>
    %51 = arith.addf %50, %49 : vector<8x128xf32>
    %52 = arith.divf %50, %51 : vector<8x128xf32>
    %53 = vector.extract_strided_slice %40 {offsets = [0, 256], sizes = [8, 128], strides = [1, 1]} : vector<8x512xf32> to vector<8x128xf32>
    %54 = math.tanh %53 : vector<8x128xf32>
    %55 = vector.extract_strided_slice %40 {offsets = [0, 384], sizes = [8, 128], strides = [1, 1]} : vector<8x512xf32> to vector<8x128xf32>
    %56 = arith.negf %55 : vector<8x128xf32>
    %57 = math.exp %56 : vector<8x128xf32>
    %cst_15 = arith.constant 1.000000e+00 : f32
    %58 = vector.broadcast %cst_15 : f32 to vector<8x128xf32>
    %59 = arith.addf %58, %57 : vector<8x128xf32>
    %60 = arith.divf %58, %59 : vector<8x128xf32>
    %61 = arith.mulf %52, %35 : vector<8x128xf32>
    %62 = arith.mulf %46, %54 : vector<8x128xf32>
    %63 = arith.addf %61, %62 : vector<8x128xf32>
    %64 = math.tanh %63 : vector<8x128xf32>
    %65 = arith.mulf %60, %64 : vector<8x128xf32>
    %66 = vector.extract_strided_slice %7 {offsets = [16, 0], sizes = [8, 512], strides = [1, 1]} : vector<64x512xf32> to vector<8x512xf32>
    %cst_16 = arith.constant dense<0.000000e+00> : vector<8x512xf32>
    %67 = tpu.matmul %65, %6, %cst_16 {dimension_numbers = #tpu.dot_dimension_numbers<[1], [0], [0], [1], [0, 0, 1, 1], [], []>} : vector<8x128xf32>, vector<128x512xf32>, vector<8x512xf32> -> vector<8x512xf32>
    %68 = arith.addf %66, %67 : vector<8x512xf32>
    %69 = vector.extract_strided_slice %68 {offsets = [0, 0], sizes = [8, 128], strides = [1, 1]} : vector<8x512xf32> to vector<8x128xf32>
    %70 = arith.negf %69 : vector<8x128xf32>
    %71 = math.exp %70 : vector<8x128xf32>
    %cst_17 = arith.constant 1.000000e+00 : f32
    %72 = vector.broadcast %cst_17 : f32 to vector<8x128xf32>
    %73 = arith.addf %72, %71 : vector<8x128xf32>
    %74 = arith.divf %72, %73 : vector<8x128xf32>
    %75 = vector.extract_strided_slice %68 {offsets = [0, 128], sizes = [8, 128], strides = [1, 1]} : vector<8x512xf32> to vector<8x128xf32>
    %76 = arith.negf %75 : vector<8x128xf32>
    %77 = math.exp %76 : vector<8x128xf32>
    %cst_18 = arith.constant 1.000000e+00 : f32
    %78 = vector.broadcast %cst_18 : f32 to vector<8x128xf32>
    %79 = arith.addf %78, %77 : vector<8x128xf32>
    %80 = arith.divf %78, %79 : vector<8x128xf32>
    %81 = vector.extract_strided_slice %68 {offsets = [0, 256], sizes = [8, 128], strides = [1, 1]} : vector<8x512xf32> to vector<8x128xf32>
    %82 = math.tanh %81 : vector<8x128xf32>
    %83 = vector.extract_strided_slice %68 {offsets = [0, 384], sizes = [8, 128], strides = [1, 1]} : vector<8x512xf32> to vector<8x128xf32>
    %84 = arith.negf %83 : vector<8x128xf32>
    %85 = math.exp %84 : vector<8x128xf32>
    %cst_19 = arith.constant 1.000000e+00 : f32
    %86 = vector.broadcast %cst_19 : f32 to vector<8x128xf32>
    %87 = arith.addf %86, %85 : vector<8x128xf32>
    %88 = arith.divf %86, %87 : vector<8x128xf32>
    %89 = arith.mulf %80, %63 : vector<8x128xf32>
    %90 = arith.mulf %74, %82 : vector<8x128xf32>
    %91 = arith.addf %89, %90 : vector<8x128xf32>
    %92 = math.tanh %91 : vector<8x128xf32>
    %93 = arith.mulf %88, %92 : vector<8x128xf32>
    %94 = vector.extract_strided_slice %7 {offsets = [24, 0], sizes = [8, 512], strides = [1, 1]} : vector<64x512xf32> to vector<8x512xf32>
    %cst_20 = arith.constant dense<0.000000e+00> : vector<8x512xf32>
    %95 = tpu.matmul %93, %6, %cst_20 {dimension_numbers = #tpu.dot_dimension_numbers<[1], [0], [0], [1], [0, 0, 1, 1], [], []>} : vector<8x128xf32>, vector<128x512xf32>, vector<8x512xf32> -> vector<8x512xf32>
    %96 = arith.addf %94, %95 : vector<8x512xf32>
    %97 = vector.extract_strided_slice %96 {offsets = [0, 0], sizes = [8, 128], strides = [1, 1]} : vector<8x512xf32> to vector<8x128xf32>
    %98 = arith.negf %97 : vector<8x128xf32>
    %99 = math.exp %98 : vector<8x128xf32>
    %cst_21 = arith.constant 1.000000e+00 : f32
    %100 = vector.broadcast %cst_21 : f32 to vector<8x128xf32>
    %101 = arith.addf %100, %99 : vector<8x128xf32>
    %102 = arith.divf %100, %101 : vector<8x128xf32>
    %103 = vector.extract_strided_slice %96 {offsets = [0, 128], sizes = [8, 128], strides = [1, 1]} : vector<8x512xf32> to vector<8x128xf32>
    %104 = arith.negf %103 : vector<8x128xf32>
    %105 = math.exp %104 : vector<8x128xf32>
    %cst_22 = arith.constant 1.000000e+00 : f32
    %106 = vector.broadcast %cst_22 : f32 to vector<8x128xf32>
    %107 = arith.addf %106, %105 : vector<8x128xf32>
    %108 = arith.divf %106, %107 : vector<8x128xf32>
    %109 = vector.extract_strided_slice %96 {offsets = [0, 256], sizes = [8, 128], strides = [1, 1]} : vector<8x512xf32> to vector<8x128xf32>
    %110 = math.tanh %109 : vector<8x128xf32>
    %111 = vector.extract_strided_slice %96 {offsets = [0, 384], sizes = [8, 128], strides = [1, 1]} : vector<8x512xf32> to vector<8x128xf32>
    %112 = arith.negf %111 : vector<8x128xf32>
    %113 = math.exp %112 : vector<8x128xf32>
    %cst_23 = arith.constant 1.000000e+00 : f32
    %114 = vector.broadcast %cst_23 : f32 to vector<8x128xf32>
    %115 = arith.addf %114, %113 : vector<8x128xf32>
    %116 = arith.divf %114, %115 : vector<8x128xf32>
    %117 = arith.mulf %108, %91 : vector<8x128xf32>
    %118 = arith.mulf %102, %110 : vector<8x128xf32>
    %119 = arith.addf %117, %118 : vector<8x128xf32>
    %120 = math.tanh %119 : vector<8x128xf32>
    %121 = arith.mulf %116, %120 : vector<8x128xf32>
    %122 = vector.extract_strided_slice %7 {offsets = [32, 0], sizes = [8, 512], strides = [1, 1]} : vector<64x512xf32> to vector<8x512xf32>
    %cst_24 = arith.constant dense<0.000000e+00> : vector<8x512xf32>
    %123 = tpu.matmul %121, %6, %cst_24 {dimension_numbers = #tpu.dot_dimension_numbers<[1], [0], [0], [1], [0, 0, 1, 1], [], []>} : vector<8x128xf32>, vector<128x512xf32>, vector<8x512xf32> -> vector<8x512xf32>
    %124 = arith.addf %122, %123 : vector<8x512xf32>
    %125 = vector.extract_strided_slice %124 {offsets = [0, 0], sizes = [8, 128], strides = [1, 1]} : vector<8x512xf32> to vector<8x128xf32>
    %126 = arith.negf %125 : vector<8x128xf32>
    %127 = math.exp %126 : vector<8x128xf32>
    %cst_25 = arith.constant 1.000000e+00 : f32
    %128 = vector.broadcast %cst_25 : f32 to vector<8x128xf32>
    %129 = arith.addf %128, %127 : vector<8x128xf32>
    %130 = arith.divf %128, %129 : vector<8x128xf32>
    %131 = vector.extract_strided_slice %124 {offsets = [0, 128], sizes = [8, 128], strides = [1, 1]} : vector<8x512xf32> to vector<8x128xf32>
    %132 = arith.negf %131 : vector<8x128xf32>
    %133 = math.exp %132 : vector<8x128xf32>
    %cst_26 = arith.constant 1.000000e+00 : f32
    %134 = vector.broadcast %cst_26 : f32 to vector<8x128xf32>
    %135 = arith.addf %134, %133 : vector<8x128xf32>
    %136 = arith.divf %134, %135 : vector<8x128xf32>
    %137 = vector.extract_strided_slice %124 {offsets = [0, 256], sizes = [8, 128], strides = [1, 1]} : vector<8x512xf32> to vector<8x128xf32>
    %138 = math.tanh %137 : vector<8x128xf32>
    %139 = vector.extract_strided_slice %124 {offsets = [0, 384], sizes = [8, 128], strides = [1, 1]} : vector<8x512xf32> to vector<8x128xf32>
    %140 = arith.negf %139 : vector<8x128xf32>
    %141 = math.exp %140 : vector<8x128xf32>
    %cst_27 = arith.constant 1.000000e+00 : f32
    %142 = vector.broadcast %cst_27 : f32 to vector<8x128xf32>
    %143 = arith.addf %142, %141 : vector<8x128xf32>
    %144 = arith.divf %142, %143 : vector<8x128xf32>
    %145 = arith.mulf %136, %119 : vector<8x128xf32>
    %146 = arith.mulf %130, %138 : vector<8x128xf32>
    %147 = arith.addf %145, %146 : vector<8x128xf32>
    %148 = math.tanh %147 : vector<8x128xf32>
    %149 = arith.mulf %144, %148 : vector<8x128xf32>
    %150 = vector.extract_strided_slice %7 {offsets = [40, 0], sizes = [8, 512], strides = [1, 1]} : vector<64x512xf32> to vector<8x512xf32>
    %cst_28 = arith.constant dense<0.000000e+00> : vector<8x512xf32>
    %151 = tpu.matmul %149, %6, %cst_28 {dimension_numbers = #tpu.dot_dimension_numbers<[1], [0], [0], [1], [0, 0, 1, 1], [], []>} : vector<8x128xf32>, vector<128x512xf32>, vector<8x512xf32> -> vector<8x512xf32>
    %152 = arith.addf %150, %151 : vector<8x512xf32>
    %153 = vector.extract_strided_slice %152 {offsets = [0, 0], sizes = [8, 128], strides = [1, 1]} : vector<8x512xf32> to vector<8x128xf32>
    %154 = arith.negf %153 : vector<8x128xf32>
    %155 = math.exp %154 : vector<8x128xf32>
    %cst_29 = arith.constant 1.000000e+00 : f32
    %156 = vector.broadcast %cst_29 : f32 to vector<8x128xf32>
    %157 = arith.addf %156, %155 : vector<8x128xf32>
    %158 = arith.divf %156, %157 : vector<8x128xf32>
    %159 = vector.extract_strided_slice %152 {offsets = [0, 128], sizes = [8, 128], strides = [1, 1]} : vector<8x512xf32> to vector<8x128xf32>
    %160 = arith.negf %159 : vector<8x128xf32>
    %161 = math.exp %160 : vector<8x128xf32>
    %cst_30 = arith.constant 1.000000e+00 : f32
    %162 = vector.broadcast %cst_30 : f32 to vector<8x128xf32>
    %163 = arith.addf %162, %161 : vector<8x128xf32>
    %164 = arith.divf %162, %163 : vector<8x128xf32>
    %165 = vector.extract_strided_slice %152 {offsets = [0, 256], sizes = [8, 128], strides = [1, 1]} : vector<8x512xf32> to vector<8x128xf32>
    %166 = math.tanh %165 : vector<8x128xf32>
    %167 = vector.extract_strided_slice %152 {offsets = [0, 384], sizes = [8, 128], strides = [1, 1]} : vector<8x512xf32> to vector<8x128xf32>
    %168 = arith.negf %167 : vector<8x128xf32>
    %169 = math.exp %168 : vector<8x128xf32>
    %cst_31 = arith.constant 1.000000e+00 : f32
    %170 = vector.broadcast %cst_31 : f32 to vector<8x128xf32>
    %171 = arith.addf %170, %169 : vector<8x128xf32>
    %172 = arith.divf %170, %171 : vector<8x128xf32>
    %173 = arith.mulf %164, %147 : vector<8x128xf32>
    %174 = arith.mulf %158, %166 : vector<8x128xf32>
    %175 = arith.addf %173, %174 : vector<8x128xf32>
    %176 = math.tanh %175 : vector<8x128xf32>
    %177 = arith.mulf %172, %176 : vector<8x128xf32>
    %178 = vector.extract_strided_slice %7 {offsets = [48, 0], sizes = [8, 512], strides = [1, 1]} : vector<64x512xf32> to vector<8x512xf32>
    %cst_32 = arith.constant dense<0.000000e+00> : vector<8x512xf32>
    %179 = tpu.matmul %177, %6, %cst_32 {dimension_numbers = #tpu.dot_dimension_numbers<[1], [0], [0], [1], [0, 0, 1, 1], [], []>} : vector<8x128xf32>, vector<128x512xf32>, vector<8x512xf32> -> vector<8x512xf32>
    %180 = arith.addf %178, %179 : vector<8x512xf32>
    %181 = vector.extract_strided_slice %180 {offsets = [0, 0], sizes = [8, 128], strides = [1, 1]} : vector<8x512xf32> to vector<8x128xf32>
    %182 = arith.negf %181 : vector<8x128xf32>
    %183 = math.exp %182 : vector<8x128xf32>
    %cst_33 = arith.constant 1.000000e+00 : f32
    %184 = vector.broadcast %cst_33 : f32 to vector<8x128xf32>
    %185 = arith.addf %184, %183 : vector<8x128xf32>
    %186 = arith.divf %184, %185 : vector<8x128xf32>
    %187 = vector.extract_strided_slice %180 {offsets = [0, 128], sizes = [8, 128], strides = [1, 1]} : vector<8x512xf32> to vector<8x128xf32>
    %188 = arith.negf %187 : vector<8x128xf32>
    %189 = math.exp %188 : vector<8x128xf32>
    %cst_34 = arith.constant 1.000000e+00 : f32
    %190 = vector.broadcast %cst_34 : f32 to vector<8x128xf32>
    %191 = arith.addf %190, %189 : vector<8x128xf32>
    %192 = arith.divf %190, %191 : vector<8x128xf32>
    %193 = vector.extract_strided_slice %180 {offsets = [0, 256], sizes = [8, 128], strides = [1, 1]} : vector<8x512xf32> to vector<8x128xf32>
    %194 = math.tanh %193 : vector<8x128xf32>
    %195 = vector.extract_strided_slice %180 {offsets = [0, 384], sizes = [8, 128], strides = [1, 1]} : vector<8x512xf32> to vector<8x128xf32>
    %196 = arith.negf %195 : vector<8x128xf32>
    %197 = math.exp %196 : vector<8x128xf32>
    %cst_35 = arith.constant 1.000000e+00 : f32
    %198 = vector.broadcast %cst_35 : f32 to vector<8x128xf32>
    %199 = arith.addf %198, %197 : vector<8x128xf32>
    %200 = arith.divf %198, %199 : vector<8x128xf32>
    %201 = arith.mulf %192, %175 : vector<8x128xf32>
    %202 = arith.mulf %186, %194 : vector<8x128xf32>
    %203 = arith.addf %201, %202 : vector<8x128xf32>
    %204 = math.tanh %203 : vector<8x128xf32>
    %205 = arith.mulf %200, %204 : vector<8x128xf32>
    %206 = vector.extract_strided_slice %7 {offsets = [56, 0], sizes = [8, 512], strides = [1, 1]} : vector<64x512xf32> to vector<8x512xf32>
    %cst_36 = arith.constant dense<0.000000e+00> : vector<8x512xf32>
    %207 = tpu.matmul %205, %6, %cst_36 {dimension_numbers = #tpu.dot_dimension_numbers<[1], [0], [0], [1], [0, 0, 1, 1], [], []>} : vector<8x128xf32>, vector<128x512xf32>, vector<8x512xf32> -> vector<8x512xf32>
    %208 = arith.addf %206, %207 : vector<8x512xf32>
    %209 = vector.extract_strided_slice %208 {offsets = [0, 0], sizes = [8, 128], strides = [1, 1]} : vector<8x512xf32> to vector<8x128xf32>
    %210 = arith.negf %209 : vector<8x128xf32>
    %211 = math.exp %210 : vector<8x128xf32>
    %cst_37 = arith.constant 1.000000e+00 : f32
    %212 = vector.broadcast %cst_37 : f32 to vector<8x128xf32>
    %213 = arith.addf %212, %211 : vector<8x128xf32>
    %214 = arith.divf %212, %213 : vector<8x128xf32>
    %215 = vector.extract_strided_slice %208 {offsets = [0, 128], sizes = [8, 128], strides = [1, 1]} : vector<8x512xf32> to vector<8x128xf32>
    %216 = arith.negf %215 : vector<8x128xf32>
    %217 = math.exp %216 : vector<8x128xf32>
    %cst_38 = arith.constant 1.000000e+00 : f32
    %218 = vector.broadcast %cst_38 : f32 to vector<8x128xf32>
    %219 = arith.addf %218, %217 : vector<8x128xf32>
    %220 = arith.divf %218, %219 : vector<8x128xf32>
    %221 = vector.extract_strided_slice %208 {offsets = [0, 256], sizes = [8, 128], strides = [1, 1]} : vector<8x512xf32> to vector<8x128xf32>
    %222 = math.tanh %221 : vector<8x128xf32>
    %223 = vector.extract_strided_slice %208 {offsets = [0, 384], sizes = [8, 128], strides = [1, 1]} : vector<8x512xf32> to vector<8x128xf32>
    %224 = arith.negf %223 : vector<8x128xf32>
    %225 = math.exp %224 : vector<8x128xf32>
    %cst_39 = arith.constant 1.000000e+00 : f32
    %226 = vector.broadcast %cst_39 : f32 to vector<8x128xf32>
    %227 = arith.addf %226, %225 : vector<8x128xf32>
    %228 = arith.divf %226, %227 : vector<8x128xf32>
    %229 = arith.mulf %220, %203 : vector<8x128xf32>
    %230 = arith.mulf %214, %222 : vector<8x128xf32>
    %231 = arith.addf %229, %230 : vector<8x128xf32>
    %232 = math.tanh %231 : vector<8x128xf32>
    %233 = arith.mulf %228, %232 : vector<8x128xf32>
    %c0_40 = arith.constant 0 : index
    %c0_41 = arith.constant 0 : index
    %234 = vector.load %arg2[%c0_40, %c0_41] : memref<1408x128xf32, #tpu.memory_space<vmem>>, vector<128x128xf32>
    %cst_42 = arith.constant dense<0.000000e+00> : vector<8x128xf32>
    %235 = tpu.matmul %233, %234, %cst_42 {dimension_numbers = #tpu.dot_dimension_numbers<[1], [0], [0], [1], [0, 0, 1, 1], [], []>} : vector<8x128xf32>, vector<128x128xf32>, vector<8x128xf32> -> vector<8x128xf32>
    %236 = arith.subf %233, %235 : vector<8x128xf32>
    %237 = arith.mulf %236, %236 : vector<8x128xf32>
    %cst_43 = arith.constant dense<0.000000e+00> : vector<8x128xf32>
    %238 = tpu.matmul %237, %234, %cst_43 {dimension_numbers = #tpu.dot_dimension_numbers<[1], [0], [0], [1], [0, 0, 1, 1], [], []>} : vector<8x128xf32>, vector<128x128xf32>, vector<8x128xf32> -> vector<8x128xf32>
    %cst_44 = arith.constant 9.99999974E-6 : f32
    %239 = vector.broadcast %cst_44 : f32 to vector<8x128xf32>
    %240 = arith.addf %238, %239 : vector<8x128xf32>
    %241 = math.rsqrt %240 : vector<8x128xf32>
    %242 = arith.mulf %236, %241 : vector<8x128xf32>
    %c0_45 = arith.constant 0 : index
    %c0_46 = arith.constant 0 : index
    %243 = vector.load %arg3[%c0_45, %c0_46] : memref<16x128xf32, #tpu.memory_space<vmem>>, vector<1x128xf32>
    %244 = vector.broadcast %243 : vector<1x128xf32> to vector<8x128xf32>
    %245 = arith.mulf %242, %244 : vector<8x128xf32>
    %c1 = arith.constant 1 : index
    %c0_47 = arith.constant 0 : index
    %246 = vector.load %arg3[%c1, %c0_47] : memref<16x128xf32, #tpu.memory_space<vmem>>, vector<1x128xf32>
    %247 = vector.broadcast %246 : vector<1x128xf32> to vector<8x128xf32>
    %248 = arith.addf %245, %247 : vector<8x128xf32>
    %c128_48 = arith.constant 128 : index
    %c0_49 = arith.constant 0 : index
    %249 = vector.load %arg2[%c128_48, %c0_49] : memref<1408x128xf32, #tpu.memory_space<vmem>>, vector<128x128xf32>
    %cst_50 = arith.constant dense<0.000000e+00> : vector<8x128xf32>
    %250 = tpu.matmul %248, %249, %cst_50 {dimension_numbers = #tpu.dot_dimension_numbers<[1], [0], [0], [1], [0, 0, 1, 1], [], []>} : vector<8x128xf32>, vector<128x128xf32>, vector<8x128xf32> -> vector<8x128xf32>
    %c2 = arith.constant 2 : index
    %c0_51 = arith.constant 0 : index
    %251 = vector.load %arg3[%c2, %c0_51] : memref<16x128xf32, #tpu.memory_space<vmem>>, vector<1x128xf32>
    %252 = vector.broadcast %251 : vector<1x128xf32> to vector<8x128xf32>
    %253 = arith.addf %250, %252 : vector<8x128xf32>
    %254 = math.tanh %253 : vector<8x128xf32>
    %c256 = arith.constant 256 : index
    %c0_52 = arith.constant 0 : index
    %255 = vector.load %arg2[%c256, %c0_52] : memref<1408x128xf32, #tpu.memory_space<vmem>>, vector<128x128xf32>
    %cst_53 = arith.constant dense<0.000000e+00> : vector<8x128xf32>
    %256 = tpu.matmul %254, %255, %cst_53 {dimension_numbers = #tpu.dot_dimension_numbers<[1], [0], [0], [1], [0, 0, 1, 1], [], []>} : vector<8x128xf32>, vector<128x128xf32>, vector<8x128xf32> -> vector<8x128xf32>
    %c3 = arith.constant 3 : index
    %c0_54 = arith.constant 0 : index
    %257 = vector.load %arg3[%c3, %c0_54] : memref<16x128xf32, #tpu.memory_space<vmem>>, vector<1x128xf32>
    %258 = vector.broadcast %257 : vector<1x128xf32> to vector<8x128xf32>
    %259 = arith.addf %256, %258 : vector<8x128xf32>
    %260 = math.tanh %259 : vector<8x128xf32>
    %c384 = arith.constant 384 : index
    %c0_55 = arith.constant 0 : index
    %261 = vector.load %arg2[%c384, %c0_55] : memref<1408x128xf32, #tpu.memory_space<vmem>>, vector<128x128xf32>
    %cst_56 = arith.constant dense<0.000000e+00> : vector<8x128xf32>
    %262 = tpu.matmul %254, %261, %cst_56 {dimension_numbers = #tpu.dot_dimension_numbers<[1], [0], [0], [1], [0, 0, 1, 1], [], []>} : vector<8x128xf32>, vector<128x128xf32>, vector<8x128xf32> -> vector<8x128xf32>
    %c4 = arith.constant 4 : index
    %c0_57 = arith.constant 0 : index
    %263 = vector.load %arg3[%c4, %c0_57] : memref<16x128xf32, #tpu.memory_space<vmem>>, vector<1x128xf32>
    %264 = vector.broadcast %263 : vector<1x128xf32> to vector<8x128xf32>
    %265 = arith.addf %262, %264 : vector<8x128xf32>
    %cst_58 = arith.constant dense<0xFF800000> : vector<8xf32>
    %266 = vector.multi_reduction <maximumf>, %265, %cst_58 [1] : vector<8x128xf32> to vector<8xf32>
    %cst_59 = arith.constant 0xFF800000 : f32
    %267 = vector.broadcast %cst_59 : f32 to vector<8xf32>
    %268 = arith.maximumf %267, %266 : vector<8xf32>
    %269 = vector.shape_cast %268 : vector<8xf32> to vector<8x1xf32>
    %270 = vector.broadcast %269 : vector<8x1xf32> to vector<8x128xf32>
    %271 = arith.subf %265, %270 : vector<8x128xf32>
    %272 = math.exp %271 : vector<8x128xf32>
    %cst_60 = arith.constant dense<0.000000e+00> : vector<8xf32>
    %273 = vector.multi_reduction <add>, %272, %cst_60 [1] : vector<8x128xf32> to vector<8xf32>
    %274 = vector.shape_cast %273 : vector<8xf32> to vector<8x1xf32>
    %275 = vector.broadcast %274 : vector<8x1xf32> to vector<8x128xf32>
    %276 = arith.divf %272, %275 : vector<8x128xf32>
    %c512 = arith.constant 512 : index
    %c0_61 = arith.constant 0 : index
    %277 = vector.load %arg2[%c512, %c0_61] : memref<1408x128xf32, #tpu.memory_space<vmem>>, vector<128x128xf32>
    %cst_62 = arith.constant dense<0.000000e+00> : vector<8x128xf32>
    %278 = tpu.matmul %276, %277, %cst_62 {dimension_numbers = #tpu.dot_dimension_numbers<[1], [0], [0], [1], [0, 0, 1, 1], [], []>} : vector<8x128xf32>, vector<128x128xf32>, vector<8x128xf32> -> vector<8x128xf32>
    %279 = arith.mulf %254, %278 : vector<8x128xf32>
    %c640 = arith.constant 640 : index
    %c0_63 = arith.constant 0 : index
    %280 = vector.load %arg2[%c640, %c0_63] : memref<1408x128xf32, #tpu.memory_space<vmem>>, vector<128x128xf32>
    %cst_64 = arith.constant dense<0.000000e+00> : vector<8x128xf32>
    %281 = tpu.matmul %276, %280, %cst_64 {dimension_numbers = #tpu.dot_dimension_numbers<[1], [0], [0], [1], [0, 0, 1, 1], [], []>} : vector<8x128xf32>, vector<128x128xf32>, vector<8x128xf32> -> vector<8x128xf32>
    %282 = arith.mulf %260, %281 : vector<8x128xf32>
    %c768 = arith.constant 768 : index
    %c0_65 = arith.constant 0 : index
    %283 = vector.load %arg2[%c768, %c0_65] : memref<1408x128xf32, #tpu.memory_space<vmem>>, vector<128x128xf32>
    %cst_66 = arith.constant dense<0.000000e+00> : vector<8x128xf32>
    %284 = tpu.matmul %279, %283, %cst_66 {dimension_numbers = #tpu.dot_dimension_numbers<[1], [0], [0], [1], [0, 0, 1, 1], [], []>} : vector<8x128xf32>, vector<128x128xf32>, vector<8x128xf32> -> vector<8x128xf32>
    %c896 = arith.constant 896 : index
    %c0_67 = arith.constant 0 : index
    %285 = vector.load %arg2[%c896, %c0_67] : memref<1408x128xf32, #tpu.memory_space<vmem>>, vector<128x128xf32>
    %cst_68 = arith.constant dense<0.000000e+00> : vector<8x128xf32>
    %286 = tpu.matmul %282, %285, %cst_68 {dimension_numbers = #tpu.dot_dimension_numbers<[1], [0], [0], [1], [0, 0, 1, 1], [], []>} : vector<8x128xf32>, vector<128x128xf32>, vector<8x128xf32> -> vector<8x128xf32>
    %287 = arith.addf %284, %286 : vector<8x128xf32>
    %c1024 = arith.constant 1024 : index
    %c0_69 = arith.constant 0 : index
    %288 = vector.load %arg2[%c1024, %c0_69] : memref<1408x128xf32, #tpu.memory_space<vmem>>, vector<128x128xf32>
    %cst_70 = arith.constant dense<0.000000e+00> : vector<8x128xf32>
    %289 = tpu.matmul %287, %288, %cst_70 {dimension_numbers = #tpu.dot_dimension_numbers<[1], [0], [0], [1], [0, 0, 1, 1], [], []>} : vector<8x128xf32>, vector<128x128xf32>, vector<8x128xf32> -> vector<8x128xf32>
    %c5 = arith.constant 5 : index
    %c0_71 = arith.constant 0 : index
    %290 = vector.load %arg3[%c5, %c0_71] : memref<16x128xf32, #tpu.memory_space<vmem>>, vector<1x128xf32>
    %291 = vector.broadcast %290 : vector<1x128xf32> to vector<8x128xf32>
    %292 = arith.addf %289, %291 : vector<8x128xf32>
    %c1152 = arith.constant 1152 : index
    %c0_72 = arith.constant 0 : index
    %293 = vector.load %arg2[%c1152, %c0_72] : memref<1408x128xf32, #tpu.memory_space<vmem>>, vector<128x128xf32>
    %cst_73 = arith.constant dense<0.000000e+00> : vector<8x128xf32>
    %294 = tpu.matmul %292, %293, %cst_73 {dimension_numbers = #tpu.dot_dimension_numbers<[1], [0], [0], [1], [0, 0, 1, 1], [], []>} : vector<8x128xf32>, vector<128x128xf32>, vector<8x128xf32> -> vector<8x128xf32>
    %c6 = arith.constant 6 : index
    %c0_74 = arith.constant 0 : index
    %295 = vector.load %arg3[%c6, %c0_74] : memref<16x128xf32, #tpu.memory_space<vmem>>, vector<1x128xf32>
    %296 = vector.broadcast %295 : vector<1x128xf32> to vector<8x128xf32>
    %297 = arith.addf %294, %296 : vector<8x128xf32>
    %298 = arith.negf %297 : vector<8x128xf32>
    %299 = math.exp %298 : vector<8x128xf32>
    %cst_75 = arith.constant 1.000000e+00 : f32
    %300 = vector.broadcast %cst_75 : f32 to vector<8x128xf32>
    %301 = arith.addf %300, %299 : vector<8x128xf32>
    %302 = arith.divf %300, %301 : vector<8x128xf32>
    %c32_i32 = arith.constant 32 : i32
    %303 = tpu.dynamic_rotate %292 by %c32_i32 dim 1 : vector<8x128xf32>, i32 -> vector<8x128xf32>
    %304 = arith.addf %287, %303 : vector<8x128xf32>
    %305 = arith.mulf %302, %304 : vector<8x128xf32>
    %c96_i32 = arith.constant 96 : i32
    %306 = tpu.dynamic_rotate %305 by %c96_i32 dim 1 : vector<8x128xf32>, i32 -> vector<8x128xf32>
    %307 = arith.addf %305, %306 : vector<8x128xf32>
    %c1280 = arith.constant 1280 : index
    %c0_76 = arith.constant 0 : index
    %308 = vector.load %arg2[%c1280, %c0_76] : memref<1408x128xf32, #tpu.memory_space<vmem>>, vector<128x128xf32>
    %cst_77 = arith.constant dense<0.000000e+00> : vector<8x128xf32>
    %309 = tpu.matmul %307, %308, %cst_77 {dimension_numbers = #tpu.dot_dimension_numbers<[1], [0], [0], [1], [0, 0, 1, 1], [], []>} : vector<8x128xf32>, vector<128x128xf32>, vector<8x128xf32> -> vector<8x128xf32>
    %c7 = arith.constant 7 : index
    %c0_78 = arith.constant 0 : index
    %310 = vector.load %arg3[%c7, %c0_78] : memref<16x128xf32, #tpu.memory_space<vmem>>, vector<1x128xf32>
    %311 = vector.broadcast %310 : vector<1x128xf32> to vector<8x128xf32>
    %312 = arith.addf %309, %311 : vector<8x128xf32>
    %c8 = arith.constant 8 : index
    %c0_79 = arith.constant 0 : index
    %313 = vector.load %arg3[%c8, %c0_79] : memref<16x128xf32, #tpu.memory_space<vmem>>, vector<1x128xf32>
    %cst_80 = arith.constant 0.000000e+00 : f32
    %314 = vector.broadcast %cst_80 : f32 to vector<1x128xf32>
    %315 = arith.cmpf ogt, %313, %314 : vector<1x128xf32>
    %cst_81 = arith.constant 0.000000e+00 : f32
    %316 = vector.broadcast %cst_81 : f32 to vector<8x128xf32>
    %317 = arith.maximumf %312, %316 : vector<8x128xf32>
    %318 = vector.shape_cast %315 : vector<1x128xi1> to vector<1x128xi1>
    %319 = vector.broadcast %318 : vector<1x128xi1> to vector<8x128xi1>
    %320 = arith.select %319, %317, %312 : vector<8x128xi1>, vector<8x128xf32>
    %c0_82 = arith.constant 0 : index
    %c0_83 = arith.constant 0 : index
    %321 = vector.load %arg4[%c0_82, %c0_83] : memref<8x128xf32, #tpu.memory_space<vmem>>, vector<8x128xf32>
    tpu.vector_store %arg4[%c0_82, %c0_83], %320 {strides = array<i32>} : memref<8x128xf32, #tpu.memory_space<vmem>>, vector<8x128xf32>,
    return
  }
}

</mosaic_0001>

<bundles_post_ra>
// kernel: _lambda_.1
= control target key start
LH: loop header
LB: loop body
LE: loop exit
PB: predicated region body
PF: predicated region fallthrough
CT: control target
= control target key end

     0   :  { %9 = vsyncpa [#allocation3], 0  ;;  %s3406_s0 = inlined_call_operand.vmem [shape: f32[64,128], index: 0, kind: input, shape index: {}]   ;;  %s3407_s1 = inlined_call_operand.hbm [shape: f32[256,512], index: 1, kind: input, shape index: {}]   ;;  %s3408_s2 = inlined_call_operand.hbm [shape: f32[1408,128], index: 2, kind: input, shape index: {}]   ;;  %s3409_s3 = inlined_call_operand.vmem [shape: f32[16,128], index: 3, kind: input, shape index: {}]   ;;  %s3410_s4 = inlined_call_operand.vmem [shape: f32[8,128], index: 4, kind: output, shape index: {}]  }
   0x1   :  { %s17_s17 = sshll.u32 %s3407_s1, 4  ;;  %s18_s17 = int_to_ptr.hbm [resolvable:$true] %s17_s17 }
   0x2   :  { %10 = vsyncpa [#allocation5], 0  ;;  %s2395_s18 = smov [#allocation2]   ;;  %s30_s22 = sshll.u32 %s3408_s2, 4  ;;  %s31_s22 = int_to_ptr.hbm [resolvable:$true] %s30_s22 }
   0x3   :  { %s19_s19 = sshll.u32 %s2395_s18, 4  ;;  %s2396_s23 = smov 512   ;;  %s20_s19 = int_to_ptr.vmem [resolvable:$true] %s19_s19 }
   0x4   :  { %s2397_s24 = smov 32   ;;  %s2398_s25 = smov [#allocation4]  }
   0x5   :  { %25 = dma.hbm_to_vmem [thread:$0]  %s18_s17, 16384, %s20_s19, [#allocation3], %s2396_s23, %s2396_s23, %s2397_s24  }
   0x6   :  { %s32_s26 = sshll.u32 %s2398_s25, 4  ;;  %s2399_s27 = smov 128   ;;  %s33_s26 = int_to_ptr.vmem [resolvable:$true] %s32_s26 }
   0x7   :  { %s2400_s28 = smov 8  }
   0x8   :  { %38 = dma.hbm_to_vmem [thread:$0]  %s31_s22, 22528, %s33_s26, [#allocation5], %s2399_s27, %s2399_s27, %s2400_s28  }
   0x9   :  { %2391 = dma.done.wait [#allocation3], 16384  }
   0xa   :  { %2392 = vsyncadd [#allocation3], 4294950912 }
   0xb   :  { %2393 = dma.done.wait [#allocation5], 22528  }
   0xc   :  { %2394 = vsyncadd [#allocation5], 4294944768  ;;  %v141_v0 = vld [vmem:[#allocation2 + $0x1e0] sm:$0xff]  ;;  %v142_v1 = vld [vmem:[#allocation2 + $0x1e8] sm:$0xff]  ;;  %vm2401_vm1 = vmmov 1  }
   0xd   :  { %v143_v2 = vld [vmem:[#allocation2 + $0x1f0] sm:$0xff]  ;;  %209 = vmatpush.msra.mxu0 %v141_v0  ;;  %250 = vmatpush.msra.mxu1 %v142_v1  ;;  %v144_v3 = vld [vmem:[#allocation2 + $0x1f8] sm:$0xff]  ;;  %v137_v4 = vld [vmem:[#allocation2 + $0x1c0] sm:$0xff] }
   0xe   :  { %v138_v5 = vld [vmem:[#allocation2 + $0x1c8] sm:$0xff]  ;;  %291 = vmatpush.msra.mxu2 %v143_v2  ;;  %332 = vmatpush.msra.mxu3 %v144_v3  ;;  %v139_v6 = vld [vmem:[#allocation2 + $0x1d0] sm:$0xff]  ;;  %v140_v7 = vld [vmem:[#allocation2 + $0x1d8] sm:$0xff] }
   0xf   :  { %v133_v8 = vld [vmem:[#allocation2 + $0x1a0] sm:$0xff]  ;;  %210 = vmatpush.msra.mxu0 %v137_v4  ;;  %251 = vmatpush.msra.mxu1 %v138_v5  ;;  %v134_v9 = vld [vmem:[#allocation2 + $0x1a8] sm:$0xff]  ;;  %v135_v10 = vld [vmem:[#allocation2 + $0x1b0] sm:$0xff] }
  0x10   :  { %v136_v11 = vld [vmem:[#allocation2 + $0x1b8] sm:$0xff]  ;;  %292 = vmatpush.msra.mxu2 %v139_v6  ;;  %333 = vmatpush.msra.mxu3 %v140_v7  ;;  %v129_v12 = vld [vmem:[#allocation2 + $0x180] sm:$0xff]  ;;  %v130_v13 = vld [vmem:[#allocation2 + $0x188] sm:$0xff] }
  0x11   :  { %211 = vmatpush.msra.mxu0 %v133_v8  ;;  %252 = vmatpush.msra.mxu1 %v134_v9  ;;  %v131_v14 = vld [vmem:[#allocation2 + $0x190] sm:$0xff]  ;;  %v132_v15 = vld [vmem:[#allocation2 + $0x198] sm:$0xff]  ;;  %v125_v16 = vld [vmem:[#allocation2 + $0x160] sm:$0xff] }
  0x12   :  { %293 = vmatpush.msra.mxu2 %v135_v10  ;;  %334 = vmatpush.msra.mxu3 %v136_v11  ;;  %v126_v17 = vld [vmem:[#allocation2 + $0x168] sm:$0xff]  ;;  %v127_v18 = vld [vmem:[#allocation2 + $0x170] sm:$0xff]  ;;  %v128_v19 = vld [vmem:[#allocation2 + $0x178] sm:$0xff] }
  0x13   :  { %212 = vmatpush.msra.mxu0 %v129_v12  ;;  %253 = vmatpush.msra.mxu1 %v130_v13  ;;  %v121_v20 = vld [vmem:[#allocation2 + $0x140] sm:$0xff]  ;;  %v122_v21 = vld [vmem:[#allocation2 + $0x148] sm:$0xff]  ;;  %v123_v22 = vld [vmem:[#allocation2 + $0x150] sm:$0xff] }
  0x14   :  { %294 = vmatpush.msra.mxu2 %v131_v14  ;;  %335 = vmatpush.msra.mxu3 %v132_v15  ;;  %v124_v23 = vld [vmem:[#allocation2 + $0x158] sm:$0xff]  ;;  %v117_v24 = vld [vmem:[#allocation2 + $0x120] sm:$0xff]  ;;  %v118_v25 = vld [vmem:[#allocation2 + $0x128] sm:$0xff] }
  0x15   :  { %213 = vmatpush.msra.mxu0 %v125_v16  ;;  %254 = vmatpush.msra.mxu1 %v126_v17  ;;  %v119_v26 = vld [vmem:[#allocation2 + $0x130] sm:$0xff]  ;;  %v120_v27 = vld [vmem:[#allocation2 + $0x138] sm:$0xff]  ;;  %v113_v28 = vld [vmem:[#allocation2 + $0x100] sm:$0xff] }
  0x16   :  { %295 = vmatpush.msra.mxu2 %v127_v18  ;;  %336 = vmatpush.msra.mxu3 %v128_v19  ;;  %v114_v29 = vld [vmem:[#allocation2 + $0x108] sm:$0xff]  ;;  %v115_v30 = vld [vmem:[#allocation2 + $0x110] sm:$0xff]  ;;  %v116_v31 = vld [vmem:[#allocation2 + $0x118] sm:$0xff] }
  0x17   :  { %214 = vmatpush.msra.mxu0 %v121_v20  ;;  %255 = vmatpush.msra.mxu1 %v122_v21  ;;  %v109_v32 = vld [vmem:[#allocation2 + $0xe0] sm:$0xff]  ;;  %v110_v33 = vld [vmem:[#allocation2 + $0xe8] sm:$0xff]  ;;  %v111_v34 = vld [vmem:[#allocation2 + $0xf0] sm:$0xff] }
  0x18   :  { %296 = vmatpush.msra.mxu2 %v123_v22  ;;  %337 = vmatpush.msra.mxu3 %v124_v23  ;;  %v112_v35 = vld [vmem:[#allocation2 + $0xf8] sm:$0xff]  ;;  %v105_v36 = vld [vmem:[#allocation2 + $0xc0] sm:$0xff]  ;;  %v106_v37 = vld [vmem:[#allocation2 + $0xc8] sm:$0xff] }
  0x19   :  { %215 = vmatpush.msra.mxu0 %v117_v24  ;;  %256 = vmatpush.msra.mxu1 %v118_v25  ;;  %v107_v38 = vld [vmem:[#allocation2 + $0xd0] sm:$0xff]  ;;  %v108_v39 = vld [vmem:[#allocation2 + $0xd8] sm:$0xff]  ;;  %v101_v40 = vld [vmem:[#allocation2 + $0xa0] sm:$0xff] }
  0x1a   :  { %297 = vmatpush.msra.mxu2 %v119_v26  ;;  %338 = vmatpush.msra.mxu3 %v120_v27  ;;  %v102_v41 = vld [vmem:[#allocation2 + $0xa8] sm:$0xff]  ;;  %v103_v42 = vld [vmem:[#allocation2 + $0xb0] sm:$0xff]  ;;  %v104_v43 = vld [vmem:[#allocation2 + $0xb8] sm:$0xff] }
  0x1b   :  { %216 = vmatpush.msra.mxu0 %v113_v28  ;;  %257 = vmatpush.msra.mxu1 %v114_v29  ;;  %v97_v44 = vld [vmem:[#allocation2 + $0x80] sm:$0xff]  ;;  %v98_v45 = vld [vmem:[#allocation2 + $0x88] sm:$0xff]  ;;  %v99_v46 = vld [vmem:[#allocation2 + $0x90] sm:$0xff] }
  0x1c   :  { %298 = vmatpush.msra.mxu2 %v115_v30  ;;  %339 = vmatpush.msra.mxu3 %v116_v31  ;;  %v100_v47 = vld [vmem:[#allocation2 + $0x98] sm:$0xff]  ;;  %v93_v48 = vld [vmem:[#allocation2 + $0x60] sm:$0xff]  ;;  %v94_v49 = vld [vmem:[#allocation2 + $0x68] sm:$0xff] }
  0x1d   :  { %217 = vmatpush.msra.mxu0 %v109_v32  ;;  %258 = vmatpush.msra.mxu1 %v110_v33  ;;  %v95_v50 = vld [vmem:[#allocation2 + $0x70] sm:$0xff]  ;;  %v96_v51 = vld [vmem:[#allocation2 + $0x78] sm:$0xff]  ;;  %v89_v52 = vld [vmem:[#allocation2 + $0x40] sm:$0xff] }
  0x1e   :  { %299 = vmatpush.msra.mxu2 %v111_v34  ;;  %340 = vmatpush.msra.mxu3 %v112_v35  ;;  %v90_v53 = vld [vmem:[#allocation2 + $0x48] sm:$0xff]  ;;  %v49_v54 = vld [vmem:[%s3406_s0] sm:$0xff]  ;;  %v91_v55 = vld [vmem:[#allocation2 + $0x50] sm:$0xff] }
  0x1f   :  { %218 = vmatpush.msra.mxu0 %v105_v36  ;;  %259 = vmatpush.msra.mxu1 %v106_v37  ;;  %v92_v56 = vld [vmem:[#allocation2 + $0x58] sm:$0xff]  ;;  %v85_v57 = vld [vmem:[#allocation2 + $0x20] sm:$0xff]  ;;  %v86_v58 = vld [vmem:[#allocation2 + $0x28] sm:$0xff]  ;;  %vm57_vm0 = vweird.f32 %v49_v54 }
  0x20   :  { %300 = vmatpush.msra.mxu2 %v107_v38  ;;  %341 = vmatpush.msra.mxu3 %v108_v39  ;;  %v87_v59 = vld [vmem:[#allocation2 + $0x30] sm:$0xff]  ;;  %v88_v60 = vld [vmem:[#allocation2 + $0x38] sm:$0xff]  ;;  %v81_v61 = vld [vmem:[#allocation2] sm:$0xff] }
  0x21   :  { %219 = vmatpush.msra.mxu0 %v101_v40  ;;  %260 = vmatpush.msra.mxu1 %v102_v41  ;;  %v82_v62 = vld [vmem:[#allocation2 + $0x8] sm:$0xff]  ;;  %v83_v63 = vld [vmem:[#allocation2 + $0x10] sm:$0xff]  ;;  %v84_v0 = vld [vmem:[#allocation2 + $0x18] sm:$0xff] }
  0x22   :  { %301 = vmatpush.msra.mxu2 %v103_v42  ;;  %342 = vmatpush.msra.mxu3 %v104_v43  ;;  %vm65_vm2 = vmxor %vm57_vm0, %vm2401_vm1  ;;  %v50_v1 = vld [vmem:[%s3406_s0 + $0x8] sm:$0xff]  ;;  %v2444_v2 = vld [vmem:[#allocation2 + $0x3e0] sm:$0xff] }
  0x23   :  { %220 = vmatpush.msra.mxu0 %v97_v44  ;;  %261 = vmatpush.msra.mxu1 %v98_v45  ;;  %v2446_v3 = vld [vmem:[#allocation2 + $0x3e8] sm:$0xff]  ;;  %v2448_v4 = vld [vmem:[#allocation2 + $0x3f8] sm:$0xff]  ;;  %vm58_vm3 = vweird.f32 %v50_v1  ;;  %v2450_v5 = vld [vmem:[#allocation2 + $0x3f0] sm:$0xff] }
  0x24   :  { %302 = vmatpush.msra.mxu2 %v99_v46  ;;  %343 = vmatpush.msra.mxu3 %v100_v47  ;;  %v2452_v6 = vld [vmem:[#allocation2 + $0x3c0] sm:$0xff]  ;;  %v2454_v7 = vld [vmem:[#allocation2 + $0x3c8] sm:$0xff]  ;;  %v2460_v9 = vld [vmem:[#allocation2 + $0x3d8] sm:$0xff] }
  0x25   :  { %221 = vmatpush.msra.mxu0 %v93_v48  ;;  %262 = vmatpush.msra.mxu1 %v94_v49  ;;  %v2458_v8 = vld [vmem:[#allocation2 + $0x3a0] sm:$0xff]  ;;  %v2462_v10 = vld [vmem:[#allocation2 + $0x3d0] sm:$0xff]  ;;  %vm2466_vm4 = vmxor %vm58_vm3, %vm2401_vm1 }
  0x26   :  { %303 = vmatpush.msra.mxu2 %v95_v50  ;;  %344 = vmatpush.msra.mxu3 %v96_v51  ;;  %v2470_v12 = vld [vmem:[#allocation2 + $0x3a8] sm:$0xff]  ;;  %v2472_v13 = vld [vmem:[#allocation2 + $0x3b8] sm:$0xff]  ;;  %v2477_v14 = vld [vmem:[#allocation2 + $0x3b0] sm:$0xff] }
  0x27   :  { %222 = vmatpush.msra.mxu0 %v89_v52  ;;  %263 = vmatpush.msra.mxu1 %v90_v53  ;;  %v2483_v15 = vld [vmem:[#allocation2 + $0x380] sm:$0xff]  ;;  %v2485_v16 = vld [vmem:[#allocation2 + $0x388] sm:$0xff]  ;;  %v51_v17 = vld [vmem:[%s3406_s0 + $0x10] sm:$0xff] }
  0x28   :  { %304 = vmatpush.msra.mxu2 %v91_v55  ;;  %345 = vmatpush.msra.mxu3 %v92_v56  ;;  %v2496_v18 = vld [vmem:[#allocation2 + $0x398] sm:$0xff]  ;;  %v2498_v19 = vld [vmem:[#allocation2 + $0x390] sm:$0xff]  ;;  %v2504_v20 = vld [vmem:[#allocation2 + $0x360] sm:$0xff]  ;;  %vm59_vm5 = vweird.f32 %v51_v17 }
  0x29   :  { %223 = vmatpush.msra.mxu0 %v85_v57  ;;  %264 = vmatpush.msra.mxu1 %v86_v58  ;;  %v2506_v21 = vld [vmem:[#allocation2 + $0x368] sm:$0xff]  ;;  %v2510_v22 = vld [vmem:[#allocation2 + $0x378] sm:$0xff]  ;;  %v2512_v23 = vld [vmem:[#allocation2 + $0x370] sm:$0xff] }
  0x2a   :  { %305 = vmatpush.msra.mxu2 %v87_v59  ;;  %346 = vmatpush.msra.mxu3 %v88_v60  ;;  %v2515_v24 = vld [vmem:[#allocation2 + $0x340] sm:$0xff]  ;;  %v2517_v25 = vld [vmem:[#allocation2 + $0x348] sm:$0xff]  ;;  %v2522_v26 = vld [vmem:[#allocation2 + $0x358] sm:$0xff] }
  0x2b   :  { %224 = vmatpush.msra.mxu0 %v81_v61  ;;  %265 = vmatpush.msra.mxu1 %v82_v62  ;;  %v2524_v27 = vld [vmem:[#allocation2 + $0x350] sm:$0xff]  ;;  %vm67_vm6 = vmxor %vm59_vm5, %vm2401_vm1  ;;  %v52_v28 = vld [vmem:[%s3406_s0 + $0x18] sm:$0xff] }
  0x2c   :  { %306 = vmatpush.msra.mxu2 %v83_v63  ;;  %347 = vmatpush.msra.mxu3 %v84_v0  ;;  %v2534_v29 = vld [vmem:[#allocation2 + $0x320] sm:$0xff]  ;;  %v2536_v30 = vld [vmem:[#allocation2 + $0x328] sm:$0xff]  ;;  %v2540_v31 = vld [vmem:[#allocation2 + $0x338] sm:$0xff]  ;;  %vm60_vm7 = vweird.f32 %v52_v28 }
  0x2d   :  { %2062 = vmatmul.msk.f32.vlgmr.msra.gmra.mxu0 %vm65_vm2, %v49_v54  ;;  %2070 = vmatmul.msk.f32.vlgmr.msra.gmra.mxu1 %vm65_vm2, %v49_v54  ;;  %v2542_v32 = vld [vmem:[#allocation2 + $0x330] sm:$0xff]  ;;  %v2544_v33 = vld [vmem:[#allocation2 + $0x300] sm:$0xff]  ;;  %v2546_v34 = vld [vmem:[#allocation2 + $0x308] sm:$0xff] }
  0x2e   :  { %2078 = vmatmul.msk.f32.vlgmr.msra.gmra.mxu2 %vm65_vm2, %v49_v54  ;;  %2086 = vmatmul.msk.f32.vlgmr.msra.gmra.mxu3 %vm65_vm2, %v49_v54  ;;  %v2550_v35 = vld [vmem:[#allocation2 + $0x318] sm:$0xff]  ;;  %v2552_v36 = vld [vmem:[#allocation2 + $0x310] sm:$0xff]  ;;  %v2555_v37 = vld [vmem:[#allocation2 + $0x2e0] sm:$0xff] }
  0x2f   :  { %373 = vmatpush.msrb.mxu0 %v2444_v2  ;;  %393 = vmatpush.msrb.mxu1 %v2446_v3  ;;  %v2557_v38 = vld [vmem:[#allocation2 + $0x2e8] sm:$0xff]  ;;  %v2562_v39 = vld [vmem:[#allocation2 + $0x2f8] sm:$0xff]  ;;  %v2564_v40 = vld [vmem:[#allocation2 + $0x2f0] sm:$0xff] }
  0x30   :  { %433 = vmatpush.msrb.mxu3 %v2448_v4  ;;  %413 = vmatpush.msrb.mxu2 %v2450_v5  ;;  %vm68_vm8 = vmxor %vm60_vm7, %vm2401_vm1  ;;  %v53_v41 = vld [vmem:[%s3406_s0 + $0x20] sm:$0xff]  ;;  %v2576_v43 = vld [vmem:[#allocation2 + $0x2c8] sm:$0xff] }
  0x31   :  { %374 = vmatpush.msrb.mxu0 %v2452_v6  ;;  %394 = vmatpush.msrb.mxu1 %v2454_v7  ;;  %v2574_v42 = vld [vmem:[#allocation2 + $0x2c0] sm:$0xff]  ;;  %v2580_v44 = vld [vmem:[#allocation2 + $0x2d8] sm:$0xff]  ;;  %v2582_v45 = vld [vmem:[#allocation2 + $0x2d0] sm:$0xff]  ;;  %vm61_vm9 = vweird.f32 %v53_v41 }
  0x32   :  { %434 = vmatpush.msrb.mxu3 %v2460_v9  ;;  %414 = vmatpush.msrb.mxu2 %v2462_v10  ;;  %3521 = vst [vmem:[#allocation8_spill] sm:$0xff] %v2580_v44  ;;  %v2584_v46 = vld [vmem:[#allocation2 + $0x2a0] sm:$0xff]  ;;  %v2586_v47 = vld [vmem:[#allocation2 + $0x2a8] sm:$0xff]  ;;  %v2590_v48 = vld [vmem:[#allocation2 + $0x2b8] sm:$0xff] }
  0x33   :  { %375 = vmatpush.msrb.mxu0 %v2458_v8  ;;  %395 = vmatpush.msrb.mxu1 %v2470_v12  ;;  %3522 = vst [vmem:[#allocation9_spill] sm:$0xff] %v2582_v45  ;;  %v2592_v49 = vld [vmem:[#allocation2 + $0x2b0] sm:$0xff]  ;;  %v2595_v50 = vld [vmem:[#allocation2 + $0x280] sm:$0xff]  ;;  %v2597_v51 = vld [vmem:[#allocation2 + $0x288] sm:$0xff] }
  0x34   :  { %435 = vmatpush.msrb.mxu3 %v2472_v13  ;;  %415 = vmatpush.msrb.mxu2 %v2477_v14  ;;  %3523 = vst [vmem:[#allocation10_spill] sm:$0xff] %v2584_v46  ;;  %v2602_v52 = vld [vmem:[#allocation2 + $0x298] sm:$0xff]  ;;  %v2604_v53 = vld [vmem:[#allocation2 + $0x290] sm:$0xff]  ;;  %vm69_vm10 = vmxor %vm61_vm9, %vm2401_vm1 }
  0x35   :  { %2063 = vmatmul.msk.f32.gmra.mxu0 %vm2466_vm4, %v50_v1  ;;  %2071 = vmatmul.msk.f32.gmra.mxu1 %vm2466_vm4, %v50_v1  ;;  %3524 = vst [vmem:[#allocation11_spill] sm:$0xff] %v2586_v47  ;;  %v54_v54 = vld [vmem:[%s3406_s0 + $0x28] sm:$0xff]  ;;  %v2614_v55 = vld [vmem:[#allocation2 + $0x260] sm:$0xff]  ;;  %v2620_v57 = vld [vmem:[#allocation2 + $0x278] sm:$0xff] }
  0x36   :  { %2079 = vmatmul.msk.f32.gmra.mxu2 %vm2466_vm4, %v50_v1  ;;  %2087 = vmatmul.msk.f32.gmra.mxu3 %vm2466_vm4, %v50_v1  ;;  %3525 = vst [vmem:[#allocation12_spill] sm:$0xff] %v2590_v48  ;;  %v2616_v56 = vld [vmem:[#allocation2 + $0x268] sm:$0xff]  ;;  %v2622_v58 = vld [vmem:[#allocation2 + $0x270] sm:$0xff]  ;;  %v2624_v59 = vld [vmem:[#allocation2 + $0x240] sm:$0xff]  ;;  %vm62_vm11 = vweird.f32 %v54_v54 }
  0x37   :  { %376 = vmatpush.msrb.mxu0 %v2483_v15  ;;  %396 = vmatpush.msrb.mxu1 %v2485_v16  ;;  %3526 = vst [vmem:[#allocation13_spill] sm:$0xff] %v2592_v49  ;;  %v2626_v60 = vld [vmem:[#allocation2 + $0x248] sm:$0xff]  ;;  %v2630_v61 = vld [vmem:[#allocation2 + $0x258] sm:$0xff]  ;;  %v2632_v62 = vld [vmem:[#allocation2 + $0x250] sm:$0xff] }
  0x38   :  { %436 = vmatpush.msrb.mxu3 %v2496_v18  ;;  %416 = vmatpush.msrb.mxu2 %v2498_v19  ;;  %3527 = vst [vmem:[#allocation14_spill] sm:$0xff] %v2595_v50  ;;  %v2635_v63 = vld [vmem:[#allocation2 + $0x220] sm:$0xff]  ;;  %v2637_v0 = vld [vmem:[#allocation2 + $0x228] sm:$0xff]  ;;  %v2642_v1 = vld [vmem:[#allocation2 + $0x230] sm:$0xff] }
  0x39   :  { %377 = vmatpush.msrb.mxu0 %v2504_v20  ;;  %397 = vmatpush.msrb.mxu1 %v2506_v21  ;;  %3528 = vst [vmem:[#allocation15_spill] sm:$0xff] %v2597_v51  ;;  %v2644_v11 = vld [vmem:[#allocation2 + $0x238] sm:$0xff]  ;;  %vm70_vm12 = vmxor %vm62_vm11, %vm2401_vm1 }
  0x3a   :  { %437 = vmatpush.msrb.mxu3 %v2510_v22  ;;  %417 = vmatpush.msrb.mxu2 %v2512_v23  ;;  %3529 = vst [vmem:[#allocation16_spill] sm:$0xff] %v2602_v52 }
  0x3b   :  { %378 = vmatpush.msrb.mxu0 %v2515_v24  ;;  %398 = vmatpush.msrb.mxu1 %v2517_v25  ;;  %3530 = vst [vmem:[#allocation17_spill] sm:$0xff] %v2604_v53 }
  0x3c   :  { %438 = vmatpush.msrb.mxu3 %v2522_v26  ;;  %418 = vmatpush.msrb.mxu2 %v2524_v27  ;;  %3531 = vst [vmem:[#allocation18_spill] sm:$0xff] %v2614_v55 }
  0x3d   :  { %2064 = vmatmul.msk.f32.gmra.mxu0 %vm67_vm6, %v51_v17  ;;  %2072 = vmatmul.msk.f32.gmra.mxu1 %vm67_vm6, %v51_v17  ;;  %3532 = vst [vmem:[#allocation19_spill] sm:$0xff] %v2616_v56 }
  0x3e   :  { %2080 = vmatmul.msk.f32.gmra.mxu2 %vm67_vm6, %v51_v17  ;;  %2088 = vmatmul.msk.f32.gmra.mxu3 %vm67_vm6, %v51_v17  ;;  %3533 = vst [vmem:[#allocation20_spill] sm:$0xff] %v2620_v57  ;;  %v55_v17 = vld [vmem:[%s3406_s0 + $0x30] sm:$0xff] }
  0x3f   :  { %379 = vmatpush.msrb.mxu0 %v2534_v29  ;;  %399 = vmatpush.msrb.mxu1 %v2536_v30  ;;  %3534 = vst [vmem:[#allocation21_spill] sm:$0xff] %v2622_v58  ;;  %vm63_vm13 = vweird.f32 %v55_v17 }
  0x40   :  { %439 = vmatpush.msrb.mxu3 %v2540_v31  ;;  %419 = vmatpush.msrb.mxu2 %v2542_v32  ;;  %3535 = vst [vmem:[#allocation22_spill] sm:$0xff] %v2624_v59  ;;  %vm71_vm14 = vmxor %vm63_vm13, %vm2401_vm1 }
  0x41   :  { %380 = vmatpush.msrb.mxu0 %v2544_v33  ;;  %400 = vmatpush.msrb.mxu1 %v2546_v34  ;;  %3536 = vst [vmem:[#allocation23_spill] sm:$0xff] %v2626_v60 }
  0x42   :  { %440 = vmatpush.msrb.mxu3 %v2550_v35  ;;  %420 = vmatpush.msrb.mxu2 %v2552_v36  ;;  %3537 = vst [vmem:[#allocation24_spill] sm:$0xff] %v2630_v61 }
  0x43   :  { %381 = vmatpush.msrb.mxu0 %v2555_v37  ;;  %401 = vmatpush.msrb.mxu1 %v2557_v38  ;;  %3538 = vst [vmem:[#allocation25_spill] sm:$0xff] %v2632_v62 }
  0x44   :  { %441 = vmatpush.msrb.mxu3 %v2562_v39  ;;  %421 = vmatpush.msrb.mxu2 %v2564_v40  ;;  %3539 = vst [vmem:[#allocation26_spill] sm:$0xff] %v2635_v63 }
  0x45   :  { %2065 = vmatmul.msk.f32.gmra.mxu0 %vm68_vm8, %v52_v28  ;;  %2073 = vmatmul.msk.f32.gmra.mxu1 %vm68_vm8, %v52_v28  ;;  %3540 = vst [vmem:[#allocation27_spill] sm:$0xff] %v2637_v0 }
  0x46   :  { %2081 = vmatmul.msk.f32.gmra.mxu2 %vm68_vm8, %v52_v28  ;;  %2089 = vmatmul.msk.f32.gmra.mxu3 %vm68_vm8, %v52_v28  ;;  %3541 = vst [vmem:[#allocation28_spill] sm:$0xff] %v2642_v1  ;;  %v2654_v28 = vld [vmem:[#allocation2 + $0x200] sm:$0xff] }
  0x47   :  { %382 = vmatpush.msrb.mxu0 %v2574_v42  ;;  %402 = vmatpush.msrb.mxu1 %v2576_v43  ;;  %3542 = vst [vmem:[#allocation29_spill] sm:$0xff] %v2644_v11 }
  0x48   :  { %442 = vmatpush.msrb.mxu3 %v2580_v44  ;;  %422 = vmatpush.msrb.mxu2 %v2582_v45  ;;  %3543 = vst [vmem:[#allocation30_spill] sm:$0xff] %v2654_v28 }
  0x49   :  { %383 = vmatpush.msrb.mxu0 %v2584_v46  ;;  %403 = vmatpush.msrb.mxu1 %v2586_v47 }
  0x4a   :  { %443 = vmatpush.msrb.mxu3 %v2590_v48  ;;  %423 = vmatpush.msrb.mxu2 %v2592_v49 }
  0x4b   :  { %384 = vmatpush.msrb.mxu0 %v2595_v50  ;;  %404 = vmatpush.msrb.mxu1 %v2597_v51 }
  0x4c   :  { %444 = vmatpush.msrb.mxu3 %v2602_v52  ;;  %424 = vmatpush.msrb.mxu2 %v2604_v53 }
  0x4d   :  { %2066 = vmatmul.msk.f32.gmra.mxu0 %vm69_vm10, %v53_v41  ;;  %2074 = vmatmul.msk.f32.gmra.mxu1 %vm69_vm10, %v53_v41 }
  0x4e   :  { %2082 = vmatmul.msk.f32.gmra.mxu2 %vm69_vm10, %v53_v41  ;;  %2090 = vmatmul.msk.f32.gmra.mxu3 %vm69_vm10, %v53_v41  ;;  %v2656_v41 = vld [vmem:[#allocation2 + $0x208] sm:$0xff] }
  0x4f   :  { %385 = vmatpush.msrb.mxu0 %v2614_v55  ;;  %405 = vmatpush.msrb.mxu1 %v2616_v56  ;;  %3544 = vst [vmem:[#allocation31_spill] sm:$0xff] %v2656_v41 }
  0x50   :  { %445 = vmatpush.msrb.mxu3 %v2620_v57  ;;  %425 = vmatpush.msrb.mxu2 %v2622_v58 }
  0x51   :  { %386 = vmatpush.msrb.mxu0 %v2624_v59  ;;  %406 = vmatpush.msrb.mxu1 %v2626_v60 }
  0x52   :  { %446 = vmatpush.msrb.mxu3 %v2630_v61  ;;  %426 = vmatpush.msrb.mxu2 %v2632_v62  ;;  %v2660_v61 = vld [vmem:[#allocation2 + $0x210] sm:$0xff]  ;;  %v2662_v62 = vld [vmem:[#allocation2 + $0x218] sm:$0xff] }
  0x53   :  { %387 = vmatpush.msrb.mxu0 %v2635_v63  ;;  %407 = vmatpush.msrb.mxu1 %v2637_v0  ;;  %3545 = vst [vmem:[#allocation32_spill] sm:$0xff] %v2660_v61 }
  0x54   :  { %427 = vmatpush.msrb.mxu2 %v2642_v1  ;;  %447 = vmatpush.msrb.mxu3 %v2644_v11  ;;  %3546 = vst [vmem:[#allocation33_spill] sm:$0xff] %v2662_v62 }
  0x55   :  { %2067 = vmatmul.msk.f32.gmra.mxu0 %vm70_vm12, %v54_v54  ;;  %2075 = vmatmul.msk.f32.gmra.mxu1 %vm70_vm12, %v54_v54 }
  0x56   :  { %2083 = vmatmul.msk.f32.gmra.mxu2 %vm70_vm12, %v54_v54  ;;  %2091 = vmatmul.msk.f32.gmra.mxu3 %vm70_vm12, %v54_v54  ;;  %v56_v54 = vld [vmem:[%s3406_s0 + $0x38] sm:$0xff] }
  0x57   :  { %388 = vmatpush.msrb.mxu0 %v2654_v28  ;;  %408 = vmatpush.msrb.mxu1 %v2656_v41  ;;  %vm64_vm15 = vweird.f32 %v56_v54 }
  0x58   :  { %428 = vmatpush.msrb.mxu2 %v2660_v61  ;;  %448 = vmatpush.msrb.mxu3 %v2662_v62  ;;  %vm72_vm0 = vmxor %vm64_vm15, %vm2401_vm1 }
  0x59   :  { %520 = vmatpush.msra.mxu0 %v2444_v2  ;;  %540 = vmatpush.msra.mxu1 %v2446_v3 }
  0x5a   :  { %560 = vmatpush.msra.mxu2 %v2450_v5  ;;  %580 = vmatpush.msra.mxu3 %v2448_v4 }
  0x5b   :  { %521 = vmatpush.msra.mxu0 %v2452_v6  ;;  %541 = vmatpush.msra.mxu1 %v2454_v7 }
  0x5c   :  { %561 = vmatpush.msra.mxu2 %v2462_v10  ;;  %581 = vmatpush.msra.mxu3 %v2460_v9 }
  0x5d   :  { %2068 = vmatmul.msk.f32.gmra.mxu0 %vm71_vm14, %v55_v17  ;;  %2076 = vmatmul.msk.f32.gmra.mxu1 %vm71_vm14, %v55_v17 }
  0x5e   :  { %2084 = vmatmul.msk.f32.gmra.mxu2 %vm71_vm14, %v55_v17  ;;  %2092 = vmatmul.msk.f32.gmra.mxu3 %vm71_vm14, %v55_v17  ;;  %v2402_v17 = vmov 0.0  }
  0x5f   :  { %522 = vmatpush.msra.mxu0 %v2458_v8  ;;  %542 = vmatpush.msra.mxu1 %v2470_v12 }
  0x60   :  { %562 = vmatpush.msra.mxu2 %v2477_v14  ;;  %582 = vmatpush.msra.mxu3 %v2472_v13 }
  0x61   :  { %523 = vmatpush.msra.mxu0 %v2483_v15  ;;  %543 = vmatpush.msra.mxu1 %v2485_v16 }
  0x62   :  { %563 = vmatpush.msra.mxu2 %v2498_v19  ;;  %583 = vmatpush.msra.mxu3 %v2496_v18 }
  0x63   :  { %524 = vmatpush.msra.mxu0 %v2504_v20  ;;  %544 = vmatpush.msra.mxu1 %v2506_v21 }
  0x64   :  { %564 = vmatpush.msra.mxu2 %v2512_v23  ;;  %584 = vmatpush.msra.mxu3 %v2510_v22 }
  0x65   :  { %2069 = vmatmul.msk.f32.gmra.mxu0 %vm72_vm0, %v56_v54  ;;  %2077 = vmatmul.msk.f32.gmra.mxu1 %vm72_vm0, %v56_v54 }
  0x66   :  { %2085 = vmatmul.msk.f32.gmra.mxu2 %vm72_vm0, %v56_v54  ;;  %2093 = vmatmul.msk.f32.gmra.mxu3 %vm72_vm0, %v56_v54  ;;  %v3547_v54 = vld [vmem:[#allocation25_spill] sm:$0xff] }
  0x67   :  { %525 = vmatpush.msra.mxu0 %v2515_v24  ;;  %545 = vmatpush.msra.mxu1 %v2517_v25 }
  0x68   :  { %565 = vmatpush.msra.mxu2 %v2524_v27  ;;  %585 = vmatpush.msra.mxu3 %v2522_v26 }
  0x69   :  { %526 = vmatpush.msra.mxu0 %v2534_v29  ;;  %546 = vmatpush.msra.mxu1 %v2536_v30 }
  0x6a   :  { %566 = vmatpush.msra.mxu2 %v2542_v32  ;;  %586 = vmatpush.msra.mxu3 %v2540_v31 }
  0x6b   :  { %527 = vmatpush.msra.mxu0 %v2544_v33  ;;  %547 = vmatpush.msra.mxu1 %v2546_v34 }
  0x6c   :  { %567 = vmatpush.msra.mxu2 %v2552_v36  ;;  %587 = vmatpush.msra.mxu3 %v2550_v35 }
  0x6d   :  { %389 = vmatmul.f32.vlgmr.msrb.gmra.mxu0 %v2402_v17  ;;  %409 = vmatmul.f32.vlgmr.msrb.gmra.mxu1 %v2402_v17 }
  0x6e   :  { %429 = vmatmul.f32.vlgmr.msrb.gmra.mxu2 %v2402_v17  ;;  %449 = vmatmul.f32.vlgmr.msrb.gmra.mxu3 %v2402_v17  ;;  %v3548_v17 = vld [vmem:[#allocation24_spill] sm:$0xff] }
  0x6f   :  { %528 = vmatpush.msra.mxu0 %v2555_v37  ;;  %548 = vmatpush.msra.mxu1 %v2557_v38 }
  0x70   :  { %568 = vmatpush.msra.mxu2 %v2564_v40  ;;  %588 = vmatpush.msra.mxu3 %v2562_v39 }
  0x71   :  { %529 = vmatpush.msra.mxu0 %v2574_v42  ;;  %549 = vmatpush.msra.mxu1 %v2576_v43 }
  0x72   :  { %569 = vmatpush.msra.mxu2 %v2582_v45  ;;  %589 = vmatpush.msra.mxu3 %v2580_v44 }
  0x73   :  { %530 = vmatpush.msra.mxu0 %v2584_v46  ;;  %550 = vmatpush.msra.mxu1 %v2586_v47 }
  0x74   :  { %570 = vmatpush.msra.mxu2 %v2592_v49  ;;  %590 = vmatpush.msra.mxu3 %v2590_v48 }
  0x75   :  { %531 = vmatpush.msra.mxu0 %v2595_v50  ;;  %551 = vmatpush.msra.mxu1 %v2597_v51 }
  0x76   :  { %571 = vmatpush.msra.mxu2 %v2604_v53  ;;  %591 = vmatpush.msra.mxu3 %v2602_v52 }
  0x77   :  { %532 = vmatpush.msra.mxu0 %v2614_v55  ;;  %552 = vmatpush.msra.mxu1 %v2616_v56 }
  0x78   :  { %572 = vmatpush.msra.mxu2 %v2622_v58  ;;  %592 = vmatpush.msra.mxu3 %v2620_v57 }
  0x79   :  { %533 = vmatpush.msra.mxu0 %v2624_v59  ;;  %553 = vmatpush.msra.mxu1 %v2626_v60 }
  0x7a   :  { %573 = vmatpush.msra.mxu2 %v3547_v54  ;;  %593 = vmatpush.msra.mxu3 %v3548_v17 }
  0x7b   :  { %534 = vmatpush.msra.mxu0 %v2635_v63  ;;  %554 = vmatpush.msra.mxu1 %v2637_v0 }
  0x7c   :  { %574 = vmatpush.msra.mxu2 %v2642_v1  ;;  %594 = vmatpush.msra.mxu3 %v2644_v11 }
  0x7d   :  { %535 = vmatpush.msra.mxu0 %v2654_v28  ;;  %555 = vmatpush.msra.mxu1 %v2656_v41 }
  0x7e   :  { %575 = vmatpush.msra.mxu2 %v2660_v61  ;;  %595 = vmatpush.msra.mxu3 %v2662_v62 }
  0x7f   :  { %667 = vmatpush.msrb.mxu0 %v2444_v2  ;;  %687 = vmatpush.msrb.mxu1 %v2446_v3 }
  0x80   :  { %707 = vmatpush.msrb.mxu2 %v2450_v5  ;;  %727 = vmatpush.msrb.mxu3 %v2448_v4 }
  0x81   :  { %668 = vmatpush.msrb.mxu0 %v2452_v6  ;;  %688 = vmatpush.msrb.mxu1 %v2454_v7 }
  0x82   :  { %708 = vmatpush.msrb.mxu2 %v2462_v10  ;;  %728 = vmatpush.msrb.mxu3 %v2460_v9 }
  0x83   :  { %669 = vmatpush.msrb.mxu0 %v2458_v8  ;;  %689 = vmatpush.msrb.mxu1 %v2470_v12 }
  0x84   :  { %709 = vmatpush.msrb.mxu2 %v2477_v14  ;;  %729 = vmatpush.msrb.mxu3 %v2472_v13 }
  0x85   :  { %670 = vmatpush.msrb.mxu0 %v2483_v15  ;;  %690 = vmatpush.msrb.mxu1 %v2485_v16 }
  0x86   :  { %710 = vmatpush.msrb.mxu2 %v2498_v19  ;;  %730 = vmatpush.msrb.mxu3 %v2496_v18 }
  0x87   :  { %671 = vmatpush.msrb.mxu0 %v2504_v20  ;;  %691 = vmatpush.msrb.mxu1 %v2506_v21 }
  0x88   :  { %711 = vmatpush.msrb.mxu2 %v2512_v23  ;;  %731 = vmatpush.msrb.mxu3 %v2510_v22 }
  0x89   :  { %672 = vmatpush.msrb.mxu0 %v2515_v24  ;;  %692 = vmatpush.msrb.mxu1 %v2517_v25 }
  0x8a   :  { %712 = vmatpush.msrb.mxu2 %v2524_v27  ;;  %732 = vmatpush.msrb.mxu3 %v2522_v26 }
  0x8b   :  { %673 = vmatpush.msrb.mxu0 %v2534_v29  ;;  %693 = vmatpush.msrb.mxu1 %v2536_v30 }
  0x8c   :  { %713 = vmatpush.msrb.mxu2 %v2542_v32  ;;  %733 = vmatpush.msrb.mxu3 %v2540_v31 }
  0x8d   :  { %674 = vmatpush.msrb.mxu0 %v2544_v33  ;;  %694 = vmatpush.msrb.mxu1 %v2546_v34 }
  0x8e   :  { %714 = vmatpush.msrb.mxu2 %v2552_v36  ;;  %734 = vmatpush.msrb.mxu3 %v2550_v35 }
  0x8f   :  { %675 = vmatpush.msrb.mxu0 %v2555_v37  ;;  %695 = vmatpush.msrb.mxu1 %v2557_v38 }
  0x90   :  { %715 = vmatpush.msrb.mxu2 %v2564_v40  ;;  %735 = vmatpush.msrb.mxu3 %v2562_v39 }
  0x91   :  { %676 = vmatpush.msrb.mxu0 %v2574_v42  ;;  %696 = vmatpush.msrb.mxu1 %v2576_v43 }
  0x92   :  { %716 = vmatpush.msrb.mxu2 %v2582_v45  ;;  %736 = vmatpush.msrb.mxu3 %v2580_v44 }
  0x93   :  { %677 = vmatpush.msrb.mxu0 %v2584_v46  ;;  %697 = vmatpush.msrb.mxu1 %v2586_v47 }
  0x94   :  { %717 = vmatpush.msrb.mxu2 %v2592_v49  ;;  %737 = vmatpush.msrb.mxu3 %v2590_v48 }
  0x95   :  { %678 = vmatpush.msrb.mxu0 %v2595_v50  ;;  %698 = vmatpush.msrb.mxu1 %v2597_v51 }
  0x96   :  { %718 = vmatpush.msrb.mxu2 %v2604_v53  ;;  %738 = vmatpush.msrb.mxu3 %v2602_v52 }
  0x97   :  { %679 = vmatpush.msrb.mxu0 %v2614_v55  ;;  %699 = vmatpush.msrb.mxu1 %v2616_v56 }
  0x98   :  { %719 = vmatpush.msrb.mxu2 %v2622_v58  ;;  %739 = vmatpush.msrb.mxu3 %v2620_v57 }
  0x99   :  { %680 = vmatpush.msrb.mxu0 %v2624_v59  ;;  %700 = vmatpush.msrb.mxu1 %v2626_v60 }
  0x9a   :  { %720 = vmatpush.msrb.mxu2 %v3547_v54  ;;  %740 = vmatpush.msrb.mxu3 %v3548_v17 }
  0x9b   :  { %681 = vmatpush.msrb.mxu0 %v2635_v63  ;;  %701 = vmatpush.msrb.mxu1 %v2637_v0 }
  0x9c   :  { %721 = vmatpush.msrb.mxu2 %v2642_v1  ;;  %741 = vmatpush.msrb.mxu3 %v2644_v11 }
  0x9d   :  { %682 = vmatpush.msrb.mxu0 %v2654_v28  ;;  %702 = vmatpush.msrb.mxu1 %v2656_v41 }
  0x9e   :  { %722 = vmatpush.msrb.mxu2 %v2660_v61  ;;  %742 = vmatpush.msrb.mxu3 %v2662_v62 }
  0xaa   :  { %v226_v60 = vpop.f32.mrf.mxu0  ;;  %v267_v54 = vpop.f32.mrf.mxu1 }
  0xb1   :  { %v308_v59 = vpop.f32.mrf.mxu2  ;;  %v349_v17 = vpop.f32.mrf.mxu3 }
  0xb2   :  { %v2801_v57 = vpop.f32.mrf.mxu0  ;;  %v2803_v63 = vpop.f32.mrf.mxu1 }
  0xb3   :  { %3549 = vst [vmem:[#allocation34_spill] sm:$0xff] %v2801_v57 }
  0xb4   :  { %3550 = vst [vmem:[#allocation35_spill] sm:$0xff] %v2803_v63 }
  0xb9   :  { %v2805_v0 = vpop.f32.mrf.mxu2  ;;  %v2807_v1 = vpop.f32.mrf.mxu3 }
  0xba   :  { %3551 = vst [vmem:[#allocation36_spill] sm:$0xff] %v2805_v0  ;;  %v2809_v11 = vpop.f32.mrf.mxu0  ;;  %v2811_v28 = vpop.f32.mrf.mxu1 }
  0xbb   :  { %3552 = vst [vmem:[#allocation37_spill] sm:$0xff] %v2807_v1 }
  0xbc   :  { %3553 = vst [vmem:[#allocation38_spill] sm:$0xff] %v2809_v11 }
  0xbd   :  { %3554 = vst [vmem:[#allocation39_spill] sm:$0xff] %v2811_v28 }
  0xc1   :  { %v2813_v41 = vpop.f32.mrf.mxu2  ;;  %v2815_v61 = vpop.f32.mrf.mxu3 }
  0xc2   :  { %3555 = vst [vmem:[#allocation40_spill] sm:$0xff] %v2813_v41  ;;  %v2817_v62 = vpop.f32.mrf.mxu0  ;;  %v2819_v58 = vpop.f32.mrf.mxu1 }
  0xc3   :  { %3556 = vst [vmem:[#allocation41_spill] sm:$0xff] %v2815_v61 }
  0xc4   :  { %3557 = vst [vmem:[#allocation42_spill] sm:$0xff] %v2817_v62 }
  0xc5   :  { %3558 = vst [vmem:[#allocation43_spill] sm:$0xff] %v2819_v58 }
  0xc9   :  { %v2821_v56 = vpop.f32.mrf.mxu2  ;;  %v2823_v57 = vpop.f32.mrf.mxu3 }
  0xca   :  { %3559 = vst [vmem:[#allocation44_spill] sm:$0xff] %v2821_v56  ;;  %v2825_v63 = vpop.f32.mrf.mxu0  ;;  %v2827_v0 = vpop.f32.mrf.mxu1 }
  0xcb   :  { %3560 = vst [vmem:[#allocation45_spill] sm:$0xff] %v2823_v57 }
  0xcc   :  { %3561 = vst [vmem:[#allocation46_spill] sm:$0xff] %v2825_v63 }
  0xcd   :  { %3562 = vst [vmem:[#allocation47_spill] sm:$0xff] %v2827_v0 }
  0xd1   :  { %v2829_v1 = vpop.f32.mrf.mxu3  ;;  %v2835_v41 = vpop.f32.mrf.mxu2 }
  0xd2   :  { %3563 = vst [vmem:[#allocation48_spill] sm:$0xff] %v2829_v1  ;;  %v2831_v11 = vpop.f32.mrf.mxu0  ;;  %v2833_v28 = vpop.f32.mrf.mxu1 }
  0xd3   :  { %3564 = vst [vmem:[#allocation49_spill] sm:$0xff] %v2831_v11 }
  0xd4   :  { %3565 = vst [vmem:[#allocation50_spill] sm:$0xff] %v2833_v28 }
  0xd5   :  { %3566 = vst [vmem:[#allocation51_spill] sm:$0xff] %v2835_v41 }
  0xd9   :  { %v2837_v61 = vpop.f32.mrf.mxu3  ;;  %v2843_v56 = vpop.f32.mrf.mxu2 }
  0xda   :  { %3567 = vst [vmem:[#allocation52_spill] sm:$0xff] %v2837_v61  ;;  %v2839_v62 = vpop.f32.mrf.mxu0  ;;  %v2841_v58 = vpop.f32.mrf.mxu1 }
  0xdb   :  { %3568 = vst [vmem:[#allocation53_spill] sm:$0xff] %v2839_v62 }
  0xdc   :  { %3569 = vst [vmem:[#allocation54_spill] sm:$0xff] %v2841_v58 }
  0xdd   :  { %3570 = vst [vmem:[#allocation55_spill] sm:$0xff] %v2843_v56 }
  0xe1   :  { %v2845_v57 = vpop.f32.mrf.mxu3  ;;  %v2851_v1 = vpop.f32.mrf.mxu2 }
  0xe2   :  { %3571 = vst [vmem:[#allocation56_spill] sm:$0xff] %v2845_v57  ;;  %v2847_v63 = vpop.f32.mrf.mxu0  ;;  %v2849_v0 = vpop.f32.mrf.mxu1 }
  0xe3   :  { %3572 = vst [vmem:[#allocation57_spill] sm:$0xff] %v2847_v63 }
  0xe4   :  { %3573 = vst [vmem:[#allocation58_spill] sm:$0xff] %v2849_v0 }
  0xe5   :  { %3574 = vst [vmem:[#allocation59_spill] sm:$0xff] %v2851_v1 }
  0xe9   :  { %v2853_v11 = vpop.f32.mrf.mxu3  ;;  %v2855_v58 = vpop.f32.mrf.mxu2 }
  0xea   :  { %3575 = vst [vmem:[#allocation60_spill] sm:$0xff] %v2853_v11  ;;  %v390_v28 = vpop.f32.mrf.mxu0  ;;  %v410_v41 = vpop.f32.mrf.mxu1 }
  0xeb   :  { %v453_v55 = vadd.f32 %v390_v28, %v226_v60  ;;  %v454_v61 = vadd.f32 %v410_v41, %v267_v54  ;;  %3576 = vst [vmem:[#allocation61_spill] sm:$0xff] %v2855_v58 }
  0xed   :  { %v2094_v52 = vmul.f32 -1.442695, %v453_v55  ;;  %v2095_v62 = vmul.f32 -1.442695, %v454_v61 }
  0xef   :  { %2137 = vpow2.f32 %v2094_v52 }
  0xf0   :  { %2139 = vpow2.f32 %v2095_v62 }
  0xf1   :  { %v450_v56 = vpop.f32.mrf.mxu3  ;;  %v430_v11 = vpop.f32.mrf.mxu2 }
  0xf2   :  { %v456_v57 = vadd.f32 %v450_v56, %v349_v17  ;;  %v455_v55 = vadd.f32 %v430_v11, %v308_v59 }
  0xf4   :  { %v2096_v53 = vmul.f32 -1.442695, %v456_v57 }
  0xf5   :  { %v2138_v63 = vpop.eup %2137 }
  0xf6   :  { %v2140_v51 = vpop.eup %2139  ;;  %v460_v0 = vadd.f32 1.0, %v2138_v63  ;;  %2141 = vpow2.f32 %v2096_v53 }
  0xf7   :  { %v479_v1 = vadd.f32 1.0, %v2140_v51 }
  0xf8   :  { %2143 = vrcp.f32 %v460_v0  ;;  %v472_v56 = vand.u32 2147483648, %v460_v0  ;;  %v470_v53 = vand.u32 2147483647, %v460_v0  ;;  %vm466_vm3 = vweird.f32 %v460_v0 }
  0xf9   :  { %2145 = vrcp.f32 %v479_v1  ;;  %v491_v57 = vand.u32 2147483648, %v479_v1  ;;  %v489_v63 = vand.u32 2147483647, %v479_v1  ;;  %vm485_vm4 = vweird.f32 %v479_v1 }
  0xfa   :  { %vm471_vm6 = vcmp.eq.f32.partialorder %v470_v53, 8.507059e+37 }
  0xfb   :  { %v492_v49 = vor.u32 1.1754944e-38, %v491_v57  ;;  %vm490_vm8 = vcmp.eq.f32.partialorder %v489_v63, 8.507059e+37 }
  0xfc   :  { %v2142_v50 = vpop.eup %2141 }
  0xfd   :  { %v499_v60 = vadd.f32 1.0, %v2142_v50  ;;  %v473_v50 = vor.u32 1.1754944e-38, %v472_v56 }
  0xfe   :  { %v2144_v28 = vpop.eup %2143 }
  0xff   :  { %v2146_v61 = vpop.eup %2145  ;;  %v462_v52 = vmul.f32 %v2144_v28, %v460_v0  ;;  %2147 = vrcp.f32 %v499_v60  ;;  %vm467_vm1 = vweird.f32 %v2144_v28  ;;  %vm505_vm10 = vweird.f32 %v499_v60 }
 0x100   :  { %v481_v62 = vmul.f32 %v2146_v61, %v479_v1  ;;  %2149 = vtanh.f32 %v455_v55  ;;  %vm486_vm2 = vweird.f32 %v2146_v61  ;;  %vm468_vm5 = vmor %vm466_vm3, %vm467_vm1  ;;  %v511_v1 = vand.u32 2147483648, %v499_v60 }
 0x101   :  { %v463_v41 = vsub.f32 1.0, %v462_v52  ;;  %vm487_vm7 = vmor %vm485_vm4, %vm486_vm2 }
 0x102   :  { %v482_v54 = vsub.f32 1.0, %v481_v62  ;;  %v512_v56 = vor.u32 1.1754944e-38, %v511_v1 }
 0x103   :  { %v464_v17 = vmul.f32 %v2144_v28, %v463_v41 }
 0x104   :  { %v483_v51 = vmul.f32 %v2146_v61, %v482_v54 }
 0x105   :  { %v2148_v58 = vpop.eup %2147  ;;  %v465_v48 = vadd.f32 %v2144_v28, %v464_v17 }
 0x106   :  { %v484_v59 = vadd.f32 %v2146_v61, %v483_v51  ;;  %v501_v11 = vmul.f32 %v2148_v58, %v499_v60  ;;  %v2150_v55 = vpop.eup %2149  ;;  %vm506_vm9 = vweird.f32 %v2148_v58 }
 0x107   :  { %v469_v52 = vsel %vm468_vm5, %v2144_v28, %v465_v48  ;;  %v509_v48 = vand.u32 2147483647, %v499_v60  ;;  %vm507_vm11 = vmor %vm505_vm10, %vm506_vm9 }
 0x108   :  { %v474_v62 = vsel %vm471_vm6, %v473_v50, %v469_v52  ;;  %v488_v41 = vsel %vm487_vm7, %v2146_v61, %v484_v59  ;;  %v502_v47 = vsub.f32 1.0, %v501_v11  ;;  %v3606_v59 = vld [vmem:[#allocation36_spill] sm:$0xff] }
 0x109   :  { %v493_v54 = vsel %vm490_vm8, %v492_v49, %v488_v41  ;;  %v516_v46 = vmul.f32 %v2150_v55, %v474_v62  ;;  %vm510_vm12 = vcmp.eq.f32.partialorder %v509_v48, 8.507059e+37 }
 0x10a   :  { %v515_v44 = vmul.f32 0.0, %v493_v54  ;;  %v503_v45 = vmul.f32 %v2148_v58, %v502_v47 }
 0x10c   :  { %v2857_v17 = vadd.f32 %v516_v46, %v515_v44  ;;  %v504_v0 = vadd.f32 %v2148_v58, %v503_v45 }
 0x10e   :  { %2151 = vtanh.f32 %v2857_v17  ;;  %v508_v28 = vsel %vm507_vm11, %v2148_v58, %v504_v0 }
 0x10f   :  { %v513_v57 = vsel %vm510_vm12, %v512_v56, %v508_v28 }
 0x114   :  { %v2152_v61 = vpop.eup %2151 }
 0x115   :  { %v519_v53 = vmul.f32 %v2152_v61, %v513_v57 }
 0x117   :  { %536 = vmatmul.f32.vlgmr.msra.gmra.mxu0 %v519_v53  ;;  %556 = vmatmul.f32.vlgmr.msra.gmra.mxu1 %v519_v53 }
 0x118   :  { %576 = vmatmul.f32.vlgmr.msra.gmra.mxu2 %v519_v53  ;;  %596 = vmatmul.f32.vlgmr.msra.gmra.mxu3 %v519_v53 }
 0x119   :  { %814 = vmatpush.msra.mxu0 %v2444_v2  ;;  %834 = vmatpush.msra.mxu1 %v2446_v3  ;;  %v3577_v2 = vld [vmem:[#allocation9_spill] sm:$0xff]  ;;  %v3578_v3 = vld [vmem:[#allocation8_spill] sm:$0xff] }
 0x11a   :  { %854 = vmatpush.msra.mxu2 %v2450_v5  ;;  %874 = vmatpush.msra.mxu3 %v2448_v4  ;;  %v3579_v4 = vld [vmem:[#allocation10_spill] sm:$0xff]  ;;  %v3580_v5 = vld [vmem:[#allocation11_spill] sm:$0xff] }
 0x11b   :  { %815 = vmatpush.msra.mxu0 %v2452_v6  ;;  %835 = vmatpush.msra.mxu1 %v2454_v7  ;;  %v3581_v6 = vld [vmem:[#allocation13_spill] sm:$0xff]  ;;  %v3582_v7 = vld [vmem:[#allocation12_spill] sm:$0xff] }
 0x11c   :  { %855 = vmatpush.msra.mxu2 %v2462_v10  ;;  %875 = vmatpush.msra.mxu3 %v2460_v9  ;;  %v3584_v9 = vld [vmem:[#allocation15_spill] sm:$0xff]  ;;  %v3585_v10 = vld [vmem:[#allocation17_spill] sm:$0xff] }
 0x11d   :  { %816 = vmatpush.msra.mxu0 %v2458_v8  ;;  %836 = vmatpush.msra.mxu1 %v2470_v12  ;;  %v3583_v8 = vld [vmem:[#allocation14_spill] sm:$0xff]  ;;  %v3586_v12 = vld [vmem:[#allocation16_spill] sm:$0xff] }
 0x11e   :  { %856 = vmatpush.msra.mxu2 %v2477_v14  ;;  %876 = vmatpush.msra.mxu3 %v2472_v13  ;;  %v3587_v13 = vld [vmem:[#allocation18_spill] sm:$0xff]  ;;  %v3588_v14 = vld [vmem:[#allocation19_spill] sm:$0xff] }
 0x11f   :  { %817 = vmatpush.msra.mxu0 %v2483_v15  ;;  %837 = vmatpush.msra.mxu1 %v2485_v16  ;;  %v3589_v15 = vld [vmem:[#allocation21_spill] sm:$0xff]  ;;  %v3590_v16 = vld [vmem:[#allocation20_spill] sm:$0xff] }
 0x120   :  { %857 = vmatpush.msra.mxu2 %v2498_v19  ;;  %877 = vmatpush.msra.mxu3 %v2496_v18  ;;  %v3591_v18 = vld [vmem:[#allocation22_spill] sm:$0xff]  ;;  %v3592_v19 = vld [vmem:[#allocation23_spill] sm:$0xff] }
 0x121   :  { %818 = vmatpush.msra.mxu0 %v2504_v20  ;;  %838 = vmatpush.msra.mxu1 %v2506_v21  ;;  %v3593_v20 = vld [vmem:[#allocation25_spill] sm:$0xff]  ;;  %v3594_v21 = vld [vmem:[#allocation24_spill] sm:$0xff] }
 0x122   :  { %858 = vmatpush.msra.mxu2 %v2512_v23  ;;  %878 = vmatpush.msra.mxu3 %v2510_v22  ;;  %v3595_v22 = vld [vmem:[#allocation26_spill] sm:$0xff]  ;;  %v3596_v23 = vld [vmem:[#allocation27_spill] sm:$0xff] }
 0x123   :  { %819 = vmatpush.msra.mxu0 %v2515_v24  ;;  %839 = vmatpush.msra.mxu1 %v2517_v25  ;;  %v3597_v24 = vld [vmem:[#allocation28_spill] sm:$0xff]  ;;  %v3598_v25 = vld [vmem:[#allocation29_spill] sm:$0xff] }
 0x124   :  { %859 = vmatpush.msra.mxu2 %v2524_v27  ;;  %879 = vmatpush.msra.mxu3 %v2522_v26  ;;  %v3599_v26 = vld [vmem:[#allocation30_spill] sm:$0xff]  ;;  %v3600_v27 = vld [vmem:[#allocation31_spill] sm:$0xff] }
 0x125   :  { %820 = vmatpush.msra.mxu0 %v2534_v29  ;;  %840 = vmatpush.msra.mxu1 %v2536_v30  ;;  %v3601_v29 = vld [vmem:[#allocation32_spill] sm:$0xff]  ;;  %v3602_v30 = vld [vmem:[#allocation33_spill] sm:$0xff] }
 0x126   :  { %860 = vmatpush.msra.mxu2 %v2542_v32  ;;  %880 = vmatpush.msra.mxu3 %v2540_v31 }
 0x127   :  { %821 = vmatpush.msra.mxu0 %v2544_v33  ;;  %841 = vmatpush.msra.mxu1 %v2546_v34  ;;  %v3603_v33 = vld [vmem:[#allocation34_spill] sm:$0xff] }
 0x128   :  { %861 = vmatpush.msra.mxu2 %v2552_v36  ;;  %881 = vmatpush.msra.mxu3 %v2550_v35  ;;  %v3604_v35 = vld [vmem:[#allocation35_spill] sm:$0xff] }
 0x129   :  { %822 = vmatpush.msra.mxu0 %v2555_v37  ;;  %842 = vmatpush.msra.mxu1 %v2557_v38 }
 0x12a   :  { %862 = vmatpush.msra.mxu2 %v2564_v40  ;;  %882 = vmatpush.msra.mxu3 %v2562_v39  ;;  %v3605_v40 = vld [vmem:[#allocation37_spill] sm:$0xff] }
 0x12b   :  { %823 = vmatpush.msra.mxu0 %v2574_v42  ;;  %843 = vmatpush.msra.mxu1 %v2576_v43 }
 0x12c   :  { %863 = vmatpush.msra.mxu2 %v3577_v2  ;;  %883 = vmatpush.msra.mxu3 %v3578_v3 }
 0x12d   :  { %824 = vmatpush.msra.mxu0 %v3579_v4  ;;  %844 = vmatpush.msra.mxu1 %v3580_v5 }
 0x12e   :  { %864 = vmatpush.msra.mxu2 %v3581_v6  ;;  %884 = vmatpush.msra.mxu3 %v3582_v7 }
 0x12f   :  { %825 = vmatpush.msra.mxu0 %v3583_v8  ;;  %845 = vmatpush.msra.mxu1 %v3584_v9 }
 0x130   :  { %865 = vmatpush.msra.mxu2 %v3585_v10  ;;  %885 = vmatpush.msra.mxu3 %v3586_v12 }
 0x131   :  { %826 = vmatpush.msra.mxu0 %v3587_v13  ;;  %846 = vmatpush.msra.mxu1 %v3588_v14 }
 0x132   :  { %866 = vmatpush.msra.mxu2 %v3589_v15  ;;  %886 = vmatpush.msra.mxu3 %v3590_v16 }
 0x133   :  { %827 = vmatpush.msra.mxu0 %v3591_v18  ;;  %847 = vmatpush.msra.mxu1 %v3592_v19 }
 0x134   :  { %867 = vmatpush.msra.mxu2 %v3593_v20  ;;  %887 = vmatpush.msra.mxu3 %v3594_v21 }
 0x135   :  { %828 = vmatpush.msra.mxu0 %v3595_v22  ;;  %848 = vmatpush.msra.mxu1 %v3596_v23 }
 0x136   :  { %868 = vmatpush.msra.mxu2 %v3597_v24  ;;  %888 = vmatpush.msra.mxu3 %v3598_v25 }
 0x137   :  { %829 = vmatpush.msra.mxu0 %v3599_v26  ;;  %849 = vmatpush.msra.mxu1 %v3600_v27 }
 0x138   :  { %869 = vmatpush.msra.mxu2 %v3601_v29  ;;  %889 = vmatpush.msra.mxu3 %v3602_v30 }
 0x194   :  { %v537_v31 = vpop.f32.mrf.mxu0  ;;  %v557_v32 = vpop.f32.mrf.mxu1 }
 0x195   :  { %v600_v34 = vadd.f32 %v537_v31, %v3603_v33  ;;  %v601_v36 = vadd.f32 %v557_v32, %v3604_v35 }
 0x197   :  { %v2097_v37 = vmul.f32 -1.442695, %v600_v34  ;;  %v2098_v38 = vmul.f32 -1.442695, %v601_v36 }
 0x199   :  { %2153 = vpow2.f32 %v2097_v37 }
 0x19a   :  { %2155 = vpow2.f32 %v2098_v38 }
 0x19b   :  { %v597_v39 = vpop.f32.mrf.mxu3  ;;  %v577_v60 = vpop.f32.mrf.mxu2 }
 0x19c   :  { %v603_v44 = vadd.f32 %v597_v39, %v3605_v40  ;;  %v602_v11 = vadd.f32 %v577_v60, %v3606_v59 }
 0x19e   :  { %v2099_v45 = vmul.f32 -1.442695, %v603_v44 }
 0x19f   :  { %v2154_v46 = vpop.eup %2153 }
 0x1a0   :  { %v2156_v47 = vpop.eup %2155  ;;  %v607_v49 = vadd.f32 1.0, %v2154_v46  ;;  %2157 = vpow2.f32 %v2099_v45 }
 0x1a1   :  { %v626_v58 = vadd.f32 1.0, %v2156_v47 }
 0x1a2   :  { %2159 = vrcp.f32 %v607_v49  ;;  %v619_v0 = vand.u32 2147483648, %v607_v49  ;;  %v617_v28 = vand.u32 2147483647, %v607_v49  ;;  %vm613_vm15 = vweird.f32 %v607_v49 }
 0x1a3   :  { %2161 = vrcp.f32 %v626_v58  ;;  %v638_v1 = vand.u32 2147483648, %v626_v58  ;;  %v636_v61 = vand.u32 2147483647, %v626_v58  ;;  %vm632_vm0 = vweird.f32 %v626_v58 }
 0x1a4   :  { %v620_v31 = vor.u32 1.1754944e-38, %v619_v0  ;;  %vm618_vm3 = vcmp.eq.f32.partialorder %v617_v28, 8.507059e+37  ;;  %v2950_v0 = vld [vmem:[#allocation2 + $0x3d0] sm:$0xff]  ;;  %v2959_v28 = vld [vmem:[#allocation2 + $0x3a8] sm:$0xff] }
 0x1a5   :  { %v639_v34 = vor.u32 1.1754944e-38, %v638_v1  ;;  %vm637_vm4 = vcmp.eq.f32.partialorder %v636_v61, 8.507059e+37  ;;  %v2953_v1 = vld [vmem:[#allocation2 + $0x3d8] sm:$0xff] }
 0x1a6   :  { %v2158_v51 = vpop.eup %2157  ;;  %v2965_v61 = vld [vmem:[#allocation2 + $0x3b8] sm:$0xff] }
 0x1a7   :  { %v646_v63 = vadd.f32 1.0, %v2158_v51 }
 0x1a8   :  { %v2160_v50 = vpop.eup %2159 }
 0x1a9   :  { %v2162_v52 = vpop.eup %2161  ;;  %v609_v55 = vmul.f32 %v2160_v50, %v607_v49  ;;  %2163 = vrcp.f32 %v646_v63  ;;  %vm614_vm13 = vweird.f32 %v2160_v50  ;;  %vm652_vm6 = vweird.f32 %v646_v63 }
 0x1aa   :  { %v628_v62 = vmul.f32 %v2162_v52, %v626_v58  ;;  %2165 = vtanh.f32 %v602_v11  ;;  %vm633_vm14 = vweird.f32 %v2162_v52  ;;  %vm615_vm1 = vmor %vm613_vm15, %vm614_vm13  ;;  %v658_v58 = vand.u32 2147483648, %v646_v63 }
 0x1ab   :  { %v610_v41 = vsub.f32 1.0, %v609_v55  ;;  %vm634_vm2 = vmor %vm632_vm0, %vm633_vm14  ;;  %v656_v60 = vand.u32 2147483647, %v646_v63  ;;  %v2935_v55 = vld [vmem:[#allocation2 + $0x3e8] sm:$0xff] }
 0x1ac   :  { %v629_v54 = vsub.f32 1.0, %v628_v62  ;;  %v2941_v62 = vld [vmem:[#allocation2 + $0x3f8] sm:$0xff] }
 0x1ad   :  { %v611_v48 = vmul.f32 %v2160_v50, %v610_v41  ;;  %vm657_vm8 = vcmp.eq.f32.partialorder %v656_v60, 8.507059e+37  ;;  %v2944_v41 = vld [vmem:[#allocation2 + $0x3c0] sm:$0xff]  ;;  %v3019_v60 = vld [vmem:[#allocation2 + $0x308] sm:$0xff] }
 0x1ae   :  { %v630_v56 = vmul.f32 %v2162_v52, %v629_v54  ;;  %v2947_v54 = vld [vmem:[#allocation2 + $0x3c8] sm:$0xff]  ;;  %3607 = vst [vmem:[#allocation9_spill] sm:$0xff] %v3019_v60 }
 0x1af   :  { %v2164_v57 = vpop.eup %2163  ;;  %v612_v53 = vadd.f32 %v2160_v50, %v611_v48  ;;  %v2956_v48 = vld [vmem:[#allocation2 + $0x3a0] sm:$0xff] }
 0x1b0   :  { %v631_v32 = vadd.f32 %v2162_v52, %v630_v56  ;;  %v648_v33 = vmul.f32 %v2164_v57, %v646_v63  ;;  %v2166_v36 = vpop.eup %2165  ;;  %vm653_vm5 = vweird.f32 %v2164_v57  ;;  %v2938_v63 = vld [vmem:[#allocation2 + $0x3f0] sm:$0xff] }
 0x1b1   :  { %v616_v35 = vsel %vm615_vm1, %v2160_v50, %v612_v53  ;;  %vm654_vm7 = vmor %vm652_vm6, %vm653_vm5  ;;  %v659_v50 = vor.u32 1.1754944e-38, %v658_v58  ;;  %v2962_v56 = vld [vmem:[#allocation2 + $0x3b0] sm:$0xff]  ;;  %v2971_v53 = vld [vmem:[#allocation2 + $0x388] sm:$0xff] }
 0x1b2   :  { %v621_v37 = vsel %vm618_vm3, %v620_v31, %v616_v35  ;;  %v635_v38 = vsel %vm634_vm2, %v2162_v52, %v631_v32  ;;  %v649_v39 = vsub.f32 1.0, %v648_v33  ;;  %v2974_v31 = vld [vmem:[#allocation2 + $0x390] sm:$0xff]  ;;  %v2977_v32 = vld [vmem:[#allocation2 + $0x398] sm:$0xff]  ;;  %v2980_v33 = vld [vmem:[#allocation2 + $0x360] sm:$0xff] }
 0x1b3   :  { %v640_v40 = vsel %vm637_vm4, %v639_v34, %v635_v38  ;;  %v663_v44 = vmul.f32 %v2166_v36, %v621_v37  ;;  %v2983_v34 = vld [vmem:[#allocation2 + $0x368] sm:$0xff]  ;;  %v2986_v35 = vld [vmem:[#allocation2 + $0x370] sm:$0xff]  ;;  %v2989_v36 = vld [vmem:[#allocation2 + $0x378] sm:$0xff] }
 0x1b4   :  { %v662_v45 = vmul.f32 %v640_v40, %v2857_v17  ;;  %v650_v46 = vmul.f32 %v2164_v57, %v649_v39  ;;  %v2932_v17 = vld [vmem:[#allocation2 + $0x3e0] sm:$0xff]  ;;  %v2995_v38 = vld [vmem:[#allocation2 + $0x348] sm:$0xff]  ;;  %v2998_v39 = vld [vmem:[#allocation2 + $0x350] sm:$0xff] }
 0x1b5   :  { %v2992_v37 = vld [vmem:[#allocation2 + $0x340] sm:$0xff]  ;;  %v3001_v40 = vld [vmem:[#allocation2 + $0x358] sm:$0xff] }
 0x1b6   :  { %v2929_v47 = vadd.f32 %v663_v44, %v662_v45  ;;  %v651_v49 = vadd.f32 %v2164_v57, %v650_v46  ;;  %v3004_v44 = vld [vmem:[#allocation2 + $0x320] sm:$0xff]  ;;  %v3007_v45 = vld [vmem:[#allocation2 + $0x328] sm:$0xff]  ;;  %v3010_v46 = vld [vmem:[#allocation2 + $0x330] sm:$0xff] }
 0x1b7   :  { %v3016_v58 = vld [vmem:[#allocation2 + $0x300] sm:$0xff] }
 0x1b8   :  { %2167 = vtanh.f32 %v2929_v47  ;;  %v655_v51 = vsel %vm654_vm7, %v2164_v57, %v651_v49  ;;  %v2968_v57 = vld [vmem:[#allocation2 + $0x380] sm:$0xff]  ;;  %v3013_v49 = vld [vmem:[#allocation2 + $0x338] sm:$0xff] }
 0x1b9   :  { %v660_v11 = vsel %vm657_vm8, %v659_v50, %v655_v51  ;;  %v3022_v51 = vld [vmem:[#allocation2 + $0x310] sm:$0xff]  ;;  %v3025_v50 = vld [vmem:[#allocation2 + $0x318] sm:$0xff] }
 0x1be   :  { %v2168_v59 = vpop.eup %2167 }
 0x1bf   :  { %v666_v52 = vmul.f32 %v2168_v59, %v660_v11  ;;  %v3028_v59 = vld [vmem:[#allocation2 + $0x2e0] sm:$0xff]  ;;  %v3031_v11 = vld [vmem:[#allocation2 + $0x2e8] sm:$0xff] }
 0x1c1   :  { %683 = vmatmul.f32.vlgmr.msrb.gmra.mxu0 %v666_v52  ;;  %703 = vmatmul.f32.vlgmr.msrb.gmra.mxu1 %v666_v52 }
 0x1c2   :  { %723 = vmatmul.f32.vlgmr.msrb.gmra.mxu2 %v666_v52  ;;  %743 = vmatmul.f32.vlgmr.msrb.gmra.mxu3 %v666_v52  ;;  %v3034_v52 = vld [vmem:[#allocation2 + $0x2f0] sm:$0xff] }
 0x1c3   :  { %961 = vmatpush.msrb.mxu0 %v2932_v17  ;;  %981 = vmatpush.msrb.mxu1 %v2935_v55 }
 0x1c4   :  { %1001 = vmatpush.msrb.mxu2 %v2938_v63  ;;  %1021 = vmatpush.msrb.mxu3 %v2941_v62 }
 0x1c5   :  { %962 = vmatpush.msrb.mxu0 %v2944_v41  ;;  %982 = vmatpush.msrb.mxu1 %v2947_v54 }
 0x1c6   :  { %1002 = vmatpush.msrb.mxu2 %v2950_v0  ;;  %1022 = vmatpush.msrb.mxu3 %v2953_v1 }
 0x1c7   :  { %963 = vmatpush.msrb.mxu0 %v2956_v48  ;;  %983 = vmatpush.msrb.mxu1 %v2959_v28 }
 0x1c8   :  { %1003 = vmatpush.msrb.mxu2 %v2962_v56  ;;  %1023 = vmatpush.msrb.mxu3 %v2965_v61 }
 0x1c9   :  { %964 = vmatpush.msrb.mxu0 %v2968_v57  ;;  %984 = vmatpush.msrb.mxu1 %v2971_v53 }
 0x1ca   :  { %1004 = vmatpush.msrb.mxu2 %v2974_v31  ;;  %1024 = vmatpush.msrb.mxu3 %v2977_v32 }
 0x1cb   :  { %965 = vmatpush.msrb.mxu0 %v2980_v33  ;;  %985 = vmatpush.msrb.mxu1 %v2983_v34 }
 0x1cc   :  { %1005 = vmatpush.msrb.mxu2 %v2986_v35  ;;  %1025 = vmatpush.msrb.mxu3 %v2989_v36 }
 0x1cd   :  { %966 = vmatpush.msrb.mxu0 %v2992_v37  ;;  %986 = vmatpush.msrb.mxu1 %v2995_v38 }
 0x1ce   :  { %1006 = vmatpush.msrb.mxu2 %v2998_v39  ;;  %1026 = vmatpush.msrb.mxu3 %v3001_v40 }
 0x1cf   :  { %967 = vmatpush.msrb.mxu0 %v3004_v44  ;;  %987 = vmatpush.msrb.mxu1 %v3007_v45 }
 0x1d0   :  { %1007 = vmatpush.msrb.mxu2 %v3010_v46  ;;  %1027 = vmatpush.msrb.mxu3 %v3013_v49 }
 0x1d1   :  { %968 = vmatpush.msrb.mxu0 %v3016_v58  ;;  %988 = vmatpush.msrb.mxu1 %v3019_v60  ;;  %v3037_v60 = vld [vmem:[#allocation2 + $0x2f8] sm:$0xff] }
 0x1d2   :  { %1008 = vmatpush.msrb.mxu2 %v3022_v51  ;;  %1028 = vmatpush.msrb.mxu3 %v3025_v50 }
 0x1d3   :  { %969 = vmatpush.msrb.mxu0 %v3028_v59  ;;  %989 = vmatpush.msrb.mxu1 %v3031_v11 }
 0x1d4   :  { %1009 = vmatpush.msrb.mxu2 %v3034_v52  ;;  %1029 = vmatpush.msrb.mxu3 %v3037_v60 }
 0x1d5   :  { %970 = vmatpush.msrb.mxu0 %v2574_v42  ;;  %990 = vmatpush.msrb.mxu1 %v2576_v43 }
 0x1d6   :  { %1010 = vmatpush.msrb.mxu2 %v3577_v2  ;;  %1030 = vmatpush.msrb.mxu3 %v3578_v3  ;;  %v3608_v2 = vld [vmem:[#allocation38_spill] sm:$0xff] }
 0x1d7   :  { %971 = vmatpush.msrb.mxu0 %v3579_v4  ;;  %991 = vmatpush.msrb.mxu1 %v3580_v5  ;;  %v3609_v4 = vld [vmem:[#allocation39_spill] sm:$0xff] }
 0x1d8   :  { %1011 = vmatpush.msrb.mxu2 %v3581_v6  ;;  %1031 = vmatpush.msrb.mxu3 %v3582_v7 }
 0x1d9   :  { %972 = vmatpush.msrb.mxu0 %v3583_v8  ;;  %992 = vmatpush.msrb.mxu1 %v3584_v9  ;;  %v3610_v9 = vld [vmem:[#allocation41_spill] sm:$0xff] }
 0x1da   :  { %1012 = vmatpush.msrb.mxu2 %v3585_v10  ;;  %1032 = vmatpush.msrb.mxu3 %v3586_v12 }
 0x1db   :  { %973 = vmatpush.msrb.mxu0 %v3587_v13  ;;  %993 = vmatpush.msrb.mxu1 %v3588_v14 }
 0x1dc   :  { %1013 = vmatpush.msrb.mxu2 %v3589_v15  ;;  %1033 = vmatpush.msrb.mxu3 %v3590_v16 }
 0x1dd   :  { %974 = vmatpush.msrb.mxu0 %v3591_v18  ;;  %994 = vmatpush.msrb.mxu1 %v3592_v19 }
 0x1de   :  { %1014 = vmatpush.msrb.mxu2 %v3593_v20  ;;  %1034 = vmatpush.msrb.mxu3 %v3594_v21 }
 0x1df   :  { %975 = vmatpush.msrb.mxu0 %v3595_v22  ;;  %995 = vmatpush.msrb.mxu1 %v3596_v23  ;;  %v3611_v22 = vld [vmem:[#allocation40_spill] sm:$0xff] }
 0x1e0   :  { %1015 = vmatpush.msrb.mxu2 %v3597_v24  ;;  %1035 = vmatpush.msrb.mxu3 %v3598_v25 }
 0x1e1   :  { %976 = vmatpush.msrb.mxu0 %v3599_v26  ;;  %996 = vmatpush.msrb.mxu1 %v3600_v27 }
 0x1e2   :  { %1016 = vmatpush.msrb.mxu2 %v3601_v29  ;;  %1036 = vmatpush.msrb.mxu3 %v3602_v30 }
 0x23e   :  { %v684_v42 = vpop.f32.mrf.mxu0  ;;  %v704_v43 = vpop.f32.mrf.mxu1 }
 0x23f   :  { %v747_v3 = vadd.f32 %v684_v42, %v3608_v2  ;;  %v748_v5 = vadd.f32 %v704_v43, %v3609_v4 }
 0x241   :  { %v2100_v6 = vmul.f32 -1.442695, %v747_v3  ;;  %v2101_v7 = vmul.f32 -1.442695, %v748_v5 }
 0x243   :  { %2169 = vpow2.f32 %v2100_v6 }
 0x244   :  { %2171 = vpow2.f32 %v2101_v7 }
 0x245   :  { %v744_v8 = vpop.f32.mrf.mxu3  ;;  %v724_v18 = vpop.f32.mrf.mxu2 }
 0x246   :  { %v750_v10 = vadd.f32 %v744_v8, %v3610_v9  ;;  %v749_v23 = vadd.f32 %v724_v18, %v3611_v22 }
 0x248   :  { %v2102_v12 = vmul.f32 -1.442695, %v750_v10 }
 0x249   :  { %v2170_v13 = vpop.eup %2169 }
 0x24a   :  { %v2172_v14 = vpop.eup %2171  ;;  %v754_v15 = vadd.f32 1.0, %v2170_v13  ;;  %2173 = vpow2.f32 %v2102_v12 }
 0x24b   :  { %v773_v16 = vadd.f32 1.0, %v2172_v14 }
 0x24c   :  { %2175 = vrcp.f32 %v754_v15  ;;  %v766_v30 = vand.u32 2147483648, %v754_v15  ;;  %v764_v2 = vand.u32 2147483647, %v754_v15  ;;  %vm760_vm11 = vweird.f32 %v754_v15 }
 0x24d   :  { %2177 = vrcp.f32 %v773_v16  ;;  %v785_v42 = vand.u32 2147483648, %v773_v16  ;;  %v783_v4 = vand.u32 2147483647, %v773_v16  ;;  %vm779_vm12 = vweird.f32 %v773_v16 }
 0x24e   :  { %v767_v7 = vor.u32 1.1754944e-38, %v766_v30  ;;  %vm765_vm15 = vcmp.eq.f32.partialorder %v764_v2, 8.507059e+37  ;;  %v3115_v2 = vld [vmem:[#allocation2 + $0x2c8] sm:$0xff] }
 0x24f   :  { %v786_v10 = vor.u32 1.1754944e-38, %v785_v42  ;;  %vm784_vm0 = vcmp.eq.f32.partialorder %v783_v4, 8.507059e+37  ;;  %v3121_v4 = vld [vmem:[#allocation2 + $0x2d8] sm:$0xff] }
 0x250   :  { %v2174_v19 = vpop.eup %2173  ;;  %3614 = vst [vmem:[#allocation10_spill] sm:$0xff] %v3121_v4 }
 0x251   :  { %v793_v20 = vadd.f32 1.0, %v2174_v19 }
 0x252   :  { %v2176_v21 = vpop.eup %2175 }
 0x253   :  { %v2178_v24 = vpop.eup %2177  ;;  %v756_v25 = vmul.f32 %v2176_v21, %v754_v15  ;;  %2179 = vrcp.f32 %v793_v20  ;;  %vm761_vm9 = vweird.f32 %v2176_v21  ;;  %vm799_vm2 = vweird.f32 %v793_v20 }
 0x254   :  { %v775_v26 = vmul.f32 %v2178_v24, %v773_v16  ;;  %2181 = vtanh.f32 %v749_v23  ;;  %vm780_vm10 = vweird.f32 %v2178_v24  ;;  %vm762_vm13 = vmor %vm760_vm11, %vm761_vm9 }
 0x255   :  { %v757_v27 = vsub.f32 1.0, %v756_v25  ;;  %vm781_vm14 = vmor %vm779_vm12, %vm780_vm10 }
 0x256   :  { %v776_v29 = vsub.f32 1.0, %v775_v26 }
 0x257   :  { %v758_v43 = vmul.f32 %v2176_v21, %v757_v27  ;;  %v805_v27 = vand.u32 2147483648, %v793_v20 }
 0x258   :  { %v777_v3 = vmul.f32 %v2178_v24, %v776_v29 }
 0x259   :  { %v2180_v5 = vpop.eup %2179  ;;  %v759_v6 = vadd.f32 %v2176_v21, %v758_v43  ;;  %v806_v30 = vor.u32 1.1754944e-38, %v805_v27  ;;  %v3172_v27 = vld [vmem:[#allocation2 + $0x220] sm:$0xff] }
 0x25a   :  { %v778_v8 = vadd.f32 %v2178_v24, %v777_v3  ;;  %v795_v9 = vmul.f32 %v2180_v5, %v793_v20  ;;  %v2182_v13 = vpop.eup %2181  ;;  %vm800_vm1 = vweird.f32 %v2180_v5  ;;  %v3118_v3 = vld [vmem:[#allocation2 + $0x2d0] sm:$0xff]  ;;  %3631 = vst [vmem:[#allocation27_spill] sm:$0xff] %v3172_v27 }
 0x25b   :  { %v763_v12 = vsel %vm762_vm13, %v2176_v21, %v759_v6  ;;  %v803_v21 = vand.u32 2147483647, %v793_v20  ;;  %vm801_vm3 = vmor %vm799_vm2, %vm800_vm1  ;;  %v3112_v20 = vld [vmem:[#allocation2 + $0x2c0] sm:$0xff]  ;;  %3613 = vst [vmem:[#allocation8_spill] sm:$0xff] %v3118_v3  ;;  %v3127_v6 = vld [vmem:[#allocation2 + $0x2a8] sm:$0xff] }
 0x25c   :  { %v768_v14 = vsel %vm765_vm15, %v767_v7, %v763_v12  ;;  %v782_v18 = vsel %vm781_vm14, %v2178_v24, %v778_v8  ;;  %v796_v19 = vsub.f32 1.0, %v795_v9  ;;  %3616 = vst [vmem:[#allocation13_spill] sm:$0xff] %v3127_v6  ;;  %v3130_v7 = vld [vmem:[#allocation2 + $0x2b0] sm:$0xff]  ;;  %v3133_v8 = vld [vmem:[#allocation2 + $0x2b8] sm:$0xff]  ;;  %v3136_v9 = vld [vmem:[#allocation2 + $0x280] sm:$0xff] }
 0x25d   :  { %v787_v22 = vsel %vm784_vm0, %v786_v10, %v782_v18  ;;  %v810_v23 = vmul.f32 %v2182_v13, %v768_v14  ;;  %vm804_vm4 = vcmp.eq.f32.partialorder %v803_v21, 8.507059e+37  ;;  %3617 = vst [vmem:[#allocation12_spill] sm:$0xff] %v3130_v7  ;;  %v3139_v10 = vld [vmem:[#allocation2 + $0x288] sm:$0xff]  ;;  %v3142_v12 = vld [vmem:[#allocation2 + $0x290] sm:$0xff]  ;;  %v3145_v13 = vld [vmem:[#allocation2 + $0x298] sm:$0xff] }
 0x25e   :  { %v809_v25 = vmul.f32 %v787_v22, %v2929_v47  ;;  %v797_v26 = vmul.f32 %v2180_v5, %v796_v19  ;;  %v3612_v47 = vld [vmem:[#allocation9_spill] sm:$0xff]  ;;  %3618 = vst [vmem:[#allocation14_spill] sm:$0xff] %v3133_v8  ;;  %v3148_v14 = vld [vmem:[#allocation2 + $0x260] sm:$0xff]  ;;  %v3154_v19 = vld [vmem:[#allocation2 + $0x270] sm:$0xff] }
 0x25f   :  { %3619 = vst [vmem:[#allocation15_spill] sm:$0xff] %v3136_v9  ;;  %v3151_v18 = vld [vmem:[#allocation2 + $0x268] sm:$0xff]  ;;  %v3157_v22 = vld [vmem:[#allocation2 + $0x278] sm:$0xff] }
 0x260   :  { %v3073_v15 = vadd.f32 %v810_v23, %v809_v25  ;;  %v798_v16 = vadd.f32 %v2180_v5, %v797_v26  ;;  %3620 = vst [vmem:[#allocation17_spill] sm:$0xff] %v3139_v10  ;;  %v3160_v23 = vld [vmem:[#allocation2 + $0x240] sm:$0xff]  ;;  %v3163_v25 = vld [vmem:[#allocation2 + $0x248] sm:$0xff]  ;;  %v3166_v26 = vld [vmem:[#allocation2 + $0x250] sm:$0xff] }
 0x261   :  { %3621 = vst [vmem:[#allocation16_spill] sm:$0xff] %v3142_v12  ;;  %v3175_v21 = vld [vmem:[#allocation2 + $0x228] sm:$0xff] }
 0x262   :  { %2183 = vtanh.f32 %v3073_v15  ;;  %v802_v29 = vsel %vm801_vm3, %v2180_v5, %v798_v16  ;;  %v3124_v5 = vld [vmem:[#allocation2 + $0x2a0] sm:$0xff]  ;;  %3622 = vst [vmem:[#allocation18_spill] sm:$0xff] %v3145_v13  ;;  %v3169_v16 = vld [vmem:[#allocation2 + $0x258] sm:$0xff] }
 0x263   :  { %v807_v42 = vsel %vm804_vm4, %v806_v30, %v802_v29  ;;  %3615 = vst [vmem:[#allocation11_spill] sm:$0xff] %v3124_v5  ;;  %v3178_v29 = vld [vmem:[#allocation2 + $0x230] sm:$0xff]  ;;  %v3181_v30 = vld [vmem:[#allocation2 + $0x238] sm:$0xff] }
 0x264   :  { %3623 = vst [vmem:[#allocation19_spill] sm:$0xff] %v3148_v14 }
 0x265   :  { %3624 = vst [vmem:[#allocation21_spill] sm:$0xff] %v3151_v18 }
 0x266   :  { %3625 = vst [vmem:[#allocation20_spill] sm:$0xff] %v3154_v19 }
 0x267   :  { %3626 = vst [vmem:[#allocation22_spill] sm:$0xff] %v3157_v22 }
 0x268   :  { %v2184_v24 = vpop.eup %2183  ;;  %3627 = vst [vmem:[#allocation23_spill] sm:$0xff] %v3160_v23 }
 0x269   :  { %v813_v43 = vmul.f32 %v2184_v24, %v807_v42  ;;  %3628 = vst [vmem:[#allocation25_spill] sm:$0xff] %v3163_v25  ;;  %v3184_v24 = vld [vmem:[#allocation2 + $0x200] sm:$0xff]  ;;  %v3187_v42 = vld [vmem:[#allocation2 + $0x208] sm:$0xff] }
 0x26a   :  { %3629 = vst [vmem:[#allocation24_spill] sm:$0xff] %v3166_v26 }
 0x26b   :  { %830 = vmatmul.f32.vlgmr.msra.gmra.mxu0 %v813_v43  ;;  %850 = vmatmul.f32.vlgmr.msra.gmra.mxu1 %v813_v43  ;;  %3630 = vst [vmem:[#allocation26_spill] sm:$0xff] %v3169_v16 }
 0x26c   :  { %870 = vmatmul.f32.vlgmr.msra.gmra.mxu2 %v813_v43  ;;  %890 = vmatmul.f32.vlgmr.msra.gmra.mxu3 %v813_v43  ;;  %3632 = vst [vmem:[#allocation28_spill] sm:$0xff] %v3175_v21  ;;  %v3190_v43 = vld [vmem:[#allocation2 + $0x210] sm:$0xff] }
 0x26d   :  { %1108 = vmatpush.msra.mxu0 %v2932_v17  ;;  %1128 = vmatpush.msra.mxu1 %v2935_v55  ;;  %3633 = vst [vmem:[#allocation29_spill] sm:$0xff] %v3178_v29 }
 0x26e   :  { %1148 = vmatpush.msra.mxu2 %v2938_v63  ;;  %1168 = vmatpush.msra.mxu3 %v2941_v62  ;;  %3634 = vst [vmem:[#allocation30_spill] sm:$0xff] %v3181_v30 }
 0x26f   :  { %1109 = vmatpush.msra.mxu0 %v2944_v41  ;;  %1129 = vmatpush.msra.mxu1 %v2947_v54  ;;  %3635 = vst [vmem:[#allocation31_spill] sm:$0xff] %v3184_v24 }
 0x270   :  { %1149 = vmatpush.msra.mxu2 %v2950_v0  ;;  %1169 = vmatpush.msra.mxu3 %v2953_v1  ;;  %3636 = vst [vmem:[#allocation32_spill] sm:$0xff] %v3187_v42 }
 0x271   :  { %1110 = vmatpush.msra.mxu0 %v2956_v48  ;;  %1130 = vmatpush.msra.mxu1 %v2959_v28  ;;  %3637 = vst [vmem:[#allocation33_spill] sm:$0xff] %v3190_v43 }
 0x272   :  { %1150 = vmatpush.msra.mxu2 %v2962_v56  ;;  %1170 = vmatpush.msra.mxu3 %v2965_v61 }
 0x273   :  { %1111 = vmatpush.msra.mxu0 %v2968_v57  ;;  %1131 = vmatpush.msra.mxu1 %v2971_v53 }
 0x274   :  { %1151 = vmatpush.msra.mxu2 %v2974_v31  ;;  %1171 = vmatpush.msra.mxu3 %v2977_v32 }
 0x275   :  { %1112 = vmatpush.msra.mxu0 %v2980_v33  ;;  %1132 = vmatpush.msra.mxu1 %v2983_v34 }
 0x276   :  { %1152 = vmatpush.msra.mxu2 %v2986_v35  ;;  %1172 = vmatpush.msra.mxu3 %v2989_v36 }
 0x277   :  { %1113 = vmatpush.msra.mxu0 %v2992_v37  ;;  %1133 = vmatpush.msra.mxu1 %v2995_v38 }
 0x278   :  { %1153 = vmatpush.msra.mxu2 %v2998_v39  ;;  %1173 = vmatpush.msra.mxu3 %v3001_v40 }
 0x279   :  { %1114 = vmatpush.msra.mxu0 %v3004_v44  ;;  %1134 = vmatpush.msra.mxu1 %v3007_v45 }
 0x27a   :  { %1154 = vmatpush.msra.mxu2 %v3010_v46  ;;  %1174 = vmatpush.msra.mxu3 %v3013_v49 }
 0x27b   :  { %1115 = vmatpush.msra.mxu0 %v3016_v58  ;;  %1135 = vmatpush.msra.mxu1 %v3612_v47 }
 0x27c   :  { %1155 = vmatpush.msra.mxu2 %v3022_v51  ;;  %1175 = vmatpush.msra.mxu3 %v3025_v50 }
 0x27d   :  { %1116 = vmatpush.msra.mxu0 %v3028_v59  ;;  %1136 = vmatpush.msra.mxu1 %v3031_v11 }
 0x27e   :  { %1156 = vmatpush.msra.mxu2 %v3034_v52  ;;  %1176 = vmatpush.msra.mxu3 %v3037_v60 }
 0x27f   :  { %1117 = vmatpush.msra.mxu0 %v3112_v20  ;;  %1137 = vmatpush.msra.mxu1 %v3115_v2 }
 0x280   :  { %1157 = vmatpush.msra.mxu2 %v3118_v3  ;;  %1177 = vmatpush.msra.mxu3 %v3121_v4 }
 0x281   :  { %1118 = vmatpush.msra.mxu0 %v3124_v5  ;;  %1138 = vmatpush.msra.mxu1 %v3127_v6 }
 0x282   :  { %1158 = vmatpush.msra.mxu2 %v3130_v7  ;;  %1178 = vmatpush.msra.mxu3 %v3133_v8 }
 0x283   :  { %1119 = vmatpush.msra.mxu0 %v3136_v9  ;;  %1139 = vmatpush.msra.mxu1 %v3139_v10 }
 0x284   :  { %1159 = vmatpush.msra.mxu2 %v3142_v12  ;;  %1179 = vmatpush.msra.mxu3 %v3145_v13 }
 0x285   :  { %1120 = vmatpush.msra.mxu0 %v3148_v14  ;;  %1140 = vmatpush.msra.mxu1 %v3151_v18 }
 0x286   :  { %1160 = vmatpush.msra.mxu2 %v3154_v19  ;;  %1180 = vmatpush.msra.mxu3 %v3157_v22 }
 0x287   :  { %1121 = vmatpush.msra.mxu0 %v3160_v23  ;;  %1141 = vmatpush.msra.mxu1 %v3163_v25 }
 0x288   :  { %1161 = vmatpush.msra.mxu2 %v3166_v26  ;;  %1181 = vmatpush.msra.mxu3 %v3169_v16  ;;  %v3639_v16 = vld [vmem:[#allocation42_spill] sm:$0xff]  ;;  %v3640_v26 = vld [vmem:[#allocation43_spill] sm:$0xff] }
 0x289   :  { %1122 = vmatpush.msra.mxu0 %v3172_v27  ;;  %1142 = vmatpush.msra.mxu1 %v3175_v21  ;;  %v3193_v21 = vld [vmem:[#allocation2 + $0x218] sm:$0xff] }
 0x28a   :  { %1162 = vmatpush.msra.mxu2 %v3178_v29  ;;  %1182 = vmatpush.msra.mxu3 %v3181_v30  ;;  %3638 = vst [vmem:[#allocation34_spill] sm:$0xff] %v3193_v21 }
 0x28b   :  { %1123 = vmatpush.msra.mxu0 %v3184_v24  ;;  %1143 = vmatpush.msra.mxu1 %v3187_v42  ;;  %v3641_v42 = vld [vmem:[#allocation45_spill] sm:$0xff] }
 0x28c   :  { %1163 = vmatpush.msra.mxu2 %v3190_v43  ;;  %1183 = vmatpush.msra.mxu3 %v3193_v21 }
 0x2e8   :  { %v831_v29 = vpop.f32.mrf.mxu0  ;;  %v851_v27 = vpop.f32.mrf.mxu1 }
 0x2e9   :  { %v894_v30 = vadd.f32 %v831_v29, %v3639_v16  ;;  %v895_v25 = vadd.f32 %v851_v27, %v3640_v26  ;;  %v3642_v26 = vld [vmem:[#allocation44_spill] sm:$0xff] }
 0x2eb   :  { %v2103_v23 = vmul.f32 -1.442695, %v894_v30  ;;  %v2104_v24 = vmul.f32 -1.442695, %v895_v25 }
 0x2ed   :  { %2185 = vpow2.f32 %v2103_v23 }
 0x2ee   :  { %2187 = vpow2.f32 %v2104_v24 }
 0x2ef   :  { %v891_v22 = vpop.f32.mrf.mxu3  ;;  %v871_v21 = vpop.f32.mrf.mxu2 }
 0x2f0   :  { %v897_v19 = vadd.f32 %v891_v22, %v3641_v42  ;;  %v896_v27 = vadd.f32 %v871_v21, %v3642_v26 }
 0x2f2   :  { %v2105_v18 = vmul.f32 -1.442695, %v897_v19 }
 0x2f3   :  { %v2186_v14 = vpop.eup %2185 }
 0x2f4   :  { %v2188_v43 = vpop.eup %2187  ;;  %v901_v13 = vadd.f32 1.0, %v2186_v14  ;;  %2189 = vpow2.f32 %v2105_v18 }
 0x2f5   :  { %v920_v12 = vadd.f32 1.0, %v2188_v43 }
 0x2f6   :  { %2191 = vrcp.f32 %v901_v13  ;;  %v913_v19 = vand.u32 2147483648, %v901_v13  ;;  %v911_v18 = vand.u32 2147483647, %v901_v13  ;;  %vm907_vm7 = vweird.f32 %v901_v13 }
 0x2f7   :  { %2193 = vrcp.f32 %v920_v12  ;;  %v932_v42 = vand.u32 2147483648, %v920_v12  ;;  %v930_v9 = vand.u32 2147483647, %v920_v12  ;;  %vm926_vm8 = vweird.f32 %v920_v12 }
 0x2f8   :  { %v914_v21 = vor.u32 1.1754944e-38, %v913_v19  ;;  %vm912_vm11 = vcmp.eq.f32.partialorder %v911_v18, 8.507059e+37 }
 0x2f9   :  { %vm931_vm12 = vcmp.eq.f32.partialorder %v930_v9, 8.507059e+37 }
 0x2fa   :  { %v2190_v10 = vpop.eup %2189 }
 0x2fb   :  { %v940_v16 = vadd.f32 1.0, %v2190_v10 }
 0x2fc   :  { %v2192_v29 = vpop.eup %2191 }
 0x2fd   :  { %v2194_v25 = vpop.eup %2193  ;;  %v903_v23 = vmul.f32 %v2192_v29, %v901_v13  ;;  %2195 = vrcp.f32 %v940_v16  ;;  %vm908_vm5 = vweird.f32 %v2192_v29  ;;  %v952_v19 = vand.u32 2147483648, %v940_v16 }
 0x2fe   :  { %v922_v30 = vmul.f32 %v2194_v25, %v920_v12  ;;  %2197 = vtanh.f32 %v896_v27  ;;  %vm927_vm6 = vweird.f32 %v2194_v25  ;;  %vm909_vm9 = vmor %vm907_vm7, %vm908_vm5  ;;  %vm946_vm14 = vweird.f32 %v940_v16 }
 0x2ff   :  { %v904_v24 = vsub.f32 1.0, %v903_v23  ;;  %vm928_vm10 = vmor %vm926_vm8, %vm927_vm6  ;;  %v933_v23 = vor.u32 1.1754944e-38, %v932_v42  ;;  %v953_v18 = vor.u32 1.1754944e-38, %v952_v19  ;;  %v3661_v19 = vld [vmem:[#allocation27_spill] sm:$0xff] }
 0x300   :  { %v923_v22 = vsub.f32 1.0, %v922_v30 }
 0x301   :  { %v905_v14 = vmul.f32 %v2192_v29, %v904_v24 }
 0x302   :  { %v924_v43 = vmul.f32 %v2194_v25, %v923_v22 }
 0x303   :  { %v2196_v8 = vpop.eup %2195  ;;  %v906_v10 = vadd.f32 %v2192_v29, %v905_v14 }
 0x304   :  { %v925_v26 = vadd.f32 %v2194_v25, %v924_v43  ;;  %v942_v7 = vmul.f32 %v2196_v8, %v940_v16  ;;  %v2198_v27 = vpop.eup %2197  ;;  %vm947_vm13 = vweird.f32 %v2196_v8  ;;  %v3650_v43 = vld [vmem:[#allocation17_spill] sm:$0xff] }
 0x305   :  { %v910_v30 = vsel %vm909_vm9, %v2192_v29, %v906_v10  ;;  %v950_v29 = vand.u32 2147483647, %v940_v16  ;;  %vm948_vm15 = vmor %vm946_vm14, %vm947_vm13  ;;  %v3649_v16 = vld [vmem:[#allocation15_spill] sm:$0xff]  ;;  %v3651_v10 = vld [vmem:[#allocation16_spill] sm:$0xff] }
 0x306   :  { %v915_v6 = vsel %vm912_vm11, %v914_v21, %v910_v30  ;;  %v929_v24 = vsel %vm928_vm10, %v2194_v25, %v925_v26  ;;  %v943_v5 = vsub.f32 1.0, %v942_v7  ;;  %v3652_v21 = vld [vmem:[#allocation18_spill] sm:$0xff]  ;;  %v3653_v26 = vld [vmem:[#allocation19_spill] sm:$0xff]  ;;  %v3655_v30 = vld [vmem:[#allocation20_spill] sm:$0xff] }
 0x307   :  { %v934_v22 = vsel %vm931_vm12, %v933_v23, %v929_v24  ;;  %v957_v4 = vmul.f32 %v2198_v27, %v915_v6  ;;  %vm951_vm0 = vcmp.eq.f32.partialorder %v950_v29, 8.507059e+37  ;;  %v3647_v6 = vld [vmem:[#allocation12_spill] sm:$0xff]  ;;  %v3654_v23 = vld [vmem:[#allocation21_spill] sm:$0xff]  ;;  %v3656_v27 = vld [vmem:[#allocation22_spill] sm:$0xff] }
 0x308   :  { %v956_v3 = vmul.f32 %v934_v22, %v3073_v15  ;;  %v944_v14 = vmul.f32 %v2196_v8, %v943_v5  ;;  %v3643_v15 = vld [vmem:[#allocation8_spill] sm:$0xff]  ;;  %v3646_v5 = vld [vmem:[#allocation13_spill] sm:$0xff]  ;;  %v3657_v24 = vld [vmem:[#allocation23_spill] sm:$0xff] }
 0x309   :  { %v3658_v22 = vld [vmem:[#allocation25_spill] sm:$0xff]  ;;  %v3662_v29 = vld [vmem:[#allocation28_spill] sm:$0xff] }
 0x30a   :  { %v3201_v13 = vadd.f32 %v957_v4, %v956_v3  ;;  %v945_v12 = vadd.f32 %v2196_v8, %v944_v14  ;;  %v3644_v3 = vld [vmem:[#allocation10_spill] sm:$0xff]  ;;  %v3645_v4 = vld [vmem:[#allocation11_spill] sm:$0xff]  ;;  %v3659_v14 = vld [vmem:[#allocation24_spill] sm:$0xff] }
 0x30c   :  { %2199 = vtanh.f32 %v3201_v13  ;;  %v949_v42 = vsel %vm948_vm15, %v2196_v8, %v945_v12  ;;  %v3648_v8 = vld [vmem:[#allocation14_spill] sm:$0xff] }
 0x30d   :  { %v954_v7 = vsel %vm951_vm0, %v953_v18, %v949_v42  ;;  %v3660_v12 = vld [vmem:[#allocation26_spill] sm:$0xff]  ;;  %v3663_v42 = vld [vmem:[#allocation29_spill] sm:$0xff] }
 0x30e   :  { %v3664_v18 = vld [vmem:[#allocation30_spill] sm:$0xff] }
 0x312   :  { %v2200_v9 = vpop.eup %2199 }
 0x313   :  { %v960_v25 = vmul.f32 %v2200_v9, %v954_v7  ;;  %v3665_v9 = vld [vmem:[#allocation31_spill] sm:$0xff]  ;;  %v3666_v7 = vld [vmem:[#allocation32_spill] sm:$0xff] }
 0x315   :  { %977 = vmatmul.f32.vlgmr.msrb.gmra.mxu0 %v960_v25  ;;  %997 = vmatmul.f32.vlgmr.msrb.gmra.mxu1 %v960_v25 }
 0x316   :  { %1017 = vmatmul.f32.vlgmr.msrb.gmra.mxu2 %v960_v25  ;;  %1037 = vmatmul.f32.vlgmr.msrb.gmra.mxu3 %v960_v25  ;;  %v3667_v25 = vld [vmem:[#allocation33_spill] sm:$0xff] }
 0x317   :  { %1255 = vmatpush.msrb.mxu0 %v2932_v17  ;;  %1275 = vmatpush.msrb.mxu1 %v2935_v55 }
 0x318   :  { %1295 = vmatpush.msrb.mxu2 %v2938_v63  ;;  %1315 = vmatpush.msrb.mxu3 %v2941_v62 }
 0x319   :  { %1256 = vmatpush.msrb.mxu0 %v2944_v41  ;;  %1276 = vmatpush.msrb.mxu1 %v2947_v54 }
 0x31a   :  { %1296 = vmatpush.msrb.mxu2 %v2950_v0  ;;  %1316 = vmatpush.msrb.mxu3 %v2953_v1 }
 0x31b   :  { %1257 = vmatpush.msrb.mxu0 %v2956_v48  ;;  %1277 = vmatpush.msrb.mxu1 %v2959_v28 }
 0x31c   :  { %1297 = vmatpush.msrb.mxu2 %v2962_v56  ;;  %1317 = vmatpush.msrb.mxu3 %v2965_v61 }
 0x31d   :  { %1258 = vmatpush.msrb.mxu0 %v2968_v57  ;;  %1278 = vmatpush.msrb.mxu1 %v2971_v53 }
 0x31e   :  { %1298 = vmatpush.msrb.mxu2 %v2974_v31  ;;  %1318 = vmatpush.msrb.mxu3 %v2977_v32 }
 0x31f   :  { %1259 = vmatpush.msrb.mxu0 %v2980_v33  ;;  %1279 = vmatpush.msrb.mxu1 %v2983_v34 }
 0x320   :  { %1299 = vmatpush.msrb.mxu2 %v2986_v35  ;;  %1319 = vmatpush.msrb.mxu3 %v2989_v36 }
 0x321   :  { %1260 = vmatpush.msrb.mxu0 %v2992_v37  ;;  %1280 = vmatpush.msrb.mxu1 %v2995_v38 }
 0x322   :  { %1300 = vmatpush.msrb.mxu2 %v2998_v39  ;;  %1320 = vmatpush.msrb.mxu3 %v3001_v40 }
 0x323   :  { %1261 = vmatpush.msrb.mxu0 %v3004_v44  ;;  %1281 = vmatpush.msrb.mxu1 %v3007_v45 }
 0x324   :  { %1301 = vmatpush.msrb.mxu2 %v3010_v46  ;;  %1321 = vmatpush.msrb.mxu3 %v3013_v49 }
 0x325   :  { %1262 = vmatpush.msrb.mxu0 %v3016_v58  ;;  %1282 = vmatpush.msrb.mxu1 %v3612_v47 }
 0x326   :  { %1302 = vmatpush.msrb.mxu2 %v3022_v51  ;;  %1322 = vmatpush.msrb.mxu3 %v3025_v50 }
 0x327   :  { %1263 = vmatpush.msrb.mxu0 %v3028_v59  ;;  %1283 = vmatpush.msrb.mxu1 %v3031_v11 }
 0x328   :  { %1303 = vmatpush.msrb.mxu2 %v3034_v52  ;;  %1323 = vmatpush.msrb.mxu3 %v3037_v60 }
 0x329   :  { %1264 = vmatpush.msrb.mxu0 %v3112_v20  ;;  %1284 = vmatpush.msrb.mxu1 %v3115_v2 }
 0x32a   :  { %1304 = vmatpush.msrb.mxu2 %v3643_v15  ;;  %1324 = vmatpush.msrb.mxu3 %v3644_v3 }
 0x32b   :  { %1265 = vmatpush.msrb.mxu0 %v3645_v4  ;;  %1285 = vmatpush.msrb.mxu1 %v3646_v5 }
 0x32c   :  { %1305 = vmatpush.msrb.mxu2 %v3647_v6  ;;  %1325 = vmatpush.msrb.mxu3 %v3648_v8 }
 0x32d   :  { %1266 = vmatpush.msrb.mxu0 %v3649_v16  ;;  %1286 = vmatpush.msrb.mxu1 %v3650_v43 }
 0x32e   :  { %1306 = vmatpush.msrb.mxu2 %v3651_v10  ;;  %1326 = vmatpush.msrb.mxu3 %v3652_v21 }
 0x32f   :  { %1267 = vmatpush.msrb.mxu0 %v3653_v26  ;;  %1287 = vmatpush.msrb.mxu1 %v3654_v23 }
 0x330   :  { %1307 = vmatpush.msrb.mxu2 %v3655_v30  ;;  %1327 = vmatpush.msrb.mxu3 %v3656_v27  ;;  %v3669_v27 = vld [vmem:[#allocation46_spill] sm:$0xff]  ;;  %v3670_v30 = vld [vmem:[#allocation47_spill] sm:$0xff] }
 0x331   :  { %1268 = vmatpush.msrb.mxu0 %v3657_v24  ;;  %1288 = vmatpush.msrb.mxu1 %v3658_v22  ;;  %v3668_v24 = vld [vmem:[#allocation34_spill] sm:$0xff] }
 0x332   :  { %1308 = vmatpush.msrb.mxu2 %v3659_v14  ;;  %1328 = vmatpush.msrb.mxu3 %v3660_v12 }
 0x333   :  { %1269 = vmatpush.msrb.mxu0 %v3661_v19  ;;  %1289 = vmatpush.msrb.mxu1 %v3662_v29 }
 0x334   :  { %1309 = vmatpush.msrb.mxu2 %v3663_v42  ;;  %1329 = vmatpush.msrb.mxu3 %v3664_v18  ;;  %v3671_v18 = vld [vmem:[#allocation48_spill] sm:$0xff] }
 0x335   :  { %1270 = vmatpush.msrb.mxu0 %v3665_v9  ;;  %1290 = vmatpush.msrb.mxu1 %v3666_v7 }
 0x336   :  { %1310 = vmatpush.msrb.mxu2 %v3667_v25  ;;  %1330 = vmatpush.msrb.mxu3 %v3668_v24 }
 0x392   :  { %v978_v22 = vpop.f32.mrf.mxu0  ;;  %v998_v14 = vpop.f32.mrf.mxu1 }
 0x393   :  { %v1041_v12 = vadd.f32 %v978_v22, %v3669_v27  ;;  %v1042_v19 = vadd.f32 %v998_v14, %v3670_v30  ;;  %v3672_v30 = vld [vmem:[#allocation51_spill] sm:$0xff] }
 0x395   :  { %v2106_v23 = vmul.f32 -1.442695, %v1041_v12  ;;  %v2107_v29 = vmul.f32 -1.442695, %v1042_v19 }
 0x397   :  { %2201 = vpow2.f32 %v2106_v23 }
 0x398   :  { %2203 = vpow2.f32 %v2107_v29 }
 0x399   :  { %v1038_v42 = vpop.f32.mrf.mxu3  ;;  %v1018_v24 = vpop.f32.mrf.mxu2 }
 0x39a   :  { %v1044_v26 = vadd.f32 %v1038_v42, %v3671_v18  ;;  %v1043_v14 = vadd.f32 %v1018_v24, %v3672_v30 }
 0x39c   :  { %v2108_v9 = vmul.f32 -1.442695, %v1044_v26 }
 0x39d   :  { %v2202_v21 = vpop.eup %2201 }
 0x39e   :  { %v2204_v7 = vpop.eup %2203  ;;  %v1048_v10 = vadd.f32 1.0, %v2202_v21  ;;  %2205 = vpow2.f32 %v2108_v9 }
 0x39f   :  { %v1067_v25 = vadd.f32 1.0, %v2204_v7 }
 0x3a0   :  { %2207 = vrcp.f32 %v1048_v10  ;;  %v1060_v26 = vand.u32 2147483648, %v1048_v10  ;;  %v1058_v9 = vand.u32 2147483647, %v1048_v10  ;;  %vm1054_vm3 = vweird.f32 %v1048_v10 }
 0x3a1   :  { %2209 = vrcp.f32 %v1067_v25  ;;  %v1079_v18 = vand.u32 2147483648, %v1067_v25  ;;  %v1077_v16 = vand.u32 2147483647, %v1067_v25  ;;  %vm1073_vm4 = vweird.f32 %v1067_v25 }
 0x3a2   :  { %v1061_v24 = vor.u32 1.1754944e-38, %v1060_v26  ;;  %vm1059_vm7 = vcmp.eq.f32.partialorder %v1058_v9, 8.507059e+37 }
 0x3a3   :  { %vm1078_vm8 = vcmp.eq.f32.partialorder %v1077_v16, 8.507059e+37 }
 0x3a4   :  { %v2206_v43 = vpop.eup %2205 }
 0x3a5   :  { %v1087_v27 = vadd.f32 1.0, %v2206_v43 }
 0x3a6   :  { %v2208_v22 = vpop.eup %2207 }
 0x3a7   :  { %v2210_v12 = vpop.eup %2209  ;;  %v1050_v23 = vmul.f32 %v2208_v22, %v1048_v10  ;;  %2211 = vrcp.f32 %v1087_v27  ;;  %vm1055_vm1 = vweird.f32 %v2208_v22  ;;  %v1099_v26 = vand.u32 2147483648, %v1087_v27 }
 0x3a8   :  { %v1069_v19 = vmul.f32 %v2210_v12, %v1067_v25  ;;  %2213 = vtanh.f32 %v1043_v14  ;;  %vm1074_vm2 = vweird.f32 %v2210_v12  ;;  %vm1056_vm5 = vmor %vm1054_vm3, %vm1055_vm1  ;;  %vm1093_vm10 = vweird.f32 %v1087_v27 }
 0x3a9   :  { %v1051_v29 = vsub.f32 1.0, %v1050_v23  ;;  %vm1075_vm6 = vmor %vm1073_vm4, %vm1074_vm2  ;;  %v1080_v23 = vor.u32 1.1754944e-38, %v1079_v18  ;;  %v1100_v9 = vor.u32 1.1754944e-38, %v1099_v26 }
 0x3aa   :  { %v1070_v42 = vsub.f32 1.0, %v1069_v19 }
 0x3ab   :  { %v1052_v21 = vmul.f32 %v2208_v22, %v1051_v29 }
 0x3ac   :  { %v1071_v7 = vmul.f32 %v2210_v12, %v1070_v42 }
 0x3ad   :  { %v2212_v8 = vpop.eup %2211  ;;  %v1053_v43 = vadd.f32 %v2208_v22, %v1052_v21 }
 0x3ae   :  { %v1072_v30 = vadd.f32 %v2210_v12, %v1071_v7  ;;  %v1089_v6 = vmul.f32 %v2212_v8, %v1087_v27  ;;  %v2214_v14 = vpop.eup %2213  ;;  %vm1094_vm9 = vweird.f32 %v2212_v8 }
 0x3af   :  { %v1057_v19 = vsel %vm1056_vm5, %v2208_v22, %v1053_v43  ;;  %v1097_v22 = vand.u32 2147483647, %v1087_v27  ;;  %vm1095_vm11 = vmor %vm1093_vm10, %vm1094_vm9  ;;  %v3702_v43 = vld [vmem:[#allocation55_spill] sm:$0xff] }
 0x3b0   :  { %v1062_v5 = vsel %vm1059_vm7, %v1061_v24, %v1057_v19  ;;  %v1076_v29 = vsel %vm1075_vm6, %v2210_v12, %v1072_v30  ;;  %v1090_v4 = vsub.f32 1.0, %v1089_v6 }
 0x3b1   :  { %v1081_v42 = vsel %vm1078_vm8, %v1080_v23, %v1076_v29  ;;  %v1104_v3 = vmul.f32 %v2214_v14, %v1062_v5  ;;  %vm1098_vm12 = vcmp.eq.f32.partialorder %v1097_v22, 8.507059e+37 }
 0x3b2   :  { %v1103_v15 = vmul.f32 %v1081_v42, %v3201_v13  ;;  %v1091_v21 = vmul.f32 %v2212_v8, %v1090_v4 }
 0x3b4   :  { %v3273_v10 = vadd.f32 %v1104_v3, %v1103_v15  ;;  %v1092_v25 = vadd.f32 %v2212_v8, %v1091_v21 }
 0x3b6   :  { %2215 = vtanh.f32 %v3273_v10  ;;  %v1096_v18 = vsel %vm1095_vm11, %v2212_v8, %v1092_v25 }
 0x3b7   :  { %v1101_v6 = vsel %vm1098_vm12, %v1100_v9, %v1096_v18 }
 0x3bc   :  { %v2216_v16 = vpop.eup %2215 }
 0x3bd   :  { %v1107_v12 = vmul.f32 %v2216_v16, %v1101_v6 }
 0x3bf   :  { %1124 = vmatmul.f32.vlgmr.msra.gmra.mxu0 %v1107_v12  ;;  %1144 = vmatmul.f32.vlgmr.msra.gmra.mxu1 %v1107_v12 }
 0x3c0   :  { %1164 = vmatmul.f32.vlgmr.msra.gmra.mxu2 %v1107_v12  ;;  %1184 = vmatmul.f32.vlgmr.msra.gmra.mxu3 %v1107_v12 }
 0x3c1   :  { %1402 = vmatpush.msra.mxu0 %v2932_v17  ;;  %1422 = vmatpush.msra.mxu1 %v2935_v55  ;;  %v3673_v17 = vld [vmem:[#allocation8_spill] sm:$0xff]  ;;  %v3674_v55 = vld [vmem:[#allocation10_spill] sm:$0xff] }
 0x3c2   :  { %1442 = vmatpush.msra.mxu2 %v2938_v63  ;;  %1462 = vmatpush.msra.mxu3 %v2941_v62  ;;  %v3675_v63 = vld [vmem:[#allocation11_spill] sm:$0xff]  ;;  %v3676_v62 = vld [vmem:[#allocation13_spill] sm:$0xff] }
 0x3c3   :  { %1403 = vmatpush.msra.mxu0 %v2944_v41  ;;  %1423 = vmatpush.msra.mxu1 %v2947_v54  ;;  %v3677_v41 = vld [vmem:[#allocation12_spill] sm:$0xff]  ;;  %v3678_v54 = vld [vmem:[#allocation14_spill] sm:$0xff] }
 0x3c4   :  { %1443 = vmatpush.msra.mxu2 %v2950_v0  ;;  %1463 = vmatpush.msra.mxu3 %v2953_v1  ;;  %v3679_v0 = vld [vmem:[#allocation15_spill] sm:$0xff]  ;;  %v3680_v1 = vld [vmem:[#allocation17_spill] sm:$0xff] }
 0x3c5   :  { %1404 = vmatpush.msra.mxu0 %v2956_v48  ;;  %1424 = vmatpush.msra.mxu1 %v2959_v28  ;;  %v3681_v48 = vld [vmem:[#allocation16_spill] sm:$0xff]  ;;  %v3682_v28 = vld [vmem:[#allocation18_spill] sm:$0xff] }
 0x3c6   :  { %1444 = vmatpush.msra.mxu2 %v2962_v56  ;;  %1464 = vmatpush.msra.mxu3 %v2965_v61  ;;  %v3683_v56 = vld [vmem:[#allocation19_spill] sm:$0xff]  ;;  %v3684_v61 = vld [vmem:[#allocation21_spill] sm:$0xff] }
 0x3c7   :  { %1405 = vmatpush.msra.mxu0 %v2968_v57  ;;  %1425 = vmatpush.msra.mxu1 %v2971_v53  ;;  %v3685_v57 = vld [vmem:[#allocation20_spill] sm:$0xff]  ;;  %v3686_v53 = vld [vmem:[#allocation22_spill] sm:$0xff] }
 0x3c8   :  { %1445 = vmatpush.msra.mxu2 %v2974_v31  ;;  %1465 = vmatpush.msra.mxu3 %v2977_v32  ;;  %v3687_v31 = vld [vmem:[#allocation23_spill] sm:$0xff]  ;;  %v3688_v32 = vld [vmem:[#allocation25_spill] sm:$0xff] }
 0x3c9   :  { %1406 = vmatpush.msra.mxu0 %v2980_v33  ;;  %1426 = vmatpush.msra.mxu1 %v2983_v34  ;;  %v3689_v33 = vld [vmem:[#allocation24_spill] sm:$0xff]  ;;  %v3690_v34 = vld [vmem:[#allocation26_spill] sm:$0xff] }
 0x3ca   :  { %1446 = vmatpush.msra.mxu2 %v2986_v35  ;;  %1466 = vmatpush.msra.mxu3 %v2989_v36  ;;  %v3691_v35 = vld [vmem:[#allocation27_spill] sm:$0xff]  ;;  %v3692_v36 = vld [vmem:[#allocation28_spill] sm:$0xff] }
 0x3cb   :  { %1407 = vmatpush.msra.mxu0 %v2992_v37  ;;  %1427 = vmatpush.msra.mxu1 %v2995_v38  ;;  %v3693_v37 = vld [vmem:[#allocation29_spill] sm:$0xff]  ;;  %v3694_v38 = vld [vmem:[#allocation30_spill] sm:$0xff] }
 0x3cc   :  { %1447 = vmatpush.msra.mxu2 %v2998_v39  ;;  %1467 = vmatpush.msra.mxu3 %v3001_v40  ;;  %v3695_v39 = vld [vmem:[#allocation31_spill] sm:$0xff]  ;;  %v3696_v40 = vld [vmem:[#allocation32_spill] sm:$0xff] }
 0x3cd   :  { %1408 = vmatpush.msra.mxu0 %v3004_v44  ;;  %1428 = vmatpush.msra.mxu1 %v3007_v45  ;;  %v3697_v44 = vld [vmem:[#allocation33_spill] sm:$0xff]  ;;  %v3698_v45 = vld [vmem:[#allocation34_spill] sm:$0xff] }
 0x3ce   :  { %1448 = vmatpush.msra.mxu2 %v3010_v46  ;;  %1468 = vmatpush.msra.mxu3 %v3013_v49 }
 0x3cf   :  { %1409 = vmatpush.msra.mxu0 %v3016_v58  ;;  %1429 = vmatpush.msra.mxu1 %v3612_v47  ;;  %v3699_v58 = vld [vmem:[#allocation49_spill] sm:$0xff]  ;;  %v3701_v47 = vld [vmem:[#allocation52_spill] sm:$0xff] }
 0x3d0   :  { %1449 = vmatpush.msra.mxu2 %v3022_v51  ;;  %1469 = vmatpush.msra.mxu3 %v3025_v50  ;;  %v3700_v51 = vld [vmem:[#allocation50_spill] sm:$0xff] }
 0x3d1   :  { %1410 = vmatpush.msra.mxu0 %v3028_v59  ;;  %1430 = vmatpush.msra.mxu1 %v3031_v11 }
 0x3d2   :  { %1450 = vmatpush.msra.mxu2 %v3034_v52  ;;  %1470 = vmatpush.msra.mxu3 %v3037_v60 }
 0x3d3   :  { %1411 = vmatpush.msra.mxu0 %v3112_v20  ;;  %1431 = vmatpush.msra.mxu1 %v3115_v2 }
 0x3d4   :  { %1451 = vmatpush.msra.mxu2 %v3673_v17  ;;  %1471 = vmatpush.msra.mxu3 %v3674_v55 }
 0x3d5   :  { %1412 = vmatpush.msra.mxu0 %v3675_v63  ;;  %1432 = vmatpush.msra.mxu1 %v3676_v62 }
 0x3d6   :  { %1452 = vmatpush.msra.mxu2 %v3677_v41  ;;  %1472 = vmatpush.msra.mxu3 %v3678_v54 }
 0x3d7   :  { %1413 = vmatpush.msra.mxu0 %v3679_v0  ;;  %1433 = vmatpush.msra.mxu1 %v3680_v1 }
 0x3d8   :  { %1453 = vmatpush.msra.mxu2 %v3681_v48  ;;  %1473 = vmatpush.msra.mxu3 %v3682_v28 }
 0x3d9   :  { %1414 = vmatpush.msra.mxu0 %v3683_v56  ;;  %1434 = vmatpush.msra.mxu1 %v3684_v61 }
 0x3da   :  { %1454 = vmatpush.msra.mxu2 %v3685_v57  ;;  %1474 = vmatpush.msra.mxu3 %v3686_v53 }
 0x3db   :  { %1415 = vmatpush.msra.mxu0 %v3687_v31  ;;  %1435 = vmatpush.msra.mxu1 %v3688_v32 }
 0x3dc   :  { %1455 = vmatpush.msra.mxu2 %v3689_v33  ;;  %1475 = vmatpush.msra.mxu3 %v3690_v34 }
 0x3dd   :  { %1416 = vmatpush.msra.mxu0 %v3691_v35  ;;  %1436 = vmatpush.msra.mxu1 %v3692_v36 }
 0x3de   :  { %1456 = vmatpush.msra.mxu2 %v3693_v37  ;;  %1476 = vmatpush.msra.mxu3 %v3694_v38  ;;  %v3703_v38 = vld [vmem:[#allocation53_spill] sm:$0xff] }
 0x3df   :  { %1417 = vmatpush.msra.mxu0 %v3695_v39  ;;  %1437 = vmatpush.msra.mxu1 %v3696_v40  ;;  %v3704_v40 = vld [vmem:[#allocation54_spill] sm:$0xff] }
 0x3e0   :  { %1457 = vmatpush.msra.mxu2 %v3697_v44  ;;  %1477 = vmatpush.msra.mxu3 %v3698_v45 }
 0x43c   :  { %v1125_v46 = vpop.f32.mrf.mxu0  ;;  %v1145_v49 = vpop.f32.mrf.mxu1 }
 0x43d   :  { %v1188_v60 = vadd.f32 %v1125_v46, %v3699_v58  ;;  %v1189_v50 = vadd.f32 %v1145_v49, %v3700_v51  ;;  %v3705_v58 = vld [vmem:[#allocation56_spill] sm:$0xff] }
 0x43f   :  { %v2109_v59 = vmul.f32 -1.442695, %v1188_v60  ;;  %v2110_v11 = vmul.f32 -1.442695, %v1189_v50 }
 0x441   :  { %2217 = vpow2.f32 %v2109_v59 }
 0x442   :  { %2219 = vpow2.f32 %v2110_v11 }
 0x443   :  { %v1185_v52 = vpop.f32.mrf.mxu3  ;;  %v1165_v5 = vpop.f32.mrf.mxu2 }
 0x444   :  { %v1191_v20 = vadd.f32 %v1185_v52, %v3701_v47  ;;  %v1190_v24 = vadd.f32 %v1165_v5, %v3702_v43 }
 0x446   :  { %v2111_v2 = vmul.f32 -1.442695, %v1191_v20 }
 0x447   :  { %v2218_v13 = vpop.eup %2217 }
 0x448   :  { %v2220_v15 = vpop.eup %2219  ;;  %v1195_v3 = vadd.f32 1.0, %v2218_v13  ;;  %2221 = vpow2.f32 %v2111_v2 }
 0x449   :  { %v1214_v4 = vadd.f32 1.0, %v2220_v15  ;;  %v3706_v15 = vld [vmem:[#allocation59_spill] sm:$0xff] }
 0x44a   :  { %2223 = vrcp.f32 %v1195_v3  ;;  %v1207_v42 = vand.u32 2147483648, %v1195_v3  ;;  %v1205_v26 = vand.u32 2147483647, %v1195_v3  ;;  %vm1201_vm15 = vweird.f32 %v1195_v3 }
 0x44b   :  { %2225 = vrcp.f32 %v1214_v4  ;;  %v1226_v21 = vand.u32 2147483648, %v1214_v4  ;;  %v1224_v18 = vand.u32 2147483647, %v1214_v4  ;;  %vm1220_vm0 = vweird.f32 %v1214_v4 }
 0x44c   :  { %v1208_v6 = vor.u32 1.1754944e-38, %v1207_v42  ;;  %vm1206_vm3 = vcmp.eq.f32.partialorder %v1205_v26, 8.507059e+37 }
 0x44d   :  { %v1227_v55 = vor.u32 1.1754944e-38, %v1226_v21  ;;  %vm1225_vm4 = vcmp.eq.f32.partialorder %v1224_v18, 8.507059e+37 }
 0x44e   :  { %v2222_v8 = vpop.eup %2221 }
 0x44f   :  { %v1234_v27 = vadd.f32 1.0, %v2222_v8 }
 0x450   :  { %v2224_v7 = vpop.eup %2223 }
 0x451   :  { %v2226_v30 = vpop.eup %2225  ;;  %v1197_v23 = vmul.f32 %v2224_v7, %v1195_v3  ;;  %2227 = vrcp.f32 %v1234_v27  ;;  %vm1202_vm13 = vweird.f32 %v2224_v7  ;;  %v1246_v53 = vand.u32 2147483648, %v1234_v27 }
 0x452   :  { %v1216_v19 = vmul.f32 %v2226_v30, %v1214_v4  ;;  %2229 = vtanh.f32 %v1190_v24  ;;  %vm1221_vm14 = vweird.f32 %v2226_v30  ;;  %vm1203_vm1 = vmor %vm1201_vm15, %vm1202_vm13  ;;  %vm1240_vm6 = vweird.f32 %v1234_v27 }
 0x453   :  { %v1198_v14 = vsub.f32 1.0, %v1197_v23  ;;  %vm1222_vm2 = vmor %vm1220_vm0, %vm1221_vm14  ;;  %v1244_v31 = vand.u32 2147483647, %v1234_v27  ;;  %v1247_v33 = vor.u32 1.1754944e-38, %v1246_v53 }
 0x454   :  { %v1217_v29 = vsub.f32 1.0, %v1216_v19 }
 0x455   :  { %v1199_v25 = vmul.f32 %v2224_v7, %v1198_v14  ;;  %vm1245_vm8 = vcmp.eq.f32.partialorder %v1244_v31, 8.507059e+37  ;;  %v1563_v31 = vld [vmem:[#allocation4 + $0x70] sm:$0xff] }
 0x456   :  { %v1218_v22 = vmul.f32 %v2226_v30, %v1217_v29 }
 0x457   :  { %v2228_v9 = vpop.eup %2227  ;;  %v1200_v16 = vadd.f32 %v2224_v7, %v1199_v25 }
 0x458   :  { %v1219_v12 = vadd.f32 %v2226_v30, %v1218_v22  ;;  %v1236_v17 = vmul.f32 %v2228_v9, %v1234_v27  ;;  %v2230_v62 = vpop.eup %2229  ;;  %vm1241_vm5 = vweird.f32 %v2228_v9 }
 0x459   :  { %v1204_v63 = vsel %vm1203_vm1, %v2224_v7, %v1200_v16  ;;  %vm1242_vm7 = vmor %vm1240_vm6, %vm1241_vm5 }
 0x45a   :  { %v1209_v41 = vsel %vm1206_vm3, %v1208_v6, %v1204_v63  ;;  %v1223_v54 = vsel %vm1222_vm2, %v2226_v30, %v1219_v12  ;;  %v1237_v0 = vsub.f32 1.0, %v1236_v17 }
 0x45b   :  { %v1228_v1 = vsel %vm1225_vm4, %v1227_v55, %v1223_v54  ;;  %v1251_v48 = vmul.f32 %v2230_v62, %v1209_v41 }
 0x45c   :  { %v1250_v28 = vmul.f32 %v1228_v1, %v3273_v10  ;;  %v1238_v56 = vmul.f32 %v2228_v9, %v1237_v0 }
 0x45e   :  { %v3345_v61 = vadd.f32 %v1251_v48, %v1250_v28  ;;  %v1239_v57 = vadd.f32 %v2228_v9, %v1238_v56 }
 0x460   :  { %2231 = vtanh.f32 %v3345_v61  ;;  %v1243_v32 = vsel %vm1242_vm7, %v2228_v9, %v1239_v57 }
 0x461   :  { %v1248_v35 = vsel %vm1245_vm8, %v1247_v33, %v1243_v32  ;;  %v1562_v32 = vld [vmem:[#allocation4 + $0x68] sm:$0xff]  ;;  %v1561_v33 = vld [vmem:[#allocation4 + $0x60] sm:$0xff] }
 0x466   :  { %v2232_v34 = vpop.eup %2231 }
 0x467   :  { %v1254_v36 = vmul.f32 %v2232_v34, %v1248_v35  ;;  %v1560_v34 = vld [vmem:[#allocation4 + $0x58] sm:$0xff]  ;;  %v1559_v35 = vld [vmem:[#allocation4 + $0x50] sm:$0xff] }
 0x469   :  { %1271 = vmatmul.f32.vlgmr.msrb.gmra.mxu0 %v1254_v36  ;;  %1291 = vmatmul.f32.vlgmr.msrb.gmra.mxu1 %v1254_v36 }
 0x46a   :  { %1311 = vmatmul.f32.vlgmr.msrb.gmra.mxu2 %v1254_v36  ;;  %1331 = vmatmul.f32.vlgmr.msrb.gmra.mxu3 %v1254_v36  ;;  %v1558_v36 = vld [vmem:[#allocation4 + $0x48] sm:$0xff] }
 0x4e6   :  { %v1272_v10 = vpop.f32.mrf.mxu0  ;;  %v1292_v37 = vpop.f32.mrf.mxu1 }
 0x4e7   :  { %v1335_v39 = vadd.f32 %v1272_v10, %v3703_v38  ;;  %v1336_v44 = vadd.f32 %v1292_v37, %v3704_v40  ;;  %v1557_v10 = vld [vmem:[#allocation4 + $0x40] sm:$0xff]  ;;  %v1556_v37 = vld [vmem:[#allocation4 + $0x38] sm:$0xff]  ;;  %v1555_v38 = vld [vmem:[#allocation4 + $0x30] sm:$0xff] }
 0x4e9   :  { %v2112_v45 = vmul.f32 -1.442695, %v1335_v39  ;;  %v2113_v46 = vmul.f32 -1.442695, %v1336_v44  ;;  %v3707_v44 = vld [vmem:[#allocation57_spill] sm:$0xff] }
 0x4eb   :  { %2233 = vpow2.f32 %v2112_v45 }
 0x4ec   :  { %2235 = vpow2.f32 %v2113_v46  ;;  %v3708_v46 = vld [vmem:[#allocation58_spill] sm:$0xff] }
 0x4ed   :  { %v1332_v49 = vpop.f32.mrf.mxu3  ;;  %v1312_v47 = vpop.f32.mrf.mxu2 }
 0x4ee   :  { %v1338_v60 = vadd.f32 %v1332_v49, %v3705_v58  ;;  %v1337_v3 = vadd.f32 %v1312_v47, %v3706_v15  ;;  %v1554_v58 = vld [vmem:[#allocation4 + $0x28] sm:$0xff] }
 0x4ef   :  { %v1550_v47 = vld [vmem:[#allocation4 + $0x8] sm:$0xff] }
 0x4f0   :  { %v2114_v51 = vmul.f32 -1.442695, %v1338_v60 }
 0x4f1   :  { %v2234_v50 = vpop.eup %2233 }
 0x4f2   :  { %v2236_v59 = vpop.eup %2235  ;;  %v1342_v11 = vadd.f32 1.0, %v2234_v50  ;;  %2237 = vpow2.f32 %v2114_v51  ;;  %v1553_v50 = vld [vmem:[#allocation4 + $0x20] sm:$0xff] }
 0x4f3   :  { %v1361_v52 = vadd.f32 1.0, %v2236_v59  ;;  %v1552_v59 = vld [vmem:[#allocation4 + $0x18] sm:$0xff] }
 0x4f4   :  { %2239 = vrcp.f32 %v1342_v11  ;;  %v1354_v43 = vand.u32 2147483648, %v1342_v11  ;;  %v1352_v23 = vand.u32 2147483647, %v1342_v11  ;;  %vm1348_vm11 = vweird.f32 %v1342_v11 }
 0x4f5   :  { %2241 = vrcp.f32 %v1361_v52  ;;  %v1373_v24 = vand.u32 2147483648, %v1361_v52  ;;  %v1371_v14 = vand.u32 2147483647, %v1361_v52  ;;  %vm1367_vm12 = vweird.f32 %v1361_v52 }
 0x4f6   :  { %v1355_v21 = vor.u32 1.1754944e-38, %v1354_v43  ;;  %vm1353_vm15 = vcmp.eq.f32.partialorder %v1352_v23, 8.507059e+37 }
 0x4f7   :  { %v1374_v22 = vor.u32 1.1754944e-38, %v1373_v24  ;;  %vm1372_vm0 = vcmp.eq.f32.partialorder %v1371_v14, 8.507059e+37 }
 0x4f8   :  { %v2238_v20 = vpop.eup %2237 }
 0x4f9   :  { %v1381_v2 = vadd.f32 1.0, %v2238_v20  ;;  %v3709_v20 = vld [vmem:[#allocation60_spill] sm:$0xff] }
 0x4fa   :  { %v2240_v13 = vpop.eup %2239 }
 0x4fb   :  { %v2242_v4 = vpop.eup %2241  ;;  %v1344_v5 = vmul.f32 %v2240_v13, %v1342_v11  ;;  %2243 = vrcp.f32 %v1381_v2  ;;  %vm1349_vm9 = vweird.f32 %v2240_v13  ;;  %v1393_v0 = vand.u32 2147483648, %v1381_v2  ;;  %v1551_v11 = vld [vmem:[#allocation4 + $0x10] sm:$0xff] }
 0x4fc   :  { %v1363_v8 = vmul.f32 %v2242_v4, %v1361_v52  ;;  %2245 = vtanh.f32 %v1337_v3  ;;  %vm1368_vm10 = vweird.f32 %v2242_v4  ;;  %vm1350_vm13 = vmor %vm1348_vm11, %vm1349_vm9  ;;  %vm1387_vm2 = vweird.f32 %v1381_v2 }
 0x4fd   :  { %v1345_v27 = vsub.f32 1.0, %v1344_v5  ;;  %vm1369_vm14 = vmor %vm1367_vm12, %vm1368_vm10  ;;  %v1391_v1 = vand.u32 2147483647, %v1381_v2  ;;  %v1394_v28 = vor.u32 1.1754944e-38, %v1393_v0 }
 0x4fe   :  { %v1364_v7 = vsub.f32 1.0, %v1363_v8 }
 0x4ff   :  { %v1346_v30 = vmul.f32 %v2240_v13, %v1345_v27  ;;  %vm1392_vm4 = vcmp.eq.f32.partialorder %v1391_v1, 8.507059e+37 }
 0x500   :  { %v1365_v19 = vmul.f32 %v2242_v4, %v1364_v7 }
 0x501   :  { %v2244_v29 = vpop.eup %2243  ;;  %v1347_v42 = vadd.f32 %v2240_v13, %v1346_v30  ;;  %v3710_v30 = vld [vmem:[#allocation61_spill] sm:$0xff] }
 0x502   :  { %v1366_v25 = vadd.f32 %v2242_v4, %v1365_v19  ;;  %v1383_v26 = vmul.f32 %v2244_v29, %v1381_v2  ;;  %v2246_v9 = vpop.eup %2245  ;;  %vm1388_vm1 = vweird.f32 %v2244_v29 }
 0x503   :  { %v1351_v18 = vsel %vm1350_vm13, %v2240_v13, %v1347_v42  ;;  %vm1389_vm3 = vmor %vm1387_vm2, %vm1388_vm1  ;;  %v1549_v13 = vld [vmem:[#allocation4] sm:$0xff] }
 0x504   :  { %v1356_v16 = vsel %vm1353_vm15, %v1355_v21, %v1351_v18  ;;  %v1370_v6 = vsel %vm1369_vm14, %v2242_v4, %v1366_v25  ;;  %v1384_v12 = vsub.f32 1.0, %v1383_v26 }
 0x505   :  { %v1375_v17 = vsel %vm1372_vm0, %v1374_v22, %v1370_v6  ;;  %v1398_v55 = vmul.f32 %v2246_v9, %v1356_v16 }
 0x506   :  { %v1397_v63 = vmul.f32 %v1375_v17, %v3345_v61  ;;  %v1385_v62 = vmul.f32 %v2244_v29, %v1384_v12  ;;  %v1564_v61 = vld [vmem:[#allocation4 + $0x78] sm:$0xff] }
 0x507   :  { %1565 = vmatpush.msrb.mxu0 %v1564_v61  ;;  %1587 = vmatpush.msrb.mxu1 %v1564_v61 }
 0x508   :  { %v3353_v41 = vadd.f32 %v1398_v55, %v1397_v63  ;;  %v1386_v54 = vadd.f32 %v2244_v29, %v1385_v62 }
 0x509   :  { %1566 = vmatpush.msrb.mxu0 %v1563_v31  ;;  %1588 = vmatpush.msrb.mxu1 %v1563_v31 }
 0x50a   :  { %2247 = vtanh.f32 %v3353_v41  ;;  %v1390_v48 = vsel %vm1389_vm3, %v2244_v29, %v1386_v54 }
 0x50b   :  { %v1395_v57 = vsel %vm1392_vm4, %v1394_v28, %v1390_v48  ;;  %1567 = vmatpush.msrb.mxu0 %v1562_v32  ;;  %1589 = vmatpush.msrb.mxu1 %v1562_v32 }
 0x50d   :  { %1568 = vmatpush.msrb.mxu0 %v1561_v33  ;;  %1590 = vmatpush.msrb.mxu1 %v1561_v33 }
 0x50f   :  { %1569 = vmatpush.msrb.mxu0 %v1560_v34  ;;  %1591 = vmatpush.msrb.mxu1 %v1560_v34 }
 0x510   :  { %v2248_v56 = vpop.eup %2247 }
 0x511   :  { %v1401_v53 = vmul.f32 %v2248_v56, %v1395_v57  ;;  %1570 = vmatpush.msrb.mxu0 %v1559_v35  ;;  %1592 = vmatpush.msrb.mxu1 %v1559_v35 }
 0x513   :  { %1418 = vmatmul.f32.vlgmr.msra.gmra.mxu0 %v1401_v53  ;;  %1438 = vmatmul.f32.vlgmr.msra.gmra.mxu1 %v1401_v53 }
 0x514   :  { %1458 = vmatmul.f32.vlgmr.msra.gmra.mxu2 %v1401_v53  ;;  %1478 = vmatmul.f32.vlgmr.msra.gmra.mxu3 %v1401_v53 }
 0x515   :  { %1571 = vmatpush.msrb.mxu0 %v1558_v36  ;;  %1593 = vmatpush.msrb.mxu1 %v1558_v36 }
 0x517   :  { %1572 = vmatpush.msrb.mxu0 %v1557_v10  ;;  %1594 = vmatpush.msrb.mxu1 %v1557_v10 }
 0x519   :  { %1573 = vmatpush.msrb.mxu0 %v1556_v37  ;;  %1595 = vmatpush.msrb.mxu1 %v1556_v37 }
 0x51b   :  { %1574 = vmatpush.msrb.mxu0 %v1555_v38  ;;  %1596 = vmatpush.msrb.mxu1 %v1555_v38 }
 0x51d   :  { %1575 = vmatpush.msrb.mxu0 %v1554_v58  ;;  %1597 = vmatpush.msrb.mxu1 %v1554_v58  ;;  %v1635_v58 = vld [vmem:[#allocation4 + $0xd8] sm:$0xff] }
 0x51f   :  { %1576 = vmatpush.msrb.mxu0 %v1553_v50  ;;  %1598 = vmatpush.msrb.mxu1 %v1553_v50  ;;  %v1632_v50 = vld [vmem:[#allocation4 + $0xc0] sm:$0xff] }
 0x521   :  { %1577 = vmatpush.msrb.mxu0 %v1552_v59  ;;  %1599 = vmatpush.msrb.mxu1 %v1552_v59  ;;  %v1631_v59 = vld [vmem:[#allocation4 + $0xb8] sm:$0xff] }
 0x523   :  { %1578 = vmatpush.msrb.mxu0 %v1551_v11  ;;  %1600 = vmatpush.msrb.mxu1 %v1551_v11  ;;  %v1630_v11 = vld [vmem:[#allocation4 + $0xb0] sm:$0xff] }
 0x525   :  { %1579 = vmatpush.msrb.mxu0 %v1550_v47  ;;  %1601 = vmatpush.msrb.mxu1 %v1550_v47  ;;  %v1628_v47 = vld [vmem:[#allocation4 + $0xa0] sm:$0xff] }
 0x527   :  { %1580 = vmatpush.msrb.mxu0 %v1549_v13  ;;  %1602 = vmatpush.msrb.mxu1 %v1549_v13  ;;  %v1625_v13 = vld [vmem:[#allocation4 + $0x88] sm:$0xff] }
 0x590   :  { %v1419_v39 = vpop.f32.mrf.mxu0  ;;  %v1439_v40 = vpop.f32.mrf.mxu1 }
 0x591   :  { %v1482_v45 = vadd.f32 %v1419_v39, %v3707_v44  ;;  %v1483_v49 = vadd.f32 %v1439_v40, %v3708_v46  ;;  %v1639_v39 = vld [vmem:[#allocation4 + $0xf8] sm:$0xff]  ;;  %v1638_v40 = vld [vmem:[#allocation4 + $0xf0] sm:$0xff]  ;;  %v1637_v46 = vld [vmem:[#allocation4 + $0xe8] sm:$0xff] }
 0x592   :  { %1642 = vmatpush.msrb.mxu2 %v1639_v39  ;;  %v1702_v39 = vld [vmem:[#allocation4 + $0x180] sm:$0xff] }
 0x593   :  { %v2115_v60 = vmul.f32 -1.442695, %v1482_v45  ;;  %v2116_v51 = vmul.f32 -1.442695, %v1483_v49  ;;  %v1636_v49 = vld [vmem:[#allocation4 + $0xe0] sm:$0xff] }
 0x594   :  { %1643 = vmatpush.msrb.mxu2 %v1638_v40  ;;  %v2131_v40 = vld [vmem:[%s3409_s3 + $0x2] ss:$0 sm:$0xff] }
 0x595   :  { %2249 = vpow2.f32 %v2115_v60  ;;  %v1634_v60 = vld [vmem:[#allocation4 + $0xd0] sm:$0xff] }
 0x596   :  { %2251 = vpow2.f32 %v2116_v51  ;;  %1644 = vmatpush.msrb.mxu2 %v1637_v46  ;;  %v1633_v51 = vld [vmem:[#allocation4 + $0xc8] sm:$0xff]  ;;  %v2132_v46 = vld [vmem:[%s3409_s3 + $0x4] ss:$0 sm:$0xff] }
 0x597   :  { %v1479_v52 = vpop.f32.mrf.mxu3  ;;  %v1459_v27 = vpop.f32.mrf.mxu2 }
 0x598   :  { %v1485_v2 = vadd.f32 %v1479_v52, %v3709_v20  ;;  %v1484_v23 = vadd.f32 %v1459_v27, %v3710_v30  ;;  %1645 = vmatpush.msrb.mxu2 %v1636_v49  ;;  %v1629_v52 = vld [vmem:[#allocation4 + $0xa8] sm:$0xff]  ;;  %v1627_v20 = vld [vmem:[#allocation4 + $0x98] sm:$0xff] }
 0x599   :  { %v1676_v27 = vld [vmem:[#allocation4 + $0x168] sm:$0xff] }
 0x59a   :  { %v2117_v15 = vmul.f32 -1.442695, %v1485_v2  ;;  %1646 = vmatpush.msrb.mxu2 %v1635_v58  ;;  %v1626_v2 = vld [vmem:[#allocation4 + $0x90] sm:$0xff] }
 0x59b   :  { %v2250_v3 = vpop.eup %2249 }
 0x59c   :  { %v2252_v4 = vpop.eup %2251  ;;  %v1489_v5 = vadd.f32 1.0, %v2250_v3  ;;  %2253 = vpow2.f32 %v2117_v15  ;;  %1647 = vmatpush.msrb.mxu2 %v1634_v60  ;;  %v1624_v15 = vld [vmem:[#allocation4 + $0x80] sm:$0xff]  ;;  %v1678_v3 = vld [vmem:[#allocation4 + $0x178] sm:$0xff] }
 0x59d   :  { %v1508_v8 = vadd.f32 1.0, %v2252_v4  ;;  %v1717_v4 = vld [vmem:[#allocation4 + $0x1f8] sm:$0xff]  ;;  %1681 = vmatpush.msrb.mxu3 %v1678_v3  ;;  %v1809_v3 = vld [vmem:[#allocation4 + $0x2d0] sm:$0xff] }
 0x59e   :  { %2255 = vrcp.f32 %v1489_v5  ;;  %v1501_v25 = vand.u32 2147483648, %v1489_v5  ;;  %v1499_v18 = vand.u32 2147483647, %v1489_v5  ;;  %vm1495_vm7 = vweird.f32 %v1489_v5  ;;  %1648 = vmatpush.msrb.mxu2 %v1633_v51  ;;  %1720 = vmatpush.msra.mxu0 %v1717_v4  ;;  %v1777_v60 = vld [vmem:[#allocation4 + $0x278] sm:$0xff] }
 0x59f   :  { %2257 = vrcp.f32 %v1508_v8  ;;  %v1520_v26 = vand.u32 2147483648, %v1508_v8  ;;  %v1518_v16 = vand.u32 2147483647, %v1508_v8  ;;  %vm1514_vm8 = vweird.f32 %v1508_v8  ;;  %v1814_v51 = vld [vmem:[#allocation4 + $0x2f8] sm:$0xff]  ;;  %1778 = vmatpush.msra.mxu1 %v1777_v60 }
 0x5a0   :  { %v1502_v17 = vor.u32 1.1754944e-38, %v1501_v25  ;;  %vm1500_vm11 = vcmp.eq.f32.partialorder %v1499_v18, 8.507059e+37  ;;  %1649 = vmatpush.msrb.mxu2 %v1632_v50  ;;  %v1711_v25 = vld [vmem:[#allocation4 + $0x1c8] sm:$0xff]  ;;  %v1776_v50 = vld [vmem:[#allocation4 + $0x270] sm:$0xff]  ;;  %v1839_v60 = vld [vmem:[#allocation4 + $0x318] sm:$0xff] }
 0x5a1   :  { %v1521_v62 = vor.u32 1.1754944e-38, %v1520_v26  ;;  %vm1519_vm12 = vcmp.eq.f32.partialorder %v1518_v16, 8.507059e+37  ;;  %v1671_v26 = vld [vmem:[#allocation4 + $0x140] sm:$0xff]  ;;  %v1709_v16 = vld [vmem:[#allocation4 + $0x1b8] sm:$0xff]  ;;  %1779 = vmatpush.msra.mxu1 %v1776_v50 }
 0x5a2   :  { %v2254_v7 = vpop.eup %2253  ;;  %1650 = vmatpush.msrb.mxu2 %v1631_v59  ;;  %v1813_v59 = vld [vmem:[#allocation4 + $0x2f0] sm:$0xff] }
 0x5a3   :  { %v1528_v43 = vadd.f32 1.0, %v2254_v7  ;;  %v1715_v7 = vld [vmem:[#allocation4 + $0x1e8] sm:$0xff] }
 0x5a4   :  { %v2256_v24 = vpop.eup %2255  ;;  %1651 = vmatpush.msrb.mxu2 %v1630_v11  ;;  %v1775_v11 = vld [vmem:[#allocation4 + $0x268] sm:$0xff] }
 0x5a5   :  { %v2258_v19 = vpop.eup %2257  ;;  %v1491_v14 = vmul.f32 %v2256_v24, %v1489_v5  ;;  %2259 = vrcp.f32 %v1528_v43  ;;  %vm1496_vm5 = vweird.f32 %v2256_v24  ;;  %v1540_v33 = vand.u32 2147483648, %v1528_v43  ;;  %v1677_v5 = vld [vmem:[#allocation4 + $0x170] sm:$0xff]  ;;  %1780 = vmatpush.msra.mxu1 %v1775_v11 }
 0x5a6   :  { %v1510_v29 = vmul.f32 %v2258_v19, %v1508_v8  ;;  %2261 = vtanh.f32 %v1484_v23  ;;  %vm1515_vm6 = vweird.f32 %v2258_v19  ;;  %vm1497_vm9 = vmor %vm1495_vm7, %vm1496_vm5  ;;  %vm1534_vm14 = vweird.f32 %v1528_v43  ;;  %1652 = vmatpush.msrb.mxu2 %v1629_v52  ;;  %v1716_v8 = vld [vmem:[#allocation4 + $0x1f0] sm:$0xff]  ;;  %1682 = vmatpush.msrb.mxu3 %v1677_v5  ;;  %v1812_v52 = vld [vmem:[#allocation4 + $0x2e8] sm:$0xff] }
 0x5a7   :  { %v1492_v42 = vsub.f32 1.0, %v1491_v14  ;;  %vm1516_vm10 = vmor %vm1514_vm8, %vm1515_vm6  ;;  %v1538_v34 = vand.u32 2147483647, %v1528_v43  ;;  %v1541_v36 = vor.u32 1.1754944e-38, %v1540_v33  ;;  %1721 = vmatpush.msra.mxu0 %v1716_v8  ;;  %v1713_v14 = vld [vmem:[#allocation4 + $0x1d8] sm:$0xff]  ;;  %v1838_v11 = vld [vmem:[#allocation4 + $0x310] sm:$0xff] }
 0x5a8   :  { %v1511_v21 = vsub.f32 1.0, %v1510_v29  ;;  %1653 = vmatpush.msrb.mxu2 %v1628_v47  ;;  %1683 = vmatpush.msrb.mxu3 %v1676_v27  ;;  %v1673_v29 = vld [vmem:[#allocation4 + $0x150] sm:$0xff]  ;;  %v1666_v33 = vld [vmem:[#allocation4 + $0x118] sm:$0xff]  ;;  %v1774_v47 = vld [vmem:[#allocation4 + $0x260] sm:$0xff] }
 0x5a9   :  { %v1493_v22 = vmul.f32 %v2256_v24, %v1492_v42  ;;  %vm1539_vm0 = vcmp.eq.f32.partialorder %v1538_v34, 8.507059e+37  ;;  %1722 = vmatpush.msra.mxu0 %v1715_v7  ;;  %v1712_v42 = vld [vmem:[#allocation4 + $0x1d0] sm:$0xff]  ;;  %v1705_v34 = vld [vmem:[#allocation4 + $0x198] sm:$0xff]  ;;  %1781 = vmatpush.msra.mxu1 %v1774_v47  ;;  %v1771_v7 = vld [vmem:[#allocation4 + $0x248] sm:$0xff] }
 0x5aa   :  { %v1512_v9 = vmul.f32 %v2258_v19, %v1511_v21  ;;  %1654 = vmatpush.msrb.mxu2 %v1627_v20  ;;  %v1672_v21 = vld [vmem:[#allocation4 + $0x148] sm:$0xff]  ;;  %v1811_v20 = vld [vmem:[#allocation4 + $0x2e0] sm:$0xff] }
 0x5ab   :  { %v2260_v6 = vpop.eup %2259  ;;  %v1494_v12 = vadd.f32 %v2256_v24, %v1493_v22  ;;  %v1710_v22 = vld [vmem:[#allocation4 + $0x1c0] sm:$0xff] }
 0x5ac   :  { %v1513_v55 = vadd.f32 %v2258_v19, %v1512_v9  ;;  %v1530_v63 = vmul.f32 %v2260_v6, %v1528_v43  ;;  %v2262_v0 = vpop.eup %2261  ;;  %vm1535_vm13 = vweird.f32 %v2260_v6  ;;  %1655 = vmatpush.msrb.mxu2 %v1626_v2  ;;  %v1675_v43 = vld [vmem:[#allocation4 + $0x160] sm:$0xff]  ;;  %v1670_v9 = vld [vmem:[#allocation4 + $0x138] sm:$0xff] }
 0x5ad   :  { %v1498_v54 = vsel %vm1497_vm9, %v2256_v24, %v1494_v12  ;;  %vm1536_vm15 = vmor %vm1534_vm14, %vm1535_vm13  ;;  %v1714_v24 = vld [vmem:[#allocation4 + $0x1e0] sm:$0xff]  ;;  %1684 = vmatpush.msrb.mxu3 %v1675_v43  ;;  %v1669_v12 = vld [vmem:[#allocation4 + $0x130] sm:$0xff] }
 0x5ae   :  { %v1503_v1 = vsel %vm1500_vm11, %v1502_v17, %v1498_v54  ;;  %v1517_v48 = vsel %vm1516_vm10, %v2258_v19, %v1513_v55  ;;  %v1531_v28 = vsub.f32 1.0, %v1530_v63  ;;  %1656 = vmatpush.msrb.mxu2 %v1625_v13  ;;  %v1674_v19 = vld [vmem:[#allocation4 + $0x158] sm:$0xff]  ;;  %1723 = vmatpush.msra.mxu0 %v1714_v24  ;;  %v1708_v17 = vld [vmem:[#allocation4 + $0x1b0] sm:$0xff]  ;;  %v1668_v63 = vld [vmem:[#allocation4 + $0x128] sm:$0xff] }
 0x5af   :  { %v1522_v56 = vsel %vm1519_vm12, %v1521_v62, %v1517_v48  ;;  %v1545_v57 = vmul.f32 %v2262_v0, %v1503_v1  ;;  %1685 = vmatpush.msrb.mxu3 %v1674_v19  ;;  %v1707_v62 = vld [vmem:[#allocation4 + $0x1a8] sm:$0xff]  ;;  %v2129_v48 = vld [vmem:[%s3409_s3] ss:$0 sm:$0xff]  ;;  %v1773_v2 = vld [vmem:[#allocation4 + $0x258] sm:$0xff] }
 0x5b0   :  { %v1544_v53 = vmul.f32 %v1522_v56, %v3353_v41  ;;  %v1532_v61 = vmul.f32 %v2260_v6, %v1531_v28  ;;  %1657 = vmatpush.msrb.mxu2 %v1624_v15  ;;  %1724 = vmatpush.msra.mxu0 %v1713_v14  ;;  %v1810_v13 = vld [vmem:[#allocation4 + $0x2d8] sm:$0xff]  ;;  %v1772_v15 = vld [vmem:[#allocation4 + $0x250] sm:$0xff]  ;;  %v1808_v43 = vld [vmem:[#allocation4 + $0x2c8] sm:$0xff] }
 0x5b1   :  { %1686 = vmatpush.msrb.mxu3 %v1673_v29  ;;  %1782 = vmatpush.msra.mxu1 %v1773_v2  ;;  %v1770_v24 = vld [vmem:[#allocation4 + $0x240] sm:$0xff]  ;;  %v1806_v19 = vld [vmem:[#allocation4 + $0x2b8] sm:$0xff]  ;;  %v1768_v14 = vld [vmem:[#allocation4 + $0x230] sm:$0xff] }
 0x5b2   :  { %v1546_v31 = vadd.f32 %v1545_v57, %v1544_v53  ;;  %v1533_v32 = vadd.f32 %v2260_v6, %v1532_v61  ;;  %1725 = vmatpush.msra.mxu0 %v1712_v42  ;;  %v2130_v57 = vld [vmem:[%s3409_s3 + $0x1] ss:$0 sm:$0xff]  ;;  %1815 = vmatpush.msra.mxu2 %v1814_v51  ;;  %v1805_v29 = vld [vmem:[#allocation4 + $0x2b0] sm:$0xff]  ;;  %v1767_v42 = vld [vmem:[#allocation4 + $0x228] sm:$0xff] }
 0x5b3   :  { %1687 = vmatpush.msrb.mxu3 %v1672_v21  ;;  %1783 = vmatpush.msra.mxu1 %v1772_v15  ;;  %v1804_v21 = vld [vmem:[#allocation4 + $0x2a8] sm:$0xff]  ;;  %v1856_v15 = vld [vmem:[#allocation4 + $0x3a0] sm:$0xff] }
 0x5b4   :  { %2263 = vtanh.f32 %v1546_v31  ;;  %v1537_v35 = vsel %vm1536_vm15, %v2260_v6, %v1533_v32  ;;  %1726 = vmatpush.msra.mxu0 %v1711_v25  ;;  %v1667_v31 = vld [vmem:[#allocation4 + $0x120] sm:$0xff]  ;;  %1816 = vmatpush.msra.mxu2 %v1813_v59 }
 0x5b5   :  { %v1542_v37 = vsel %vm1539_vm0, %v1541_v36, %v1537_v35  ;;  %1688 = vmatpush.msrb.mxu3 %v1671_v26  ;;  %v1706_v32 = vld [vmem:[#allocation4 + $0x1a0] sm:$0xff]  ;;  %v1665_v35 = vld [vmem:[#allocation4 + $0x110] sm:$0xff]  ;;  %1784 = vmatpush.msra.mxu1 %v1771_v7  ;;  %v1853_v7 = vld [vmem:[#allocation4 + $0x388] sm:$0xff] }
 0x5b6   :  { %1727 = vmatpush.msra.mxu0 %v1710_v22  ;;  %v1704_v36 = vld [vmem:[#allocation4 + $0x190] sm:$0xff]  ;;  %1817 = vmatpush.msra.mxu2 %v1812_v52  ;;  %v1766_v25 = vld [vmem:[#allocation4 + $0x220] sm:$0xff]  ;;  %v1765_v22 = vld [vmem:[#allocation4 + $0x218] sm:$0xff] }
 0x5b7   :  { %1689 = vmatpush.msrb.mxu3 %v1670_v9  ;;  %1785 = vmatpush.msra.mxu1 %v1770_v24  ;;  %v1803_v26 = vld [vmem:[#allocation4 + $0x2a0] sm:$0xff]  ;;  %v1764_v9 = vld [vmem:[#allocation4 + $0x210] sm:$0xff]  ;;  %v1923_v24 = vld [vmem:[#allocation4 + $0x478] sm:$0xff] }
 0x5b8   :  { %1728 = vmatpush.msra.mxu0 %v1709_v16  ;;  %1818 = vmatpush.msra.mxu2 %v1811_v20  ;;  %v1801_v16 = vld [vmem:[#allocation4 + $0x290] sm:$0xff] }
 0x5b9   :  { %1690 = vmatpush.msrb.mxu3 %v1669_v12  ;;  %v1800_v12 = vld [vmem:[#allocation4 + $0x288] sm:$0xff] }
 0x5ba   :  { %v2264_v10 = vpop.eup %2263  ;;  %1729 = vmatpush.msra.mxu0 %v1708_v17  ;;  %1819 = vmatpush.msra.mxu2 %v1810_v13  ;;  %v1762_v17 = vld [vmem:[#allocation4 + $0x200] sm:$0xff] }
 0x5bb   :  { %v1548_v38 = vmul.f32 %v2264_v10, %v1542_v37  ;;  %1691 = vmatpush.msrb.mxu3 %v1668_v63  ;;  %v1664_v10 = vld [vmem:[#allocation4 + $0x108] sm:$0xff]  ;;  %v1851_v63 = vld [vmem:[#allocation4 + $0x378] sm:$0xff] }
 0x5bc   :  { %1730 = vmatpush.msra.mxu0 %v1707_v62  ;;  %v1703_v37 = vld [vmem:[#allocation4 + $0x188] sm:$0xff]  ;;  %1820 = vmatpush.msra.mxu2 %v1809_v3  ;;  %v1850_v62 = vld [vmem:[#allocation4 + $0x370] sm:$0xff] }
 0x5bd   :  { %1581 = vmatmul.f32.vlgmr.msrb.gmra.mxu0 %v1548_v38  ;;  %1692 = vmatpush.msrb.mxu3 %v1667_v31  ;;  %v1862_v31 = vld [vmem:[#allocation4 + $0x3d0] sm:$0xff]  ;;  %v1837_v3 = vld [vmem:[#allocation4 + $0x308] sm:$0xff] }
 0x5be   :  { %1731 = vmatpush.msra.mxu0 %v1706_v32  ;;  %1821 = vmatpush.msra.mxu2 %v1808_v43  ;;  %v1845_v32 = vld [vmem:[#allocation4 + $0x348] sm:$0xff]  ;;  %v1852_v43 = vld [vmem:[#allocation4 + $0x380] sm:$0xff] }
 0x5bf   :  { %1693 = vmatpush.msrb.mxu3 %v1666_v33  ;;  %v1861_v33 = vld [vmem:[#allocation4 + $0x3c8] sm:$0xff] }
 0x5c0   :  { %1732 = vmatpush.msra.mxu0 %v1705_v34 }
 0x5c1   :  { %1694 = vmatpush.msrb.mxu3 %v1665_v35  ;;  %v1844_v35 = vld [vmem:[#allocation4 + $0x340] sm:$0xff] }
 0x5c2   :  { %1733 = vmatpush.msra.mxu0 %v1704_v36  ;;  %v1860_v36 = vld [vmem:[#allocation4 + $0x3c0] sm:$0xff] }
 0x5c3   :  { %1695 = vmatpush.msrb.mxu3 %v1664_v10  ;;  %v1843_v10 = vld [vmem:[#allocation4 + $0x338] sm:$0xff] }
 0x5c4   :  { %1734 = vmatpush.msra.mxu0 %v1703_v37  ;;  %v1859_v37 = vld [vmem:[#allocation4 + $0x3b8] sm:$0xff] }
 0x5c6   :  { %1735 = vmatpush.msra.mxu0 %v1702_v39  ;;  %v1858_v39 = vld [vmem:[#allocation4 + $0x3b0] sm:$0xff] }
 0x5c8   :  { %1888 = vmatpush.msrb.mxu0 %v1851_v63  ;;  %v1912_v63 = vld [vmem:[#allocation4 + $0x420] sm:$0xff] }
 0x5ca   :  { %1889 = vmatpush.msrb.mxu0 %v1850_v62  ;;  %v1911_v62 = vld [vmem:[#allocation4 + $0x418] sm:$0xff] }
 0x63a   :  { %v1582_v41 = vpop.f32.mrf.mxu0 }
 0x63b   :  { %v3361_v44 = vsub.f32 %v1548_v38, %v1582_v41  ;;  %v1663_v38 = vld [vmem:[#allocation4 + $0x100] sm:$0xff] }
 0x63c   :  { %1696 = vmatpush.msrb.mxu3 %v1663_v38  ;;  %v1842_v38 = vld [vmem:[#allocation4 + $0x330] sm:$0xff] }
 0x63d   :  { %v1586_v45 = vmul.f32 %v3361_v44, %v3361_v44 }
 0x63f   :  { %1603 = vmatmul.f32.vlgmr.msrb.gmra.mxu1 %v1586_v45 }
 0x6bc   :  { %v1604_v30 = vpop.f32.mrf.mxu1 }
 0x6bd   :  { %v1605_v23 = vadd.f32 1e-05, %v1604_v30  ;;  %v1807_v30 = vld [vmem:[#allocation4 + $0x2c0] sm:$0xff] }
 0x6be   :  { %1822 = vmatpush.msra.mxu2 %v1807_v30  ;;  %v1922_v30 = vld [vmem:[#allocation4 + $0x470] sm:$0xff] }
 0x6bf   :  { %2265 = vrsqrt.f32 %v1605_v23  ;;  %vm1613_vm2 = vweird.f32 %v1605_v23 }
 0x6c0   :  { %1823 = vmatpush.msra.mxu2 %v1806_v19  ;;  %v1919_v19 = vld [vmem:[#allocation4 + $0x458] sm:$0xff] }
 0x6c2   :  { %1824 = vmatpush.msra.mxu2 %v1805_v29  ;;  %v1917_v29 = vld [vmem:[#allocation4 + $0x448] sm:$0xff] }
 0x6c4   :  { %1825 = vmatpush.msra.mxu2 %v1804_v21  ;;  %v2133_v21 = vld [vmem:[%s3409_s3 + $0x3] ss:$0 sm:$0xff] }
 0x6c5   :  { %v2266_v18 = vpop.eup %2265 }
 0x6c6   :  { %v1608_v6 = vmul.f32 %v2266_v18, %v1605_v23  ;;  %vm1614_vm1 = vweird.f32 %v2266_v18  ;;  %v1769_v23 = vld [vmem:[#allocation4 + $0x238] sm:$0xff]  ;;  %1826 = vmatpush.msra.mxu2 %v1803_v26 }
 0x6c7   :  { %vm1615_vm3 = vmor %vm1613_vm2, %vm1614_vm1  ;;  %1786 = vmatpush.msra.mxu1 %v1769_v23  ;;  %v1920_v23 = vld [vmem:[#allocation4 + $0x460] sm:$0xff] }
 0x6c8   :  { %v1609_v55 = vmul.f32 %v2266_v18, %v1608_v6  ;;  %v1763_v6 = vld [vmem:[#allocation4 + $0x208] sm:$0xff] }
 0x6c9   :  { %1787 = vmatpush.msra.mxu1 %v1768_v14  ;;  %v1918_v14 = vld [vmem:[#allocation4 + $0x450] sm:$0xff] }
 0x6ca   :  { %v1610_v54 = vmul.f32 0.5, %v1609_v55  ;;  %v1799_v55 = vld [vmem:[#allocation4 + $0x280] sm:$0xff] }
 0x6cb   :  { %1788 = vmatpush.msra.mxu1 %v1767_v42  ;;  %v1916_v42 = vld [vmem:[#allocation4 + $0x440] sm:$0xff] }
 0x6cc   :  { %v1611_v0 = vsub.f32 1.5, %v1610_v54  ;;  %v1867_v54 = vld [vmem:[#allocation4 + $0x3f8] sm:$0xff] }
 0x6cd   :  { %1789 = vmatpush.msra.mxu1 %v1766_v25  ;;  %1868 = vmatpush.msra.mxu3 %v1867_v54  ;;  %v1910_v54 = vld [vmem:[#allocation4 + $0x410] sm:$0xff] }
 0x6ce   :  { %v1612_v1 = vmul.f32 %v2266_v18, %v1611_v0  ;;  %v1866_v0 = vld [vmem:[#allocation4 + $0x3f0] sm:$0xff] }
 0x6cf   :  { %1790 = vmatpush.msra.mxu1 %v1765_v22  ;;  %1869 = vmatpush.msra.mxu3 %v1866_v0  ;;  %v1909_v0 = vld [vmem:[#allocation4 + $0x408] sm:$0xff] }
 0x6d0   :  { %v1616_v28 = vsel %vm1615_vm3, %v2266_v18, %v1612_v1  ;;  %v1802_v18 = vld [vmem:[#allocation4 + $0x298] sm:$0xff]  ;;  %v1849_v1 = vld [vmem:[#allocation4 + $0x368] sm:$0xff] }
 0x6d1   :  { %v1617_v56 = vmul.f32 %v1616_v28, %v3361_v44  ;;  %1827 = vmatpush.msra.mxu2 %v1802_v18  ;;  %1791 = vmatpush.msra.mxu1 %v1764_v9  ;;  %v1848_v28 = vld [vmem:[#allocation4 + $0x360] sm:$0xff] }
 0x6d2   :  { %1890 = vmatpush.msrb.mxu0 %v1849_v1  ;;  %v1961_v1 = vld [vmem:[#allocation4 + $0x4f8] sm:$0xff] }
 0x6d3   :  { %v1620_v53 = vmul.f32 %v2129_v48, %v1617_v56  ;;  %1828 = vmatpush.msra.mxu2 %v1801_v16  ;;  %1792 = vmatpush.msra.mxu1 %v1763_v6  ;;  %v1865_v48 = vld [vmem:[#allocation4 + $0x3e8] sm:$0xff]  ;;  %v1864_v56 = vld [vmem:[#allocation4 + $0x3e0] sm:$0xff] }
 0x6d4   :  { %1870 = vmatpush.msra.mxu3 %v1865_v48  ;;  %1891 = vmatpush.msrb.mxu0 %v1848_v28  ;;  %v1960_v48 = vld [vmem:[#allocation4 + $0x4f0] sm:$0xff]  ;;  %v1959_v28 = vld [vmem:[#allocation4 + $0x4e8] sm:$0xff] }
 0x6d5   :  { %v1623_v61 = vadd.f32 %v2130_v57, %v1620_v53  ;;  %1829 = vmatpush.msra.mxu2 %v1800_v12  ;;  %1793 = vmatpush.msra.mxu1 %v1762_v17  ;;  %v1847_v57 = vld [vmem:[#allocation4 + $0x358] sm:$0xff]  ;;  %v1914_v17 = vld [vmem:[#allocation4 + $0x430] sm:$0xff] }
 0x6d6   :  { %v1863_v53 = vld [vmem:[#allocation4 + $0x3d8] sm:$0xff]  ;;  %1871 = vmatpush.msra.mxu3 %v1864_v56  ;;  %1892 = vmatpush.msrb.mxu0 %v1847_v57  ;;  %v1958_v56 = vld [vmem:[#allocation4 + $0x4e0] sm:$0xff] }
 0x6d7   :  { %1658 = vmatmul.f32.vlgmr.msrb.gmra.mxu2 %v1623_v61  ;;  %v1846_v61 = vld [vmem:[#allocation4 + $0x350] sm:$0xff]  ;;  %1926 = vmatpush.msrb.mxu1 %v1923_v24  ;;  %v1915_v12 = vld [vmem:[#allocation4 + $0x438] sm:$0xff] }
 0x6d8   :  { %1830 = vmatpush.msra.mxu2 %v1799_v55  ;;  %1872 = vmatpush.msra.mxu3 %v1863_v53  ;;  %v1913_v55 = vld [vmem:[#allocation4 + $0x428] sm:$0xff]  ;;  %v1957_v57 = vld [vmem:[#allocation4 + $0x4d8] sm:$0xff]  ;;  %v1956_v53 = vld [vmem:[#allocation4 + $0x4d0] sm:$0xff] }
 0x6d9   :  { %1893 = vmatpush.msrb.mxu0 %v1846_v61  ;;  %1927 = vmatpush.msrb.mxu1 %v1922_v30  ;;  %v1955_v61 = vld [vmem:[#allocation4 + $0x4c8] sm:$0xff]  ;;  %v2014_v30 = vld [vmem:[#allocation4 + $0x520] sm:$0xff] }
 0x6da   :  { %1873 = vmatpush.msra.mxu3 %v1862_v31  ;;  %1964 = vmatpush.msrb.mxu2 %v1961_v1  ;;  %v1954_v31 = vld [vmem:[#allocation4 + $0x4c0] sm:$0xff] }
 0x6db   :  { %1894 = vmatpush.msrb.mxu0 %v1845_v32  ;;  %v1953_v32 = vld [vmem:[#allocation4 + $0x4b8] sm:$0xff] }
 0x6dc   :  { %1874 = vmatpush.msra.mxu3 %v1861_v33  ;;  %1965 = vmatpush.msrb.mxu2 %v1960_v48  ;;  %v1952_v33 = vld [vmem:[#allocation4 + $0x4b0] sm:$0xff] }
 0x6dd   :  { %1895 = vmatpush.msrb.mxu0 %v1844_v35  ;;  %v1950_v35 = vld [vmem:[#allocation4 + $0x4a0] sm:$0xff] }
 0x6de   :  { %1875 = vmatpush.msra.mxu3 %v1860_v36  ;;  %1966 = vmatpush.msrb.mxu2 %v1959_v28  ;;  %v1949_v36 = vld [vmem:[#allocation4 + $0x498] sm:$0xff] }
 0x6df   :  { %1896 = vmatpush.msrb.mxu0 %v1843_v10  ;;  %v1948_v10 = vld [vmem:[#allocation4 + $0x490] sm:$0xff] }
 0x6e0   :  { %1876 = vmatpush.msra.mxu3 %v1859_v37  ;;  %1967 = vmatpush.msrb.mxu2 %v1958_v56 }
 0x6e1   :  { %1897 = vmatpush.msrb.mxu0 %v1842_v38 }
 0x6e2   :  { %1877 = vmatpush.msra.mxu3 %v1858_v39  ;;  %1968 = vmatpush.msrb.mxu2 %v1957_v57 }
 0x6e4   :  { %1969 = vmatpush.msrb.mxu2 %v1956_v53 }
 0x6e6   :  { %1970 = vmatpush.msrb.mxu2 %v1955_v61 }
 0x6e8   :  { %1971 = vmatpush.msrb.mxu2 %v1954_v31 }
 0x6ea   :  { %1972 = vmatpush.msrb.mxu2 %v1953_v32 }
 0x6ec   :  { %1973 = vmatpush.msrb.mxu2 %v1952_v33 }
 0x75a   :  { %v1659_v41 = vpop.f32.mrf.mxu2 }
 0x75b   :  { %v1660_v44 = vadd.f32 %v2131_v40, %v1659_v41  ;;  %v1841_v40 = vld [vmem:[#allocation4 + $0x328] sm:$0xff] }
 0x75c   :  { %1898 = vmatpush.msrb.mxu0 %v1841_v40  ;;  %v1947_v40 = vld [vmem:[#allocation4 + $0x488] sm:$0xff] }
 0x75d   :  { %2267 = vtanh.f32 %v1660_v44  ;;  %v1857_v44 = vld [vmem:[#allocation4 + $0x3a8] sm:$0xff] }
 0x75e   :  { %1878 = vmatpush.msra.mxu3 %v1857_v44  ;;  %v2134_v44 = vld [vmem:[%s3409_s3 + $0x5] ss:$0 sm:$0xff] }
 0x760   :  { %1879 = vmatpush.msra.mxu3 %v1856_v15  ;;  %v2019_v15 = vld [vmem:[#allocation4 + $0x548] sm:$0xff] }
 0x763   :  { %v3375_v45 = vpop.eup %2267 }
 0x764   :  { %1697 = vmatmul.f32.vlgmr.msrb.gmra.mxu3 %v3375_v45  ;;  %1736 = vmatmul.f32.vlgmr.msra.gmra.mxu0 %v3375_v45 }
 0x7e1   :  { %v1737_v49 = vpop.f32.mrf.mxu0 }
 0x7e2   :  { %v1738_v58 = vadd.f32 %v2132_v46, %v1737_v49  ;;  %v1840_v49 = vld [vmem:[#allocation4 + $0x320] sm:$0xff] }
 0x7e3   :  { %1899 = vmatpush.msrb.mxu0 %v1840_v49 }
 0x7e4   :  { %1740 = vmax.xlane.f32.xlu0 %v1738_v58 }
 0x7e5   :  { %1900 = vmatpush.msrb.mxu0 %v1839_v60 }
 0x7e7   :  { %1901 = vmatpush.msrb.mxu0 %v1838_v11  ;;  %v1698_v25 = vpop.f32.mrf.mxu3 }
 0x7e8   :  { %v1699_v26 = vadd.f32 %v2133_v21, %v1698_v25 }
 0x7e9   :  { %1902 = vmatpush.msrb.mxu0 %v1837_v3 }
 0x857   :  { %v1741_v4 = vpop.xlane.xlu0 %1740 }
 0x858   :  { %v1742_v5 = vsub.f32 %v1738_v58, %v1741_v4  ;;  %v1855_v4 = vld [vmem:[#allocation4 + $0x398] sm:$0xff] }
 0x859   :  { %1880 = vmatpush.msra.mxu3 %v1855_v4  ;;  %v2018_v4 = vld [vmem:[#allocation4 + $0x540] sm:$0xff] }
 0x85a   :  { %v1743_v8 = vmul.f32 1.442695, %v1742_v5  ;;  %v1836_v5 = vld [vmem:[#allocation4 + $0x300] sm:$0xff] }
 0x85b   :  { %1903 = vmatpush.msrb.mxu0 %v1836_v5  ;;  %v2017_v5 = vld [vmem:[#allocation4 + $0x538] sm:$0xff] }
 0x85c   :  { %2269 = vpow2.f32 %v1743_v8  ;;  %v1854_v8 = vld [vmem:[#allocation4 + $0x390] sm:$0xff] }
 0x85d   :  { %1881 = vmatpush.msra.mxu3 %v1854_v8  ;;  %v2016_v8 = vld [vmem:[#allocation4 + $0x530] sm:$0xff] }
 0x85f   :  { %1882 = vmatpush.msra.mxu3 %v1853_v7  ;;  %v2015_v7 = vld [vmem:[#allocation4 + $0x528] sm:$0xff] }
 0x861   :  { %1883 = vmatpush.msra.mxu3 %v1852_v43 }
 0x862   :  { %v3382_v27 = vpop.eup %2269 }
 0x863   :  { %1745 = vadd.xlane.f32.xlu0 %v3382_v27 }
 0x8d6   :  { %v1746_v34 = vpop.xlane.xlu0 %1745 }
 0x8d7   :  { %2271 = vrcp.f32 %v1746_v34  ;;  %v1758_v51 = vand.u32 2147483648, %v1746_v34  ;;  %v1756_v59 = vand.u32 2147483647, %v1746_v34  ;;  %vm1752_vm5 = vweird.f32 %v1746_v34 }
 0x8d8   :  { %2273 = vtanh.f32 %v1699_v26  ;;  %v2011_v26 = vld [vmem:[#allocation4 + $0x508] sm:$0xff] }
 0x8d9   :  { %v1759_v47 = vor.u32 1.1754944e-38, %v1758_v51  ;;  %vm1757_vm7 = vcmp.eq.f32.partialorder %v1756_v59, 8.507059e+37  ;;  %v2024_v59 = vld [vmem:[#allocation4 + $0x570] sm:$0xff] }
 0x8dd   :  { %v2272_v41 = vpop.eup %2271 }
 0x8de   :  { %v1748_v46 = vmul.f32 %v2272_v41, %v1746_v34  ;;  %vm1753_vm4 = vweird.f32 %v2272_v41  ;;  %v2274_v9 = vpop.eup %2273  ;;  %v1951_v34 = vld [vmem:[#allocation4 + $0x4a8] sm:$0xff] }
 0x8df   :  { %vm1754_vm6 = vmor %vm1752_vm5, %vm1753_vm4  ;;  %1974 = vmatpush.msrb.mxu2 %v1951_v34 }
 0x8e0   :  { %v1749_v58 = vsub.f32 1.0, %v1748_v46 }
 0x8e1   :  { %1975 = vmatpush.msrb.mxu2 %v1950_v35 }
 0x8e2   :  { %v1750_v50 = vmul.f32 %v2272_v41, %v1749_v58  ;;  %v2135_v58 = vld [vmem:[%s3409_s3 + $0x6] ss:$0 sm:$0xff] }
 0x8e3   :  { %1976 = vmatpush.msrb.mxu2 %v1949_v36 }
 0x8e4   :  { %v1751_v52 = vadd.f32 %v2272_v41, %v1750_v50  ;;  %v2025_v50 = vld [vmem:[#allocation4 + $0x578] sm:$0xff] }
 0x8e5   :  { %1977 = vmatpush.msrb.mxu2 %v1948_v10  ;;  %2028 = vmatpush.msrb.mxu3 %v2025_v50 }
 0x8e6   :  { %v1755_v20 = vsel %vm1754_vm6, %v2272_v41, %v1751_v52  ;;  %v1946_v41 = vld [vmem:[#allocation4 + $0x480] sm:$0xff]  ;;  %v2023_v52 = vld [vmem:[#allocation4 + $0x568] sm:$0xff] }
 0x8e7   :  { %v1760_v2 = vsel %vm1757_vm7, %v1759_v47, %v1755_v20  ;;  %1978 = vmatpush.msrb.mxu2 %v1947_v40  ;;  %2029 = vmatpush.msrb.mxu3 %v2024_v59  ;;  %v2022_v47 = vld [vmem:[#allocation4 + $0x560] sm:$0xff]  ;;  %v2021_v20 = vld [vmem:[#allocation4 + $0x558] sm:$0xff] }
 0x8e8   :  { %v1761_v13 = vmul.f32 %v3382_v27, %v1760_v2  ;;  %v1921_v27 = vld [vmem:[#allocation4 + $0x468] sm:$0xff]  ;;  %v2020_v2 = vld [vmem:[#allocation4 + $0x550] sm:$0xff] }
 0x8e9   :  { %1928 = vmatpush.msrb.mxu1 %v1921_v27  ;;  %1979 = vmatpush.msrb.mxu2 %v1946_v41 }
 0x8ea   :  { %1794 = vmatmul.f32.vlgmr.msra.gmra.mxu1 %v1761_v13  ;;  %1831 = vmatmul.f32.vlgmr.msra.gmra.mxu2 %v1761_v13 }
 0x8eb   :  { %1929 = vmatpush.msrb.mxu1 %v1920_v23  ;;  %2030 = vmatpush.msrb.mxu3 %v2023_v52  ;;  %v2013_v23 = vld [vmem:[#allocation4 + $0x518] sm:$0xff] }
 0x8ed   :  { %1930 = vmatpush.msrb.mxu1 %v1919_v19  ;;  %2031 = vmatpush.msrb.mxu3 %v2022_v47 }
 0x8ef   :  { %1931 = vmatpush.msrb.mxu1 %v1918_v14  ;;  %2032 = vmatpush.msrb.mxu3 %v2021_v20 }
 0x8f1   :  { %1932 = vmatpush.msrb.mxu1 %v1917_v29  ;;  %2033 = vmatpush.msrb.mxu3 %v2020_v2 }
 0x8f3   :  { %1933 = vmatpush.msrb.mxu1 %v1916_v42  ;;  %2034 = vmatpush.msrb.mxu3 %v2019_v15  ;;  %v2012_v42 = vld [vmem:[#allocation4 + $0x510] sm:$0xff] }
 0x8f5   :  { %1934 = vmatpush.msrb.mxu1 %v1915_v12  ;;  %2035 = vmatpush.msrb.mxu3 %v2018_v4  ;;  %v2010_v12 = vld [vmem:[#allocation4 + $0x500] sm:$0xff] }
 0x8f7   :  { %1935 = vmatpush.msrb.mxu1 %v1914_v17  ;;  %2036 = vmatpush.msrb.mxu3 %v2017_v5 }
 0x8f9   :  { %1936 = vmatpush.msrb.mxu1 %v1913_v55  ;;  %2037 = vmatpush.msrb.mxu3 %v2016_v8 }
 0x8fb   :  { %1937 = vmatpush.msrb.mxu1 %v1912_v63  ;;  %2038 = vmatpush.msrb.mxu3 %v2015_v7  ;;  %v2048_v63 = vld [vmem:[%s3409_s3 + $0x8] sm:$0x1] }
 0x8fc   :  { %vm2049_vm12 = vcmp.gt.f32.partialorder %v2048_v63, 0.0 }
 0x8fd   :  { %1938 = vmatpush.msrb.mxu1 %v1911_v62  ;;  %2039 = vmatpush.msrb.mxu3 %v2014_v30  ;;  %v2404_v62 = vmov 0  }
 0x8ff   :  { %1939 = vmatpush.msrb.mxu1 %v1910_v54  ;;  %2040 = vmatpush.msrb.mxu3 %v2013_v23  ;;  %v2051_v54 = vsel %vm2049_vm12, 1, %v2404_v62 }
 0x901   :  { %1940 = vmatpush.msrb.mxu1 %v1909_v0  ;;  %2041 = vmatpush.msrb.mxu3 %v2012_v42  ;;  %v2136_v0 = vld [vmem:[%s3409_s3 + $0x7] ss:$0 sm:$0xff] }
 0x903   :  { %2042 = vmatpush.msrb.mxu3 %v2011_v26 }
 0x905   :  { %2043 = vmatpush.msrb.mxu3 %v2010_v12 }
 0x967   :  { %v1795_v22 = vpop.f32.mrf.mxu1 }
 0x968   :  { %v1798_v18 = vmul.f32 %v3375_v45, %v1795_v22  ;;  %v1908_v45 = vld [vmem:[#allocation4 + $0x400] sm:$0xff] }
 0x969   :  { %1941 = vmatpush.msrb.mxu1 %v1908_v45  ;;  %v2052_v45 = vperm.slane %v2051_v54, 0 }
 0x96a   :  { %1904 = vmatmul.f32.vlgmr.msrb.gmra.mxu0 %v1798_v18 }
 0x96b   :  { %vm2053_vm13 = vcmp.eq.s32.totalorder %v2052_v45, 1 }
 0x96d   :  { %v1832_v16 = vpop.f32.mrf.mxu2 }
 0x96e   :  { %v1835_v6 = vmul.f32 %v2274_v9, %v1832_v16 }
 0x970   :  { %1884 = vmatmul.f32.vlgmr.msra.gmra.mxu3 %v1835_v6 }
 0x9e7   :  { %v1905_v37 = vpop.f32.mrf.mxu0 }
 0x9f3   :  { %v1885_v38 = vpop.f32.mrf.mxu3 }
 0x9f4   :  { %v1906_v39 = vadd.f32 %v1905_v37, %v1885_v38 }
 0x9f6   :  { %1942 = vmatmul.f32.vlgmr.msrb.gmra.mxu1 %v1906_v39 }
 0xa73   :  { %v1943_v46 = vpop.f32.mrf.mxu1 }
 0xa74   :  { %v1944_v49 = vadd.f32 %v2134_v44, %v1943_v46 }
 0xa76   :  { %2003 = vrot.lane.b32.xlu1 %v1944_v49, %s2397_s24  ;;  %1980 = vmatmul.f32.vlgmr.msrb.gmra.mxu2 %v1944_v49  ;;  %s2403_s24 = smov 96  }
 0xae8   :  { %v2004_v21 = vpop.permute.xlu1 %2003 }
 0xae9   :  { %v2005_v18 = vadd.f32 %v2004_v21, %v1906_v39 }
 0xaf9   :  { %v1981_v60 = vpop.f32.mrf.mxu2 }
 0xafa   :  { %v1982_v51 = vadd.f32 %v2135_v58, %v1981_v60 }
 0xafc   :  { %v2118_v11 = vmul.f32 -1.442695, %v1982_v51 }
 0xafe   :  { %2275 = vpow2.f32 %v2118_v11 }
 0xb04   :  { %v2276_v13 = vpop.eup %2275 }
 0xb05   :  { %v1987_v3 = vadd.f32 1.0, %v2276_v13 }
 0xb07   :  { %2277 = vrcp.f32 %v1987_v3  ;;  %v1999_v19 = vand.u32 2147483648, %v1987_v3  ;;  %v1997_v29 = vand.u32 2147483647, %v1987_v3  ;;  %vm1993_vm9 = vweird.f32 %v1987_v3 }
 0xb09   :  { %v2000_v22 = vor.u32 1.1754944e-38, %v1999_v19  ;;  %vm1998_vm11 = vcmp.eq.f32.partialorder %v1997_v29, 8.507059e+37 }
 0xb0d   :  { %v2278_v43 = vpop.eup %2277 }
 0xb0e   :  { %v1989_v24 = vmul.f32 %v2278_v43, %v1987_v3  ;;  %vm1994_vm8 = vweird.f32 %v2278_v43 }
 0xb0f   :  { %vm1995_vm10 = vmor %vm1993_vm9, %vm1994_vm8 }
 0xb10   :  { %v1990_v27 = vsub.f32 1.0, %v1989_v24 }
 0xb12   :  { %v1991_v14 = vmul.f32 %v2278_v43, %v1990_v27 }
 0xb14   :  { %v1992_v25 = vadd.f32 %v2278_v43, %v1991_v14 }
 0xb16   :  { %v1996_v9 = vsel %vm1995_vm10, %v2278_v43, %v1992_v25 }
 0xb17   :  { %v2001_v16 = vsel %vm1998_vm11, %v2000_v22, %v1996_v9 }
 0xb18   :  { %v2006_v6 = vmul.f32 %v2005_v18, %v2001_v16 }
 0xb1a   :  { %2007 = vrot.lane.b32.xlu1 %v2006_v6, %s2403_s24 }
 0xb8c   :  { %v2008_v17 = vpop.permute.xlu1 %2007 }
 0xb8d   :  { %v2009_v55 = vadd.f32 %v2008_v17, %v2006_v6 }
 0xb8f   :  { %2044 = vmatmul.f32.vlgmr.msrb.gmra.mxu3 %v2009_v55 }
 0xc12   :  { %v2045_v1 = vpop.f32.mrf.mxu3 }
 0xc13   :  { %v2046_v48 = vadd.f32 %v2136_v0, %v2045_v1 }
 0xc15   :  { %v2050_v28 = vmax.f32 %v2046_v48, 0.0 }
 0xc17   :  { %v2054_v56 = vsel %vm2053_vm13, %v2050_v28, %v2046_v48 }
 0xc18   :  { %2055 = vst [vmem:[%s3410_s4] sm:$0xff] %v2054_v56 }
 0xc19   :  { %2060 = vsyncpa [#allocation3], 1 }
 0xc1a   :  { %2061 = vsyncpa [#allocation5], 1 }

</bundles_post_ra>
